<compile_context>
chip_gen: v7x
topology: tpu7x:2x2x1
jax: 0.10.0
libtpu: 0.0.40
codegen_flags: <defaults>
</compile_context>

<pallas_src>
import functools
import math

import jax
import jax.numpy as jnp
from jax.experimental import pallas as pl
from jax.experimental.pallas import tpu as pltpu


# ----------------------------- config ---------------------------------------
DIM = 128          # model dim
HEAD_DIM = 64      # head_dim (% 4 == 0)
NHEADS = DIM // HEAD_DIM
MLP_DIM = 256
SEQ_LEN = 64
WINDOW = 16
ROPE_BASE = 1024.0
BATCH = 2
EPS = 1e-6
NEG_INF = -1e30


# ------------------------- in-kernel helpers --------------------------------
def _rmsnorm(x):
    ms = jnp.mean(x * x, axis=-1, keepdims=True)
    return x * jax.lax.rsqrt(ms + EPS)


# ------------------------------ kernel ---------------------------------------
def decoder_layer_kernel(x_ref, qkvw_ref, bhead_ref, cos_ref, sin_ref,
                         qkmask_ref, vmask_ref, bias_ref,
                         ow_ref, w1_ref, w2_ref, o_ref,
                         *, nheads, head_dim, nb, seq_len):
    D = nheads * head_dim
    M = nb * seq_len
    x = x_ref[...].reshape(M, D)                        # (M, D) f32

    # ---- attention branch ------------------------------------------------
    xn = _rmsnorm(x)
    qkv = jnp.dot(xn.astype(jnp.bfloat16), qkvw_ref[...],
                  preferred_element_type=jnp.float32)   # (M, 3D), f32 acc

    q = qkv[:, :D]            # permuted (half-major) head layout
    k = qkv[:, D:2 * D]       # permuted (half-major) head layout
    v = qkv[:, 2 * D:]        # original (head-major) layout

    # per-head RMSNorm: sum-of-squares per head via block-broadcast matmul
    bhead = bhead_ref[...]                              # (D, D) 0/1, f32
    inv_hd = 1.0 / head_dim
    q_ss = jnp.dot(q * q, bhead, preferred_element_type=jnp.float32)
    k_ss = jnp.dot(k * k, bhead, preferred_element_type=jnp.float32)
    qn = q * jax.lax.rsqrt(q_ss * inv_hd + EPS)
    kn = k * jax.lax.rsqrt(k_ss * inv_hd + EPS)

    # RoPE on the full slab (permuted layout): y = x*cos + roll(x, D/2)*sin±
    cos = cos_ref[...]
    sin = sin_ref[...]
    qr = qn * cos + pltpu.roll(qn, D // 2, axis=1) * sin
    kr = kn * cos + pltpu.roll(kn, D // 2, axis=1) * sin

    krT = kr.T.astype(jnp.bfloat16)                     # (D, M), shared by heads
    bias = bias_ref[...]                                # (M, M) additive mask
    scale = 1.0 / math.sqrt(head_dim)

    attn = jnp.zeros((M, D), jnp.float32)
    for h in range(nheads):
        qh = (qr * qkmask_ref[h:h + 1, :]).astype(jnp.bfloat16)
        s = jnp.dot(qh, krT, preferred_element_type=jnp.float32) * scale + bias
        m = jnp.max(s, axis=-1, keepdims=True)
        p = jnp.exp(s - m)                              # masked entries -> exactly 0
        p = p * pl.reciprocal(jnp.sum(p, axis=-1, keepdims=True), approx=True)
        vh = (v * vmask_ref[h:h + 1, :]).astype(jnp.bfloat16)
        attn = attn + jnp.dot(p.astype(jnp.bfloat16), vh,
                              preferred_element_type=jnp.float32)

    x = x + jnp.dot(attn.astype(jnp.bfloat16), ow_ref[...],
                    preferred_element_type=jnp.float32)

    # ---- MLP branch (RMSNorm -> Linear -> ReLU^2 -> Linear) ---------------
    xn2 = _rmsnorm(x)
    h1 = jnp.dot(xn2.astype(jnp.bfloat16), w1_ref[...],
                 preferred_element_type=jnp.float32)
    h1 = jnp.maximum(h1, 0.0)
    h1 = h1 * h1
    x = x + jnp.dot(h1.astype(jnp.bfloat16), w2_ref[...],
                    preferred_element_type=jnp.float32)

    o_ref[...] = x.reshape(nb, seq_len, D)


# --------------------------- wrapper -----------------------------------------
def decoder_layer(x, qkvw, bhead, cosM, sinM, qkmask, vmask, bias,
                  ow, w1, w2, *, nb):
    N, T, D = x.shape
    assert N % nb == 0
    M = nb * T
    kernel = functools.partial(decoder_layer_kernel, nheads=NHEADS,
                               head_dim=HEAD_DIM, nb=nb, seq_len=T)
    return pl.pallas_call(
        kernel,
        out_shape=jax.ShapeDtypeStruct((N, T, D), x.dtype),
        grid=(N // nb,),
        in_specs=[
            pl.BlockSpec((nb, T, D), lambda n: (n, 0, 0)),
            pl.BlockSpec((D, 3 * D), lambda n: (0, 0)),
            pl.BlockSpec((D, D), lambda n: (0, 0)),
            pl.BlockSpec((M, D), lambda n: (0, 0)),
            pl.BlockSpec((M, D), lambda n: (0, 0)),
            pl.BlockSpec((NHEADS, D), lambda n: (0, 0)),
            pl.BlockSpec((NHEADS, D), lambda n: (0, 0)),
            pl.BlockSpec((M, M), lambda n: (0, 0)),
            pl.BlockSpec((D, D), lambda n: (0, 0)),
            pl.BlockSpec((D, MLP_DIM), lambda n: (0, 0)),
            pl.BlockSpec((MLP_DIM, D), lambda n: (0, 0)),
        ],
        out_specs=pl.BlockSpec((nb, T, D), lambda n: (n, 0, 0)),
        compiler_params=pltpu.CompilerParams(
            dimension_semantics=("parallel",)),
    )(x, qkvw, bhead, cosM, sinM, qkmask, vmask, bias, ow, w1, w2)


# ------------------------- pure-JAX f32 reference ----------------------------
def reference(x, qkv_w_t, cos, sin, ow_t, w1_t, w2_t):
    N, T, D = x.shape
    xn = _rmsnorm(x)
    qkv = xn @ qkv_w_t                                        # (N, T, 3D)
    qkv = qkv.reshape(N, T, 3 * NHEADS, HEAD_DIM)
    q, k, v = qkv[:, :, :NHEADS], qkv[:, :, NHEADS:2 * NHEADS], qkv[:, :, 2 * NHEADS:]
    q, k = _rmsnorm(q), _rmsnorm(k)

    def rope4(a):
        half = HEAD_DIM // 2
        a1, a2 = a[..., :half], a[..., half:]
        c = cos[None, :, None, :]
        s = sin[None, :, None, :]
        return jnp.concatenate([a1 * c + a2 * s, -a1 * s + a2 * c], axis=-1)

    q, k = rope4(q), rope4(k)
    scale = 1.0 / math.sqrt(HEAD_DIM)
    scores = jnp.einsum("nqhd,nkhd->nhqk", q, k) * scale
    qi = jnp.arange(T)[:, None]
    ki = jnp.arange(T)[None, :]
    mask = (ki <= qi) & (qi < ki + WINDOW)
    scores = jnp.where(mask[None, None], scores, NEG_INF)
    p = jax.nn.softmax(scores, axis=-1)
    p = jnp.where(mask[None, None], p, 0.0)
    attn = jnp.einsum("nhqk,nkhd->nqhd", p, v).reshape(N, T, D)
    x = x + attn @ ow_t
    h1 = jnp.maximum(_rmsnorm(x) @ w1_t, 0.0) ** 2
    return x + h1 @ w2_t


# ------------------------------- main -----------------------------------------
if __name__ == "__main__":
    key = jax.random.PRNGKey(0)
    k_x, k_qkv, k_o, k_w1, k_w2 = jax.random.split(key, 5)

    x = jax.random.normal(k_x, (BATCH, SEQ_LEN, DIM), dtype=jnp.float32)

    # qkv_w: (3, dim, dim) / sqrt(dim) / 2, used as x @ flatten(0,1).T
    qkv_w = jax.random.normal(k_qkv, (3, DIM, DIM), dtype=jnp.float32) / math.sqrt(DIM) / 2
    qkv_w_t = qkv_w.reshape(3 * DIM, DIM).T                  # (D, 3D)  [q | k | v]

    # o_proj / mlp output are zero_init in the module; use small deterministic
    # random values so the kernel path is non-trivial.
    ow_t = (jax.random.normal(k_o, (DIM, DIM), dtype=jnp.float32) * 0.02).T
    w1_t = (jax.random.normal(k_w1, (MLP_DIM, DIM), dtype=jnp.float32) / math.sqrt(DIM)).T
    w2_t = (jax.random.normal(k_w2, (DIM, MLP_DIM), dtype=jnp.float32) * 0.02).T

    # RoPE tables (module buffers): freqs padded with zeros to head_dim//2
    freqs = (1.0 / ROPE_BASE) ** jnp.linspace(0.0, 1.0, HEAD_DIM // 4, dtype=jnp.float32)
    freqs_d = jnp.concatenate([freqs, jnp.zeros((HEAD_DIM // 4,), jnp.float32)])
    theta = jnp.arange(SEQ_LEN, dtype=jnp.float32)[:, None] * freqs_d[None, :]  # (T, hd//2)
    cos = jnp.cos(theta)
    sin = jnp.sin(theta)

    # ----------------- kernel-side prepacking (host, one-time) -----------------
    # Sequences per grid step so the matmul M dim is ~128 rows.
    NB = max(1, min(BATCH, 128 // SEQ_LEN))
    while BATCH % NB:
        NB -= 1
    M = NB * SEQ_LEN

    half = HEAD_DIM // 2
    # half-major permutation of q/k columns: [x1 of all heads | x2 of all heads]
    perm = jnp.array([h * HEAD_DIM + p * half + d
                      for p in range(2) for h in range(NHEADS) for d in range(half)],
                     dtype=jnp.int32)
    wq = qkv_w_t[:, :DIM][:, perm]
    wk = qkv_w_t[:, DIM:2 * DIM][:, perm]
    wv = qkv_w_t[:, 2 * DIM:]
    qkvw_bf16 = jnp.concatenate([wq, wk, wv], axis=1).astype(jnp.bfloat16)  # (D, 3D)

    col = jnp.arange(DIM)
    perm_head = (col % (DIM // 2)) // half      # head id of a permuted column
    orig_head = col // HEAD_DIM                 # head id of an original column
    bhead = (perm_head[:, None] == perm_head[None, :]).astype(jnp.float32)   # (D, D)
    qkmask = (jnp.arange(NHEADS)[:, None] == perm_head[None, :]).astype(jnp.float32)
    vmask = (jnp.arange(NHEADS)[:, None] == orig_head[None, :]).astype(jnp.float32)

    # full-width RoPE tables in permuted layout, tiled over the NB stacked seqs
    cos_row = jnp.tile(cos, (1, 2 * NHEADS))                                 # (T, D)
    sin_row = jnp.concatenate([jnp.tile(sin, (1, NHEADS)),
                               -jnp.tile(sin, (1, NHEADS))], axis=1)         # (T, D)
    cosM = jnp.tile(cos_row, (NB, 1))                                        # (M, D)
    sinM = jnp.tile(sin_row, (NB, 1))

    # additive attention mask: same stacked sequence + sliding-window causal
    r = jnp.arange(M)
    seq_r = r // SEQ_LEN
    t_r = r % SEQ_LEN
    same_seq = seq_r[:, None] == seq_r[None, :]
    causal = (t_r[None, :] <= t_r[:, None]) & (t_r[:, None] < t_r[None, :] + WINDOW)
    bias = jnp.where(same_seq & causal, 0.0, NEG_INF).astype(jnp.float32)    # (M, M)

    ow_bf16 = ow_t.astype(jnp.bfloat16)
    w1_bf16 = w1_t.astype(jnp.bfloat16)
    w2_bf16 = w2_t.astype(jnp.bfloat16)

    out = decoder_layer(x, qkvw_bf16, bhead, cosM, sinM, qkmask, vmask, bias,
                        ow_bf16, w1_bf16, w2_bf16, nb=NB)
    out = jax.block_until_ready(out)

    ref = reference(x, qkv_w_t, cos, sin, ow_t, w1_t, w2_t)
    assert out.shape == (BATCH, SEQ_LEN, DIM)
    max_err = jnp.max(jnp.abs(out - ref))
    # bf16 MXU operands vs. the pure-f32 reference -> relaxed tolerance
    assert jnp.allclose(out, ref, rtol=5e-2, atol=5e-2), f"max abs err = {max_err}"

    print("KERNEL_OK")
</pallas_src>

<mosaic_0001>
module attributes {stable_mosaic.version = 11 : i64} {
  func.func @decoder_layer_kernel(%arg0: i32, %arg1: memref<2x64x128xf32, #tpu.memory_space<vmem>>, %arg2: memref<128x384xbf16, #tpu.memory_space<vmem>>, %arg3: memref<128x128xf32, #tpu.memory_space<vmem>>, %arg4: memref<128x128xf32, #tpu.memory_space<vmem>>, %arg5: memref<128x128xf32, #tpu.memory_space<vmem>>, %arg6: memref<2x128xf32, #tpu.memory_space<vmem>>, %arg7: memref<2x128xf32, #tpu.memory_space<vmem>>, %arg8: memref<128x128xf32, #tpu.memory_space<vmem>>, %arg9: memref<128x128xbf16, #tpu.memory_space<vmem>>, %arg10: memref<128x256xbf16, #tpu.memory_space<vmem>>, %arg11: memref<256x128xbf16, #tpu.memory_space<vmem>>, %arg12: memref<2x64x128xf32, #tpu.memory_space<vmem>>) attributes {dimension_semantics = [#tpu.dimension_semantics<parallel>], iteration_bounds = array<i64: 1>, scalar_prefetch = 0 : i64, scratch_operands = 0 : i64, tpu.core_type = #tpu.core_type<tc>, window_params = [{transform_indices = @transform_0, window_bounds = array<i64: 2, 64, 128>}, {pipeline_mode = #tpu.pipeline_mode<synchronous>, transform_indices = @transform_1, window_bounds = array<i64: 128, 384>}, {pipeline_mode = #tpu.pipeline_mode<synchronous>, transform_indices = @transform_2, window_bounds = array<i64: 128, 128>}, {pipeline_mode = #tpu.pipeline_mode<synchronous>, transform_indices = @transform_3, window_bounds = array<i64: 128, 128>}, {pipeline_mode = #tpu.pipeline_mode<synchronous>, transform_indices = @transform_4, window_bounds = array<i64: 128, 128>}, {pipeline_mode = #tpu.pipeline_mode<synchronous>, transform_indices = @transform_5, window_bounds = array<i64: 2, 128>}, {pipeline_mode = #tpu.pipeline_mode<synchronous>, transform_indices = @transform_6, window_bounds = array<i64: 2, 128>}, {pipeline_mode = #tpu.pipeline_mode<synchronous>, transform_indices = @transform_7, window_bounds = array<i64: 128, 128>}, {pipeline_mode = #tpu.pipeline_mode<synchronous>, transform_indices = @transform_8, window_bounds = array<i64: 128, 128>}, {pipeline_mode = #tpu.pipeline_mode<synchronous>, transform_indices = @transform_9, window_bounds = array<i64: 128, 256>}, {pipeline_mode = #tpu.pipeline_mode<synchronous>, transform_indices = @transform_10, window_bounds = array<i64: 256, 128>}, {transform_indices = @transform_11, window_bounds = array<i64: 2, 64, 128>}]} {
    %c0 = arith.constant 0 : index
    %c0_0 = arith.constant 0 : index
    %c0_1 = arith.constant 0 : index
    %0 = vector.load %arg1[%c0, %c0_0, %c0_1] : memref<2x64x128xf32, #tpu.memory_space<vmem>>, vector<2x64x128xf32>
    %1 = vector.shape_cast %0 : vector<2x64x128xf32> to vector<128x128xf32>
    %2 = arith.mulf %1, %1 : vector<128x128xf32>
    %cst = arith.constant dense<0.000000e+00> : vector<128xf32>
    %3 = vector.multi_reduction <add>, %2, %cst [1] : vector<128x128xf32> to vector<128xf32>
    %4 = vector.shape_cast %3 : vector<128xf32> to vector<128x1xf32>
    %cst_2 = arith.constant 1.280000e+02 : f32
    %5 = vector.broadcast %cst_2 : f32 to vector<128x1xf32>
    %6 = arith.divf %4, %5 : vector<128x1xf32>
    %cst_3 = arith.constant 9.99999997E-7 : f32
    %7 = vector.broadcast %cst_3 : f32 to vector<128x1xf32>
    %8 = arith.addf %6, %7 : vector<128x1xf32>
    %9 = math.rsqrt %8 : vector<128x1xf32>
    %10 = vector.broadcast %9 : vector<128x1xf32> to vector<128x128xf32>
    %11 = arith.mulf %1, %10 : vector<128x128xf32>
    %12 = arith.truncf %11 : vector<128x128xf32> to vector<128x128xbf16>
    %c0_4 = arith.constant 0 : index
    %c0_5 = arith.constant 0 : index
    %13 = vector.load %arg2[%c0_4, %c0_5] : memref<128x384xbf16, #tpu.memory_space<vmem>>, vector<128x384xbf16>
    %cst_6 = arith.constant dense<0.000000e+00> : vector<128x384xf32>
    %14 = tpu.matmul %12, %13, %cst_6 {dimension_numbers = #tpu.dot_dimension_numbers<[1], [0], [0], [1], [0, 0, 1, 1], [], []>} : vector<128x128xbf16>, vector<128x384xbf16>, vector<128x384xf32> -> vector<128x384xf32>
    %15 = vector.extract_strided_slice %14 {offsets = [0, 0], sizes = [128, 128], strides = [1, 1]} : vector<128x384xf32> to vector<128x128xf32>
    %16 = vector.extract_strided_slice %14 {offsets = [0, 128], sizes = [128, 128], strides = [1, 1]} : vector<128x384xf32> to vector<128x128xf32>
    %17 = vector.extract_strided_slice %14 {offsets = [0, 256], sizes = [128, 128], strides = [1, 1]} : vector<128x384xf32> to vector<128x128xf32>
    %c0_7 = arith.constant 0 : index
    %c0_8 = arith.constant 0 : index
    %18 = vector.load %arg3[%c0_7, %c0_8] : memref<128x128xf32, #tpu.memory_space<vmem>>, vector<128x128xf32>
    %19 = arith.mulf %15, %15 : vector<128x128xf32>
    %cst_9 = arith.constant dense<0.000000e+00> : vector<128x128xf32>
    %20 = tpu.matmul %19, %18, %cst_9 {dimension_numbers = #tpu.dot_dimension_numbers<[1], [0], [0], [1], [0, 0, 1, 1], [], []>} : vector<128x128xf32>, vector<128x128xf32>, vector<128x128xf32> -> vector<128x128xf32>
    %21 = arith.mulf %16, %16 : vector<128x128xf32>
    %cst_10 = arith.constant dense<0.000000e+00> : vector<128x128xf32>
    %22 = tpu.matmul %21, %18, %cst_10 {dimension_numbers = #tpu.dot_dimension_numbers<[1], [0], [0], [1], [0, 0, 1, 1], [], []>} : vector<128x128xf32>, vector<128x128xf32>, vector<128x128xf32> -> vector<128x128xf32>
    %cst_11 = arith.constant 1.562500e-02 : f32
    %23 = vector.broadcast %cst_11 : f32 to vector<128x128xf32>
    %24 = arith.mulf %20, %23 : vector<128x128xf32>
    %cst_12 = arith.constant 9.99999997E-7 : f32
    %25 = vector.broadcast %cst_12 : f32 to vector<128x128xf32>
    %26 = arith.addf %24, %25 : vector<128x128xf32>
    %27 = math.rsqrt %26 : vector<128x128xf32>
    %28 = arith.mulf %15, %27 : vector<128x128xf32>
    %cst_13 = arith.constant 1.562500e-02 : f32
    %29 = vector.broadcast %cst_13 : f32 to vector<128x128xf32>
    %30 = arith.mulf %22, %29 : vector<128x128xf32>
    %cst_14 = arith.constant 9.99999997E-7 : f32
    %31 = vector.broadcast %cst_14 : f32 to vector<128x128xf32>
    %32 = arith.addf %30, %31 : vector<128x128xf32>
    %33 = math.rsqrt %32 : vector<128x128xf32>
    %34 = arith.mulf %16, %33 : vector<128x128xf32>
    %c0_15 = arith.constant 0 : index
    %c0_16 = arith.constant 0 : index
    %35 = vector.load %arg4[%c0_15, %c0_16] : memref<128x128xf32, #tpu.memory_space<vmem>>, vector<128x128xf32>
    %c0_17 = arith.constant 0 : index
    %c0_18 = arith.constant 0 : index
    %36 = vector.load %arg5[%c0_17, %c0_18] : memref<128x128xf32, #tpu.memory_space<vmem>>, vector<128x128xf32>
    %37 = arith.mulf %28, %35 : vector<128x128xf32>
    %c64_i32 = arith.constant 64 : i32
    %38 = tpu.dynamic_rotate %28 by %c64_i32 dim 1 : vector<128x128xf32>, i32 -> vector<128x128xf32>
    %39 = arith.mulf %38, %36 : vector<128x128xf32>
    %40 = arith.addf %37, %39 : vector<128x128xf32>
    %41 = arith.mulf %34, %35 : vector<128x128xf32>
    %c64_i32_19 = arith.constant 64 : i32
    %42 = tpu.dynamic_rotate %34 by %c64_i32_19 dim 1 : vector<128x128xf32>, i32 -> vector<128x128xf32>
    %43 = arith.mulf %42, %36 : vector<128x128xf32>
    %44 = arith.addf %41, %43 : vector<128x128xf32>
    %45 = tpu.transpose %44, [1, 0] : vector<128x128xf32> -> vector<128x128xf32>
    %46 = arith.truncf %45 : vector<128x128xf32> to vector<128x128xbf16>
    %c0_20 = arith.constant 0 : index
    %c0_21 = arith.constant 0 : index
    %47 = vector.load %arg8[%c0_20, %c0_21] : memref<128x128xf32, #tpu.memory_space<vmem>>, vector<128x128xf32>
    %cst_22 = arith.constant 0.000000e+00 : f32
    %48 = vector.broadcast %cst_22 : f32 to vector<128x128xf32>
    %c0_23 = arith.constant 0 : index
    %c0_24 = arith.constant 0 : index
    %49 = vector.load %arg6[%c0_23, %c0_24] : memref<2x128xf32, #tpu.memory_space<vmem>>, vector<1x128xf32>
    %50 = vector.broadcast %49 : vector<1x128xf32> to vector<128x128xf32>
    %51 = arith.mulf %40, %50 : vector<128x128xf32>
    %52 = arith.truncf %51 : vector<128x128xf32> to vector<128x128xbf16>
    %cst_25 = arith.constant dense<0.000000e+00> : vector<128x128xf32>
    %53 = tpu.matmul %52, %46, %cst_25 {dimension_numbers = #tpu.dot_dimension_numbers<[1], [0], [0], [1], [0, 0, 1, 1], [], []>} : vector<128x128xbf16>, vector<128x128xbf16>, vector<128x128xf32> -> vector<128x128xf32>
    %cst_26 = arith.constant 1.250000e-01 : f32
    %54 = vector.broadcast %cst_26 : f32 to vector<128x128xf32>
    %55 = arith.mulf %53, %54 : vector<128x128xf32>
    %56 = arith.addf %55, %47 : vector<128x128xf32>
    %cst_27 = arith.constant dense<0xFF800000> : vector<128xf32>
    %57 = vector.multi_reduction <maximumf>, %56, %cst_27 [1] : vector<128x128xf32> to vector<128xf32>
    %58 = vector.shape_cast %57 : vector<128xf32> to vector<128x1xf32>
    %59 = vector.broadcast %58 : vector<128x1xf32> to vector<128x128xf32>
    %60 = arith.subf %56, %59 : vector<128x128xf32>
    %61 = math.exp %60 : vector<128x128xf32>
    %cst_28 = arith.constant dense<0.000000e+00> : vector<128xf32>
    %62 = vector.multi_reduction <add>, %61, %cst_28 [1] : vector<128x128xf32> to vector<128xf32>
    %63 = vector.shape_cast %62 : vector<128xf32> to vector<128x1xf32>
    %64 = tpu.reciprocal %63 {approx = true} : vector<128x1xf32> -> vector<128x1xf32>
    %65 = vector.broadcast %64 : vector<128x1xf32> to vector<128x128xf32>
    %66 = arith.mulf %61, %65 : vector<128x128xf32>
    %c0_29 = arith.constant 0 : index
    %c0_30 = arith.constant 0 : index
    %67 = vector.load %arg7[%c0_29, %c0_30] : memref<2x128xf32, #tpu.memory_space<vmem>>, vector<1x128xf32>
    %68 = vector.broadcast %67 : vector<1x128xf32> to vector<128x128xf32>
    %69 = arith.mulf %17, %68 : vector<128x128xf32>
    %70 = arith.truncf %69 : vector<128x128xf32> to vector<128x128xbf16>
    %71 = arith.truncf %66 : vector<128x128xf32> to vector<128x128xbf16>
    %cst_31 = arith.constant dense<0.000000e+00> : vector<128x128xf32>
    %72 = tpu.matmul %71, %70, %cst_31 {dimension_numbers = #tpu.dot_dimension_numbers<[1], [0], [0], [1], [0, 0, 1, 1], [], []>} : vector<128x128xbf16>, vector<128x128xbf16>, vector<128x128xf32> -> vector<128x128xf32>
    %73 = arith.addf %48, %72 : vector<128x128xf32>
    %c1 = arith.constant 1 : index
    %c0_32 = arith.constant 0 : index
    %74 = vector.load %arg6[%c1, %c0_32] : memref<2x128xf32, #tpu.memory_space<vmem>>, vector<1x128xf32>
    %75 = vector.broadcast %74 : vector<1x128xf32> to vector<128x128xf32>
    %76 = arith.mulf %40, %75 : vector<128x128xf32>
    %77 = arith.truncf %76 : vector<128x128xf32> to vector<128x128xbf16>
    %cst_33 = arith.constant dense<0.000000e+00> : vector<128x128xf32>
    %78 = tpu.matmul %77, %46, %cst_33 {dimension_numbers = #tpu.dot_dimension_numbers<[1], [0], [0], [1], [0, 0, 1, 1], [], []>} : vector<128x128xbf16>, vector<128x128xbf16>, vector<128x128xf32> -> vector<128x128xf32>
    %cst_34 = arith.constant 1.250000e-01 : f32
    %79 = vector.broadcast %cst_34 : f32 to vector<128x128xf32>
    %80 = arith.mulf %78, %79 : vector<128x128xf32>
    %81 = arith.addf %80, %47 : vector<128x128xf32>
    %cst_35 = arith.constant dense<0xFF800000> : vector<128xf32>
    %82 = vector.multi_reduction <maximumf>, %81, %cst_35 [1] : vector<128x128xf32> to vector<128xf32>
    %83 = vector.shape_cast %82 : vector<128xf32> to vector<128x1xf32>
    %84 = vector.broadcast %83 : vector<128x1xf32> to vector<128x128xf32>
    %85 = arith.subf %81, %84 : vector<128x128xf32>
    %86 = math.exp %85 : vector<128x128xf32>
    %cst_36 = arith.constant dense<0.000000e+00> : vector<128xf32>
    %87 = vector.multi_reduction <add>, %86, %cst_36 [1] : vector<128x128xf32> to vector<128xf32>
    %88 = vector.shape_cast %87 : vector<128xf32> to vector<128x1xf32>
    %89 = tpu.reciprocal %88 {approx = true} : vector<128x1xf32> -> vector<128x1xf32>
    %90 = vector.broadcast %89 : vector<128x1xf32> to vector<128x128xf32>
    %91 = arith.mulf %86, %90 : vector<128x128xf32>
    %c1_37 = arith.constant 1 : index
    %c0_38 = arith.constant 0 : index
    %92 = vector.load %arg7[%c1_37, %c0_38] : memref<2x128xf32, #tpu.memory_space<vmem>>, vector<1x128xf32>
    %93 = vector.broadcast %92 : vector<1x128xf32> to vector<128x128xf32>
    %94 = arith.mulf %17, %93 : vector<128x128xf32>
    %95 = arith.truncf %94 : vector<128x128xf32> to vector<128x128xbf16>
    %96 = arith.truncf %91 : vector<128x128xf32> to vector<128x128xbf16>
    %cst_39 = arith.constant dense<0.000000e+00> : vector<128x128xf32>
    %97 = tpu.matmul %96, %95, %cst_39 {dimension_numbers = #tpu.dot_dimension_numbers<[1], [0], [0], [1], [0, 0, 1, 1], [], []>} : vector<128x128xbf16>, vector<128x128xbf16>, vector<128x128xf32> -> vector<128x128xf32>
    %98 = arith.addf %73, %97 : vector<128x128xf32>
    %99 = arith.truncf %98 : vector<128x128xf32> to vector<128x128xbf16>
    %c0_40 = arith.constant 0 : index
    %c0_41 = arith.constant 0 : index
    %100 = vector.load %arg9[%c0_40, %c0_41] : memref<128x128xbf16, #tpu.memory_space<vmem>>, vector<128x128xbf16>
    %cst_42 = arith.constant dense<0.000000e+00> : vector<128x128xf32>
    %101 = tpu.matmul %99, %100, %cst_42 {dimension_numbers = #tpu.dot_dimension_numbers<[1], [0], [0], [1], [0, 0, 1, 1], [], []>} : vector<128x128xbf16>, vector<128x128xbf16>, vector<128x128xf32> -> vector<128x128xf32>
    %102 = arith.addf %1, %101 : vector<128x128xf32>
    %103 = arith.mulf %102, %102 : vector<128x128xf32>
    %cst_43 = arith.constant dense<0.000000e+00> : vector<128xf32>
    %104 = vector.multi_reduction <add>, %103, %cst_43 [1] : vector<128x128xf32> to vector<128xf32>
    %105 = vector.shape_cast %104 : vector<128xf32> to vector<128x1xf32>
    %cst_44 = arith.constant 1.280000e+02 : f32
    %106 = vector.broadcast %cst_44 : f32 to vector<128x1xf32>
    %107 = arith.divf %105, %106 : vector<128x1xf32>
    %cst_45 = arith.constant 9.99999997E-7 : f32
    %108 = vector.broadcast %cst_45 : f32 to vector<128x1xf32>
    %109 = arith.addf %107, %108 : vector<128x1xf32>
    %110 = math.rsqrt %109 : vector<128x1xf32>
    %111 = vector.broadcast %110 : vector<128x1xf32> to vector<128x128xf32>
    %112 = arith.mulf %102, %111 : vector<128x128xf32>
    %113 = arith.truncf %112 : vector<128x128xf32> to vector<128x128xbf16>
    %c0_46 = arith.constant 0 : index
    %c0_47 = arith.constant 0 : index
    %114 = vector.load %arg10[%c0_46, %c0_47] : memref<128x256xbf16, #tpu.memory_space<vmem>>, vector<128x256xbf16>
    %cst_48 = arith.constant dense<0.000000e+00> : vector<128x256xf32>
    %115 = tpu.matmul %113, %114, %cst_48 {dimension_numbers = #tpu.dot_dimension_numbers<[1], [0], [0], [1], [0, 0, 1, 1], [], []>} : vector<128x128xbf16>, vector<128x256xbf16>, vector<128x256xf32> -> vector<128x256xf32>
    %cst_49 = arith.constant 0.000000e+00 : f32
    %116 = vector.broadcast %cst_49 : f32 to vector<128x256xf32>
    %117 = arith.maximumf %115, %116 : vector<128x256xf32>
    %118 = arith.mulf %117, %117 : vector<128x256xf32>
    %119 = arith.truncf %118 : vector<128x256xf32> to vector<128x256xbf16>
    %c0_50 = arith.constant 0 : index
    %c0_51 = arith.constant 0 : index
    %120 = vector.load %arg11[%c0_50, %c0_51] : memref<256x128xbf16, #tpu.memory_space<vmem>>, vector<256x128xbf16>
    %cst_52 = arith.constant dense<0.000000e+00> : vector<128x128xf32>
    %121 = tpu.matmul %119, %120, %cst_52 {dimension_numbers = #tpu.dot_dimension_numbers<[1], [0], [0], [1], [0, 0, 1, 1], [], []>} : vector<128x256xbf16>, vector<256x128xbf16>, vector<128x128xf32> -> vector<128x128xf32>
    %122 = arith.addf %102, %121 : vector<128x128xf32>
    %123 = vector.shape_cast %122 : vector<128x128xf32> to vector<2x64x128xf32>
    %c0_53 = arith.constant 0 : index
    %c0_54 = arith.constant 0 : index
    %c0_55 = arith.constant 0 : index
    %124 = vector.load %arg12[%c0_53, %c0_54, %c0_55] : memref<2x64x128xf32, #tpu.memory_space<vmem>>, vector<2x64x128xf32>
    tpu.vector_store %arg12[%c0_53, %c0_54, %c0_55], %123 {strides = array<i32>} : memref<2x64x128xf32, #tpu.memory_space<vmem>>, vector<2x64x128xf32>,
    return
  }
  func.func @transform_0(%arg0: i32) -> (i32, i32, i32) {
    %c0_i32 = arith.constant 0 : i32
    %c0_i32_0 = arith.constant 0 : i32
    %c0_i32_1 = arith.constant 0 : i32
    return %arg0, %c0_i32, %c0_i32_0 : i32, i32, i32
  }
  func.func @transform_1(%arg0: i32) -> (i32, i32) {
    %c0_i32 = arith.constant 0 : i32
    %c0_i32_0 = arith.constant 0 : i32
    %c0_i32_1 = arith.constant 0 : i32
    return %c0_i32, %c0_i32_0 : i32, i32
  }
  func.func @transform_2(%arg0: i32) -> (i32, i32) {
    %c0_i32 = arith.constant 0 : i32
    %c0_i32_0 = arith.constant 0 : i32
    %c0_i32_1 = arith.constant 0 : i32
    return %c0_i32, %c0_i32_0 : i32, i32
  }
  func.func @transform_3(%arg0: i32) -> (i32, i32) {
    %c0_i32 = arith.constant 0 : i32
    %c0_i32_0 = arith.constant 0 : i32
    %c0_i32_1 = arith.constant 0 : i32
    return %c0_i32, %c0_i32_0 : i32, i32
  }
  func.func @transform_4(%arg0: i32) -> (i32, i32) {
    %c0_i32 = arith.constant 0 : i32
    %c0_i32_0 = arith.constant 0 : i32
    %c0_i32_1 = arith.constant 0 : i32
    return %c0_i32, %c0_i32_0 : i32, i32
  }
  func.func @transform_5(%arg0: i32) -> (i32, i32) {
    %c0_i32 = arith.constant 0 : i32
    %c0_i32_0 = arith.constant 0 : i32
    %c0_i32_1 = arith.constant 0 : i32
    return %c0_i32, %c0_i32_0 : i32, i32
  }
  func.func @transform_6(%arg0: i32) -> (i32, i32) {
    %c0_i32 = arith.constant 0 : i32
    %c0_i32_0 = arith.constant 0 : i32
    %c0_i32_1 = arith.constant 0 : i32
    return %c0_i32, %c0_i32_0 : i32, i32
  }
  func.func @transform_7(%arg0: i32) -> (i32, i32) {
    %c0_i32 = arith.constant 0 : i32
    %c0_i32_0 = arith.constant 0 : i32
    %c0_i32_1 = arith.constant 0 : i32
    return %c0_i32, %c0_i32_0 : i32, i32
  }
  func.func @transform_8(%arg0: i32) -> (i32, i32) {
    %c0_i32 = arith.constant 0 : i32
    %c0_i32_0 = arith.constant 0 : i32
    %c0_i32_1 = arith.constant 0 : i32
    return %c0_i32, %c0_i32_0 : i32, i32
  }
  func.func @transform_9(%arg0: i32) -> (i32, i32) {
    %c0_i32 = arith.constant 0 : i32
    %c0_i32_0 = arith.constant 0 : i32
    %c0_i32_1 = arith.constant 0 : i32
    return %c0_i32, %c0_i32_0 : i32, i32
  }
  func.func @transform_10(%arg0: i32) -> (i32, i32) {
    %c0_i32 = arith.constant 0 : i32
    %c0_i32_0 = arith.constant 0 : i32
    %c0_i32_1 = arith.constant 0 : i32
    return %c0_i32, %c0_i32_0 : i32, i32
  }
  func.func @transform_11(%arg0: i32) -> (i32, i32, i32) {
    %c0_i32 = arith.constant 0 : i32
    %c0_i32_0 = arith.constant 0 : i32
    %c0_i32_1 = arith.constant 0 : i32
    return %arg0, %c0_i32, %c0_i32_0 : i32, i32, i32
  }
}

</mosaic_0001>

<bundles_post_ra>
// kernel: tpu_custom_call.1
= control target key start
LH: loop header
LB: loop body
LE: loop exit
PB: predicated region body
PF: predicated region fallthrough
CT: control target
= control target key end

     0   :  { %16 = vsyncpa [#allocation3], 0  ;;  %s5896_s0 = inlined_call_operand.hbm [shape: f32[2,64,128], index: 0, kind: input, shape index: {}]   ;;  %s5897_s1 = inlined_call_operand.hbm [shape: bf16[128,384], index: 1, kind: input, shape index: {}]   ;;  %s5898_s2 = inlined_call_operand.hbm [shape: f32[128,128], index: 2, kind: input, shape index: {}]   ;;  %s5899_s3 = inlined_call_operand.hbm [shape: f32[128,128], index: 3, kind: input, shape index: {}]   ;;  %s5900_s4 = inlined_call_operand.hbm [shape: f32[128,128], index: 4, kind: input, shape index: {}]   ;;  %s5901_s5 = inlined_call_operand.vmem [shape: f32[2,128], index: 5, kind: input, shape index: {}]   ;;  %s5902_s6 = inlined_call_operand.vmem [shape: f32[2,128], index: 6, kind: input, shape index: {}]   ;;  %s5903_s7 = inlined_call_operand.hbm [shape: f32[128,128], index: 7, kind: input, shape index: {}]   ;;  %s5904_s8 = inlined_call_operand.hbm [shape: bf16[128,128], index: 8, kind: input, shape index: {}]   ;;  %s5905_s9 = inlined_call_operand.hbm [shape: bf16[128,256], index: 9, kind: input, shape index: {}]   ;;  %s5906_s10 = inlined_call_operand.hbm [shape: bf16[256,128], index: 10, kind: input, shape index: {}]   ;;  %s5907_s11 = inlined_call_operand.hbm [shape: f32[2,64,128], index: 11, kind: output, shape index: {}]  }
   0x1   :  { %17 = vsyncpa [#allocation6], 0 }
   0x2   :  { %18 = vsyncpa [#allocation9], 0 }
   0x3   :  { %19 = vsyncpa [#allocation12], 0 }
   0x4   :  { %20 = vsyncpa [#allocation15], 0 }
   0x5   :  { %21 = vsyncpa [#allocation4], 0  ;;  %s4404_s17 = smov [#allocation5]   ;;  %s4172_s21 = scalar_lea.hbm %s5897_s1, 3072 }
   0x6   :  { %s39_s18 = sshll.u32 %s4404_s17, 4  ;;  %p4173_p0 = scmp.ne.s32.totalorder %s5897_s1, %s4172_s21  ;;  %s40_s18 = int_to_ptr.vmem [resolvable:$true] %s39_s18 }
   0x7   :  { %p4176_p1 = scmp.lt.u32.totalorder %s4172_s21, %s5897_s1 }
   0x9   :  { %p4178_p2 = pnand %p4176_p1, %p4173_p0 }
   0xb   :  { %4181 = shalt.err (!%p4178_p2)
}
   0xc   :  { %s4182_s26 = scalar_lea.vmem %s40_s18, 3072  ;;  %p4187_p4 = scmp.lt.s32.totalorder %s40_s18, %s40_s18 }
   0xd   :  { %p4183_p3 = scmp.ne.s32.totalorder %s40_s18, %s4182_s26  ;;  %p4188_p5 = scmp.lt.s32.totalorder %s4182_s26, %s4182_s26 }
   0xf   :  { %p4189_p6 = por %p4188_p5, %p4187_p4 }
  0x11   :  { %p4190_p7 = pnand %p4189_p6, %p4183_p3 }
  0x13   :  { %4193 = shalt.err (!%p4190_p7)
}
  0x14   :  { %s4405_s27 = smov 192   ;;  %s4406_s28 = smov 12  }
  0x15   :  { %45 = dma.hbm_to_vmem [thread:$0]  %s5897_s1, 3072, %s40_s18, [#allocation6], %s4405_s27, %s4405_s27, %s4406_s28  }
  0x16   :  { %s4407_s12 = smov [#allocation8]   ;;  %s4408_s14 = smov [#allocation11]  }
  0x17   :  { %s63_s13 = sshll.u32 %s4407_s12, 4  ;;  %s91_s15 = sshll.u32 %s4408_s14, 4  ;;  %s64_s13 = int_to_ptr.vmem [resolvable:$true] %s63_s13  ;;  %s92_s15 = int_to_ptr.vmem [resolvable:$true] %s91_s15 }
  0x18   :  { %s4194_s19 = scalar_lea.hbm %s5899_s3, 2048 }
  0x19   :  { %p4195_p8 = scmp.ne.s32.totalorder %s5899_s3, %s4194_s19  ;;  %p4198_p9 = scmp.lt.u32.totalorder %s4194_s19, %s5899_s3 }
  0x1b   :  { %p4200_p10 = pnand %p4198_p9, %p4195_p8 }
  0x1d   :  { %4203 = shalt.err (!%p4200_p10)
}
  0x1e   :  { %s4204_s1 = scalar_lea.vmem %s64_s13, 2048  ;;  %p4209_p12 = scmp.lt.s32.totalorder %s64_s13, %s64_s13 }
  0x1f   :  { %p4205_p11 = scmp.ne.s32.totalorder %s64_s13, %s4204_s1  ;;  %p4210_p13 = scmp.lt.s32.totalorder %s4204_s1, %s4204_s1 }
  0x21   :  { %p4211_p0 = por %p4210_p13, %p4209_p12 }
  0x23   :  { %p4212_p1 = pnand %p4211_p0, %p4205_p11 }
  0x25   :  { %4215 = shalt.err (!%p4212_p1)
}
  0x26   :  { %s4409_s18 = smov 128   ;;  %s4410_s24 = smov 8  }
  0x27   :  { %69 = dma.hbm_to_vmem [thread:$0]  %s5899_s3, 2048, %s64_s13, [#allocation9], %s4409_s18, %s4409_s18, %s4410_s24  }
  0x28   :  { %s4216_s29 = scalar_lea.hbm %s5903_s7, 2048 }
  0x29   :  { %p4217_p2 = scmp.ne.s32.totalorder %s5903_s7, %s4216_s29  ;;  %p4220_p3 = scmp.lt.u32.totalorder %s4216_s29, %s5903_s7 }
  0x2b   :  { %p4222_p4 = pnand %p4220_p3, %p4217_p2 }
  0x2d   :  { %4225 = shalt.err (!%p4222_p4)
}
  0x2e   :  { %s4226_s17 = scalar_lea.vmem %s92_s15, 2048  ;;  %p4231_p6 = scmp.lt.s32.totalorder %s92_s15, %s92_s15 }
  0x2f   :  { %p4227_p5 = scmp.ne.s32.totalorder %s92_s15, %s4226_s17  ;;  %p4232_p7 = scmp.lt.s32.totalorder %s4226_s17, %s4226_s17 }
  0x31   :  { %p4233_p8 = por %p4232_p7, %p4231_p6 }
  0x33   :  { %p4234_p9 = pnand %p4233_p8, %p4227_p5 }
  0x35   :  { %4237 = shalt.err (!%p4234_p9)
}
  0x36   :  { %97 = dma.hbm_to_vmem [thread:$0]  %s5903_s7, 2048, %s92_s15, [#allocation12], %s4409_s18, %s4409_s18, %s4410_s24  }
  0x37   :  { %s4411_s19 = smov [#allocation14]   ;;  %s4412_s21 = smov [#allocation2]  }
  0x38   :  { %s115_s20 = sshll.u32 %s4411_s19, 4  ;;  %s27_s22 = sshll.u32 %s4412_s21, 4  ;;  %s116_s20 = int_to_ptr.vmem [resolvable:$true] %s115_s20  ;;  %s28_s22 = int_to_ptr.vmem [resolvable:$true] %s27_s22 }
  0x39   :  { %s4238_s25 = scalar_lea.hbm %s5905_s9, 2048 }
  0x3a   :  { %p4239_p10 = scmp.ne.s32.totalorder %s5905_s9, %s4238_s25  ;;  %p4242_p11 = scmp.lt.u32.totalorder %s4238_s25, %s5905_s9 }
  0x3c   :  { %p4244_p12 = pnand %p4242_p11, %p4239_p10 }
  0x3e   :  { %4247 = shalt.err (!%p4244_p12)
}
  0x3f   :  { %s4248_s7 = scalar_lea.vmem %s116_s20, 2048  ;;  %p4253_p0 = scmp.lt.s32.totalorder %s116_s20, %s116_s20 }
  0x40   :  { %p4249_p13 = scmp.ne.s32.totalorder %s116_s20, %s4248_s7  ;;  %p4254_p1 = scmp.lt.s32.totalorder %s4248_s7, %s4248_s7 }
  0x42   :  { %p4255_p2 = por %p4254_p1, %p4253_p0 }
  0x44   :  { %p4256_p3 = pnand %p4255_p2, %p4249_p13 }
  0x46   :  { %4259 = shalt.err (!%p4256_p3)
}
  0x47   :  { %121 = dma.hbm_to_vmem [thread:$0]  %s5905_s9, 2048, %s116_s20, [#allocation15], %s4409_s18, %s4409_s18, %s4410_s24  }
  0x48   :  { %s4260_s16 = scalar_lea.hbm %s5896_s0, 2048 }
  0x49   :  { %p4261_p4 = scmp.ne.s32.totalorder %s5896_s0, %s4260_s16  ;;  %p4264_p5 = scmp.lt.u32.totalorder %s4260_s16, %s5896_s0 }
  0x4b   :  { %p4266_p6 = pnand %p4264_p5, %p4261_p4 }
  0x4d   :  { %4269 = shalt.err (!%p4266_p6)
}
  0x4e   :  { %s4270_s21 = scalar_lea.vmem %s28_s22, 2048  ;;  %p4275_p8 = scmp.lt.s32.totalorder %s28_s22, %s28_s22 }
  0x4f   :  { %p4271_p7 = scmp.ne.s32.totalorder %s28_s22, %s4270_s21  ;;  %p4276_p9 = scmp.lt.s32.totalorder %s4270_s21, %s4270_s21 }
  0x51   :  { %p4277_p10 = por %p4276_p9, %p4275_p8 }
  0x53   :  { %p4278_p11 = pnand %p4277_p10, %p4271_p7 }
  0x55   :  { %4281 = shalt.err (!%p4278_p11)
}
  0x56   :  { %33 = dma.hbm_to_vmem [thread:$0]  %s5896_s0, 2048, %s28_s22, [#allocation3], %s4409_s18, %s4409_s18, %s4410_s24  }
  0x57   :  { %s4413_s23 = smov [#allocation7]   ;;  %s4414_s25 = smov [#allocation10]  }
  0x58   :  { %s51_s1 = sshll.u32 %s4413_s23, 4  ;;  %s75_s26 = sshll.u32 %s4414_s25, 4  ;;  %s52_s1 = int_to_ptr.vmem [resolvable:$true] %s51_s1  ;;  %s76_s26 = int_to_ptr.vmem [resolvable:$true] %s75_s26 }
  0x59   :  { %s4282_s29 = scalar_lea.hbm %s5898_s2, 2048 }
  0x5a   :  { %p4283_p12 = scmp.ne.s32.totalorder %s5898_s2, %s4282_s29  ;;  %p4286_p13 = scmp.lt.u32.totalorder %s4282_s29, %s5898_s2 }
  0x5c   :  { %p4288_p0 = pnand %p4286_p13, %p4283_p12 }
  0x5e   :  { %4291 = shalt.err (!%p4288_p0)
}
  0x5f   :  { %s4292_s0 = scalar_lea.vmem %s52_s1, 2048  ;;  %p4297_p2 = scmp.lt.s32.totalorder %s52_s1, %s52_s1 }
  0x60   :  { %p4293_p1 = scmp.ne.s32.totalorder %s52_s1, %s4292_s0  ;;  %p4298_p3 = scmp.lt.s32.totalorder %s4292_s0, %s4292_s0 }
  0x62   :  { %p4299_p4 = por %p4298_p3, %p4297_p2 }
  0x64   :  { %p4300_p5 = pnand %p4299_p4, %p4293_p1 }
  0x66   :  { %4303 = shalt.err (!%p4300_p5)
}
  0x67   :  { %57 = dma.hbm_to_vmem [thread:$0]  %s5898_s2, 2048, %s52_s1, [#allocation6], %s4409_s18, %s4409_s18, %s4410_s24  }
  0x68   :  { %s4304_s3 = scalar_lea.hbm %s5900_s4, 2048 }
  0x69   :  { %p4305_p6 = scmp.ne.s32.totalorder %s5900_s4, %s4304_s3  ;;  %p4308_p7 = scmp.lt.u32.totalorder %s4304_s3, %s5900_s4 }
  0x6b   :  { %p4310_p8 = pnand %p4308_p7, %p4305_p6 }
  0x6d   :  { %4313 = shalt.err (!%p4310_p8)
}
  0x6e   :  { %s4314_s20 = scalar_lea.vmem %s76_s26, 2048  ;;  %p4319_p10 = scmp.lt.s32.totalorder %s76_s26, %s76_s26 }
  0x6f   :  { %p4315_p9 = scmp.ne.s32.totalorder %s76_s26, %s4314_s20  ;;  %p4320_p11 = scmp.lt.s32.totalorder %s4314_s20, %s4314_s20 }
  0x71   :  { %p4321_p12 = por %p4320_p11, %p4319_p10 }
  0x73   :  { %p4322_p13 = pnand %p4321_p12, %p4315_p9 }
  0x75   :  { %4325 = shalt.err (!%p4322_p13)
}
  0x76   :  { %81 = dma.hbm_to_vmem [thread:$0]  %s5900_s4, 2048, %s76_s26, [#allocation9], %s4409_s18, %s4409_s18, %s4410_s24  }
  0x77   :  { %s4415_s1 = smov [#allocation13]   ;;  %s4326_s29 = scalar_lea.hbm %s5904_s8, 1024 }
  0x78   :  { %s103_s25 = sshll.u32 %s4415_s1, 4  ;;  %p4327_p0 = scmp.ne.s32.totalorder %s5904_s8, %s4326_s29  ;;  %s104_s25 = int_to_ptr.vmem [resolvable:$true] %s103_s25 }
  0x79   :  { %p4330_p1 = scmp.lt.u32.totalorder %s4326_s29, %s5904_s8 }
  0x7b   :  { %p4332_p2 = pnand %p4330_p1, %p4327_p0 }
  0x7d   :  { %4335 = shalt.err (!%p4332_p2)
}
  0x7e   :  { %s4336_s0 = scalar_lea.vmem %s104_s25, 1024  ;;  %p4341_p4 = scmp.lt.s32.totalorder %s104_s25, %s104_s25 }
  0x7f   :  { %p4337_p3 = scmp.ne.s32.totalorder %s104_s25, %s4336_s0  ;;  %p4342_p5 = scmp.lt.s32.totalorder %s4336_s0, %s4336_s0 }
  0x81   :  { %p4343_p6 = por %p4342_p5, %p4341_p4 }
  0x83   :  { %p4344_p7 = pnand %p4343_p6, %p4337_p3 }
  0x85   :  { %4347 = shalt.err (!%p4344_p7)
}
  0x86   :  { %s4416_s4 = smov 64   ;;  %s4417_s26 = smov 4  }
  0x87   :  { %109 = dma.hbm_to_vmem [thread:$0]  %s5904_s8, 1024, %s104_s25, [#allocation12], %s4416_s4, %s4416_s4, %s4417_s26  }
  0x88   :  { %s4418_s16 = smov [#allocation16]   ;;  %s4348_s19 = scalar_lea.hbm %s5906_s10, 2048 }
  0x89   :  { %s127_s17 = sshll.u32 %s4418_s16, 4  ;;  %p4349_p8 = scmp.ne.s32.totalorder %s5906_s10, %s4348_s19  ;;  %s128_s17 = int_to_ptr.vmem [resolvable:$true] %s127_s17 }
  0x8a   :  { %p4352_p9 = scmp.lt.u32.totalorder %s4348_s19, %s5906_s10 }
  0x8c   :  { %p4354_p10 = pnand %p4352_p9, %p4349_p8 }
  0x8e   :  { %4357 = shalt.err (!%p4354_p10)
}
  0x8f   :  { %s4358_s23 = scalar_lea.vmem %s128_s17, 2048  ;;  %p4363_p12 = scmp.lt.s32.totalorder %s128_s17, %s128_s17 }
  0x90   :  { %p4359_p11 = scmp.ne.s32.totalorder %s128_s17, %s4358_s23  ;;  %p4364_p13 = scmp.lt.s32.totalorder %s4358_s23, %s4358_s23 }
  0x92   :  { %p4365_p0 = por %p4364_p13, %p4363_p12 }
  0x94   :  { %p4366_p1 = pnand %p4365_p0, %p4359_p11 }
  0x96   :  { %4369 = shalt.err (!%p4366_p1)
}
  0x97   :  { %133 = dma.hbm_to_vmem [thread:$0]  %s5906_s10, 2048, %s128_s17, [#allocation15], %s4416_s4, %s4416_s4, %s4417_s26  }
  0x98   :  { %4392 = dma.done.wait [#allocation3], 2048  }
  0x99   :  { %4393 = vsyncadd [#allocation3], 4294965248 }
  0x9a   :  { %4394 = dma.done.wait [#allocation6], 5120  }
  0x9b   :  { %4395 = vsyncadd [#allocation6], 4294962176 }
  0x9c   :  { %4396 = dma.done.wait [#allocation9], 4096  }
  0x9d   :  { %4397 = vsyncadd [#allocation9], 4294963200 }
  0x9e   :  { %4398 = dma.done.wait [#allocation12], 3072  }
  0x9f   :  { %4399 = vsyncadd [#allocation12], 4294964224 }
  0xa0   :  { %4400 = dma.done.wait [#allocation15], 4096  }
  0xa1   :  { %4401 = vsyncadd [#allocation15], 4294963200  ;;  %v4611_v0 = vld [vmem:[#allocation2] sm:$0xff]  ;;  %v4613_v1 = vld [vmem:[#allocation2 + $0x10] sm:$0xff]  ;;  %v5908_v56 = vmov 0  }
  0xa2   :  { %v4615_v2 = vld [vmem:[#allocation2 + $0x8] sm:$0xff]  ;;  %v178_v3 = vmul.f32 %v4611_v0, %v4611_v0  ;;  %v180_v4 = vmul.f32 %v4613_v1, %v4613_v1  ;;  %v4621_v5 = vld [vmem:[#allocation2 + $0x18] sm:$0xff]  ;;  %v4629_v9 = vld [vmem:[#allocation2 + $0x20] sm:$0xff]  ;;  %491 = vmatprep.mubr.bf16.mxu0 %v5908_v56 }
  0xa3   :  { %v179_v6 = vmul.f32 %v4615_v2, %v4615_v2  ;;  %v181_v7 = vmul.f32 %v4621_v5, %v4621_v5  ;;  %v4627_v8 = vld [vmem:[#allocation2 + $0x28] sm:$0xff]  ;;  %v4631_v10 = vld [vmem:[#allocation2 + $0x38] sm:$0xff]  ;;  %v4633_v11 = vld [vmem:[#allocation2 + $0x30] sm:$0xff]  ;;  %v182_v15 = vmul.f32 %v4629_v9, %v4629_v9 }
  0xa4   :  { %194 = vadd.xlane.f32.xlu0 %v178_v3  ;;  %198 = vadd.xlane.f32.xlu1 %v180_v4  ;;  %v3820_v12 = vld [vmem:[#allocation5 + $0x4] ss:$12 sps:$4 sm:$0xff]   ;;  %v3822_v13 = vld [vmem:[#allocation5] ss:$12 sps:$4 sm:$0xff]   ;;  %v183_v14 = vmul.f32 %v4627_v8, %v4627_v8  ;;  %v3823_v16 = vld [vmem:[#allocation5 + $0x8] ss:$12 sps:$4 sm:$0xff]   ;;  %v185_v23 = vmul.f32 %v4631_v10, %v4631_v10  ;;  %v184_v24 = vmul.f32 %v4633_v11, %v4633_v11 }
  0xa5   :  { %459 = vmatprep.subr.bf16.mxu0 %v3820_v12  ;;  %v3824_v17 = vld [vmem:[#allocation5 + $0x1c] ss:$12 sps:$4 sm:$0xff]   ;;  %v3826_v18 = vld [vmem:[#allocation5 + $0x18] ss:$12 sps:$4 sm:$0xff]   ;;  %3419 = vmatprep.subr.bf16.mxu1 %v3823_v16  ;;  %v3827_v19 = vld [vmem:[#allocation5 + $0x20] ss:$12 sps:$4 sm:$0xff]  }
  0xa6   :  { %460 = vmatpush1.bf16.msra.mxu0 %v3822_v13  ;;  %v4639_v20 = vld [vmem:[#allocation2 + $0x48] sm:$0xff]  ;;  %v4641_v21 = vld [vmem:[#allocation2 + $0x40] sm:$0xff]  ;;  %3420 = vmatpush3.bf16.msra.mxu1 %v3823_v16  ;;  %v4647_v25 = vld [vmem:[#allocation2 + $0x58] sm:$0xff] }
  0xa7   :  { %461 = vmatprep.subr.bf16.mxu0 %v3824_v17  ;;  %v3828_v22 = vld [vmem:[#allocation5 + $0x34] ss:$12 sps:$4 sm:$0xff]   ;;  %3421 = vmatprep.subr.bf16.mxu1 %v3827_v19  ;;  %v187_v27 = vmul.f32 %v4639_v20, %v4639_v20  ;;  %v186_v28 = vmul.f32 %v4641_v21, %v4641_v21  ;;  %v3830_v29 = vld [vmem:[#allocation5 + $0x30] ss:$12 sps:$4 sm:$0xff]   ;;  %v3831_v30 = vld [vmem:[#allocation5 + $0x38] ss:$12 sps:$4 sm:$0xff]   ;;  %v189_v34 = vmul.f32 %v4647_v25, %v4647_v25 }
  0xa8   :  { %196 = vadd.xlane.f32.xlu0 %v179_v6  ;;  %200 = vadd.xlane.f32.xlu1 %v181_v7  ;;  %v4649_v26 = vld [vmem:[#allocation2 + $0x50] sm:$0xff]  ;;  %v4655_v31 = vld [vmem:[#allocation2 + $0x68] sm:$0xff]  ;;  %v4657_v32 = vld [vmem:[#allocation2 + $0x60] sm:$0xff] }
  0xa9   :  { %v3832_v33 = vld [vmem:[#allocation5 + $0x4c] ss:$12 sps:$4 sm:$0xff]   ;;  %v188_v35 = vmul.f32 %v4649_v26, %v4649_v26  ;;  %v3834_v36 = vld [vmem:[#allocation5 + $0x48] ss:$12 sps:$4 sm:$0xff]   ;;  %v3835_v37 = vld [vmem:[#allocation5 + $0x50] ss:$12 sps:$4 sm:$0xff]   ;;  %v191_v41 = vmul.f32 %v4655_v31, %v4655_v31  ;;  %v190_v42 = vmul.f32 %v4657_v32, %v4657_v32 }
  0xaa   :  { %462 = vmatpush1.bf16.msra.mxu0 %v3826_v18  ;;  %3422 = vmatpush3.bf16.msra.mxu1 %v3827_v19  ;;  %v4663_v38 = vld [vmem:[#allocation2 + $0x78] sm:$0xff]  ;;  %v4665_v39 = vld [vmem:[#allocation2 + $0x70] sm:$0xff]  ;;  %v3838_v43 = vld [vmem:[#allocation5 + $0x60] ss:$12 sps:$4 sm:$0xff]  }
  0xab   :  { %463 = vmatprep.subr.bf16.mxu0 %v3828_v22  ;;  %3423 = vmatprep.subr.bf16.mxu1 %v3831_v30  ;;  %v3836_v40 = vld [vmem:[#allocation5 + $0x64] ss:$12 sps:$4 sm:$0xff]   ;;  %v3839_v44 = vld [vmem:[#allocation5 + $0x68] ss:$12 sps:$4 sm:$0xff]   ;;  %v3843_v47 = vld [vmem:[#allocation5 + $0x80] ss:$12 sps:$4 sm:$0xff]   ;;  %v193_v48 = vmul.f32 %v4663_v38, %v4663_v38  ;;  %v192_v49 = vmul.f32 %v4665_v39, %v4665_v39 }
  0xac   :  { %204 = vadd.xlane.f32.xlu1 %v183_v14  ;;  %202 = vadd.xlane.f32.xlu0 %v182_v15  ;;  %v3840_v45 = vld [vmem:[#allocation5 + $0x7c] ss:$12 sps:$4 sm:$0xff]   ;;  %v3842_v46 = vld [vmem:[#allocation5 + $0x78] ss:$12 sps:$4 sm:$0xff]   ;;  %v3844_v50 = vld [vmem:[#allocation5 + $0x94] ss:$12 sps:$4 sm:$0xff]  }
  0xad   :  { %v3846_v51 = vld [vmem:[#allocation5 + $0x90] ss:$12 sps:$4 sm:$0xff]   ;;  %v3847_v52 = vld [vmem:[#allocation5 + $0x98] ss:$12 sps:$4 sm:$0xff]   ;;  %v3850_v55 = vld [vmem:[#allocation5 + $0xa8] ss:$12 sps:$4 sm:$0xff]  }
  0xae   :  { %464 = vmatpush1.bf16.msra.mxu0 %v3830_v29  ;;  %3424 = vmatpush3.bf16.msra.mxu1 %v3831_v30  ;;  %v3848_v53 = vld [vmem:[#allocation5 + $0xac] ss:$12 sps:$4 sm:$0xff]   ;;  %v3851_v54 = vld [vmem:[#allocation5 + $0xb0] ss:$12 sps:$4 sm:$0xff]   ;;  %v669_v57 = vld [vmem:[#allocation7] sm:$0xff] }
  0xaf   :  { %465 = vmatprep.subr.bf16.mxu0 %v3832_v33  ;;  %3425 = vmatprep.subr.bf16.mxu1 %v3835_v37  ;;  %v670_v58 = vld [vmem:[#allocation7 + $0x8] sm:$0xff] }
  0xb0   :  { %208 = vadd.xlane.f32.xlu1 %v185_v23  ;;  %206 = vadd.xlane.f32.xlu0 %v184_v24  ;;  %v4676_v59 = vpack.c.bf16 %v670_v58, %v669_v57 }
  0xb2   :  { %466 = vmatpush1.bf16.msra.mxu0 %v3834_v36  ;;  %3426 = vmatpush3.bf16.msra.mxu1 %v3835_v37 }
  0xb3   :  { %467 = vmatprep.subr.bf16.mxu0 %v3836_v40  ;;  %3427 = vmatprep.subr.bf16.mxu1 %v3839_v44 }
  0xb4   :  { %212 = vadd.xlane.f32.xlu1 %v187_v27  ;;  %210 = vadd.xlane.f32.xlu0 %v186_v28 }
  0xb6   :  { %468 = vmatpush1.bf16.msra.mxu0 %v3838_v43  ;;  %3428 = vmatpush3.bf16.msra.mxu1 %v3839_v44 }
  0xb7   :  { %469 = vmatprep.subr.bf16.mxu0 %v3840_v45  ;;  %3429 = vmatprep.subr.bf16.mxu1 %v3843_v47 }
  0xb8   :  { %216 = vadd.xlane.f32.xlu1 %v189_v34  ;;  %214 = vadd.xlane.f32.xlu0 %v188_v35 }
  0xba   :  { %470 = vmatpush1.bf16.msra.mxu0 %v3842_v46  ;;  %3430 = vmatpush3.bf16.msra.mxu1 %v3843_v47 }
  0xbb   :  { %471 = vmatprep.subr.bf16.mxu0 %v3844_v50  ;;  %3431 = vmatprep.subr.bf16.mxu1 %v3847_v52 }
  0xbc   :  { %220 = vadd.xlane.f32.xlu1 %v191_v41  ;;  %218 = vadd.xlane.f32.xlu0 %v190_v42 }
  0xbe   :  { %472 = vmatpush1.bf16.msra.mxu0 %v3846_v51  ;;  %3432 = vmatpush3.bf16.msra.mxu1 %v3847_v52  ;;  %v671_v51 = vld [vmem:[#allocation7 + $0x10] sm:$0xff]  ;;  %v672_v52 = vld [vmem:[#allocation7 + $0x18] sm:$0xff] }
  0xbf   :  { %473 = vmatprep.subr.bf16.mxu0 %v3848_v53  ;;  %3433 = vmatprep.subr.bf16.mxu1 %v3851_v54 }
  0xc0   :  { %224 = vadd.xlane.f32.xlu1 %v193_v48  ;;  %222 = vadd.xlane.f32.xlu0 %v192_v49 }
  0xc2   :  { %474 = vmatpush1.bf16.msra.mxu0 %v3850_v55  ;;  %3434 = vmatpush3.bf16.msra.mxu1 %v3851_v54 }
  0xc3   :  { %3756 = vmatprep.subr.bf16.mxu0 %v4676_v59  ;;  %3724 = vmatprep.subr.bf16.mxu1 %v4676_v59 }
 0x131   :  { %v195_v60 = vpop.xlane.xlu0 %194  ;;  %v199_v61 = vpop.xlane.xlu1 %198 }
 0x132   :  { %v227_v62 = vmul.f32 0.0078125, %v195_v60  ;;  %v229_v63 = vmul.f32 0.0078125, %v199_v61 }
 0x134   :  { %v243_v3 = vadd.f32 1e-06, %v227_v62  ;;  %v245_v4 = vadd.f32 1e-06, %v229_v63  ;;  %v3727_v62 = vpack.c.bf16 %v672_v52, %v671_v51  ;;  %v681_v51 = vld [vmem:[#allocation7 + $0x60] sm:$0xff]  ;;  %v682_v52 = vld [vmem:[#allocation7 + $0x68] sm:$0xff] }
 0x135   :  { %v197_v6 = vpop.xlane.xlu0 %196  ;;  %v201_v7 = vpop.xlane.xlu1 %200 }
 0x136   :  { %v228_v12 = vmul.f32 0.0078125, %v197_v6  ;;  %v230_v13 = vmul.f32 0.0078125, %v201_v7  ;;  %3900 = vrsqrt.f32 %v245_v4  ;;  %v673_v4 = vld [vmem:[#allocation7 + $0x20] sm:$0xff]  ;;  %v674_v6 = vld [vmem:[#allocation7 + $0x28] sm:$0xff] }
 0x137   :  { %3902 = vrsqrt.f32 %v243_v3 }
 0x138   :  { %v244_v14 = vadd.f32 1e-06, %v228_v12  ;;  %v246_v15 = vadd.f32 1e-06, %v230_v13 }
 0x139   :  { %v205_v16 = vpop.xlane.xlu1 %204  ;;  %v203_v17 = vpop.xlane.xlu0 %202 }
 0x13a   :  { %3904 = vrsqrt.f32 %v244_v14  ;;  %v232_v18 = vmul.f32 0.0078125, %v205_v16  ;;  %v231_v19 = vmul.f32 0.0078125, %v203_v17  ;;  %v3731_v16 = vpack.c.bf16 %v674_v6, %v673_v4 }
 0x13b   :  { %3906 = vrsqrt.f32 %v246_v15 }
 0x13c   :  { %v248_v22 = vadd.f32 1e-06, %v232_v18  ;;  %v247_v23 = vadd.f32 1e-06, %v231_v19 }
 0x13d   :  { %v209_v24 = vpop.xlane.xlu1 %208  ;;  %v207_v27 = vpop.xlane.xlu0 %206 }
 0x13e   :  { %3908 = vrsqrt.f32 %v248_v22  ;;  %v234_v28 = vmul.f32 0.0078125, %v209_v24  ;;  %v233_v29 = vmul.f32 0.0078125, %v207_v27  ;;  %v675_v22 = vld [vmem:[#allocation7 + $0x30] sm:$0xff] }
 0x13f   :  { %3910 = vrsqrt.f32 %v247_v23  ;;  %v676_v23 = vld [vmem:[#allocation7 + $0x38] sm:$0xff] }
 0x140   :  { %v250_v30 = vadd.f32 1e-06, %v234_v28  ;;  %v249_v33 = vadd.f32 1e-06, %v233_v29  ;;  %v3901_v34 = vpop.eup %3900 }
 0x141   :  { %v213_v35 = vpop.xlane.xlu1 %212  ;;  %v211_v36 = vpop.xlane.xlu0 %210  ;;  %v277_v43 = vmul.f32 %v3901_v34, %v4613_v1 }
 0x142   :  { %v3903_v37 = vpop.eup %3902  ;;  %3912 = vrsqrt.f32 %v250_v30  ;;  %v236_v40 = vmul.f32 0.0078125, %v213_v35  ;;  %v235_v41 = vmul.f32 0.0078125, %v211_v36  ;;  %v677_v36 = vld [vmem:[#allocation7 + $0x40] sm:$0xff] }
 0x143   :  { %3914 = vrsqrt.f32 %v249_v33  ;;  %v275_v47 = vmul.f32 %v3903_v37, %v4611_v0 }
 0x144   :  { %v3905_v42 = vpop.eup %3904  ;;  %v252_v44 = vadd.f32 1e-06, %v236_v40  ;;  %v251_v45 = vadd.f32 1e-06, %v235_v41 }
 0x145   :  { %v3907_v46 = vpop.eup %3906  ;;  %v276_v48 = vmul.f32 %v3905_v42, %v4615_v2  ;;  %v217_v49 = vpop.xlane.xlu1 %216 }
 0x146   :  { %v215_v50 = vpop.xlane.xlu0 %214  ;;  %v278_v53 = vmul.f32 %v3907_v46, %v4621_v5  ;;  %3916 = vrsqrt.f32 %v252_v44  ;;  %v238_v54 = vmul.f32 0.0078125, %v217_v49  ;;  %v679_v44 = vld [vmem:[#allocation7 + $0x50] sm:$0xff] }
 0x147   :  { %v237_v55 = vmul.f32 0.0078125, %v215_v50  ;;  %v291_v57 = vpack.c.bf16 %v276_v48, %v275_v47  ;;  %3918 = vrsqrt.f32 %v251_v45  ;;  %v680_v45 = vld [vmem:[#allocation7 + $0x58] sm:$0xff] }
 0x148   :  { %v3909_v58 = vpop.eup %3908  ;;  %v292_v1 = vpack.c.bf16 %v278_v53, %v277_v43  ;;  %v254_v60 = vadd.f32 1e-06, %v238_v54  ;;  %v3743_v48 = vpack.c.bf16 %v680_v45, %v679_v44  ;;  %v3747_v54 = vpack.c.bf16 %v682_v52, %v681_v51 }
 0x149   :  { %v253_v61 = vadd.f32 1e-06, %v237_v55  ;;  %v3911_v63 = vpop.eup %3910  ;;  %492 = vmatmul.mubr.bf16.vlgmr.msra.gmra.mrb[0].mxu0 %v291_v57  ;;  %3435 = vmatprep.mubr.bf16.mxu1 %v291_v57  ;;  %v280_v0 = vmul.f32 %v3909_v58, %v4627_v8  ;;  %v221_v2 = vpop.xlane.xlu1 %220  ;;  %v683_v58 = vld [vmem:[#allocation7 + $0x70] sm:$0xff] }
 0x14a   :  { %v219_v3 = vpop.xlane.xlu0 %218  ;;  %3436 = vmatmul.mubr.bf16.vlgmr.msra.gmra.mrb[0].mxu1 %v292_v1  ;;  %501 = vmatprep.mubr.bf16.mxu0 %v5908_v56  ;;  %v279_v5 = vmul.f32 %v3911_v63, %v4629_v9  ;;  %3920 = vrsqrt.f32 %v254_v60  ;;  %v240_v7 = vmul.f32 0.0078125, %v221_v2 }
 0x14b   :  { %v239_v12 = vmul.f32 0.0078125, %v219_v3  ;;  %3922 = vrsqrt.f32 %v253_v61  ;;  %3758 = vmatpush3.bf16.msra.mxu0 %v4676_v59  ;;  %3726 = vmatpush3.bf16.msra.mxu1 %v4676_v59 }
 0x14c   :  { %v3913_v13 = vpop.eup %3912  ;;  %v293_v14 = vpack.c.bf16 %v280_v0, %v279_v5  ;;  %v256_v8 = vadd.f32 1e-06, %v240_v7  ;;  %3760 = vmatprep.subr.bf16.mxu0 %v3727_v62  ;;  %3728 = vmatprep.subr.bf16.mxu1 %v3727_v62 }
 0x14d   :  { %v255_v15 = vadd.f32 1e-06, %v239_v12  ;;  %v3915_v17 = vpop.eup %3914  ;;  %v282_v18 = vmul.f32 %v3913_v13, %v4631_v10  ;;  %v225_v19 = vpop.xlane.xlu1 %224  ;;  %v3735_v10 = vpack.c.bf16 %v676_v23, %v675_v22 }
 0x14e   :  { %v223_v9 = vpop.xlane.xlu0 %222  ;;  %3439 = vmatprep.mubr.bf16.mxu1 %v293_v14  ;;  %v281_v24 = vmul.f32 %v3915_v17, %v4633_v11  ;;  %3924 = vrsqrt.f32 %v256_v8  ;;  %v242_v27 = vmul.f32 0.0078125, %v225_v19  ;;  %v678_v11 = vld [vmem:[#allocation7 + $0x48] sm:$0xff] }
 0x14f   :  { %v241_v59 = vmul.f32 0.0078125, %v223_v9  ;;  %3926 = vrsqrt.f32 %v255_v15  ;;  %3762 = vmatpush3.bf16.msra.mxu0 %v3727_v62  ;;  %3730 = vmatpush3.bf16.msra.mxu1 %v3727_v62  ;;  %v3739_v42 = vpack.c.bf16 %v678_v11, %v677_v36 }
 0x150   :  { %v3917_v28 = vpop.eup %3916  ;;  %v4691_v29 = vpack.c.bf16 %v282_v18, %v281_v24  ;;  %v258_v30 = vadd.f32 1e-06, %v242_v27  ;;  %3764 = vmatprep.subr.bf16.mxu0 %v3731_v16  ;;  %3732 = vmatprep.subr.bf16.mxu1 %v3731_v16 }
 0x151   :  { %v257_v33 = vadd.f32 1e-06, %v241_v59  ;;  %v3919_v34 = vpop.eup %3918  ;;  %502 = vmatmul.mubr.bf16.gmra.mrb[4].mxu0 %v292_v1  ;;  %v284_v35 = vmul.f32 %v3917_v28, %v4639_v20  ;;  %v684_v1 = vld [vmem:[#allocation7 + $0x78] sm:$0xff] }
 0x152   :  { %511 = vmatprep.mubr.bf16.mxu0 %v5908_v56  ;;  %3440 = vmatmul.mubr.bf16.gmra.mrb[4].mxu1 %v4691_v29  ;;  %v283_v37 = vmul.f32 %v3919_v34, %v4641_v21  ;;  %3928 = vrsqrt.f32 %v258_v30 }
 0x153   :  { %3930 = vrsqrt.f32 %v257_v33  ;;  %3766 = vmatpush3.bf16.msra.mxu0 %v3731_v16  ;;  %3734 = vmatpush3.bf16.msra.mxu1 %v3731_v16 }
 0x154   :  { %v3921_v40 = vpop.eup %3920  ;;  %v295_v41 = vpack.c.bf16 %v284_v35, %v283_v37  ;;  %3768 = vmatprep.subr.bf16.mxu0 %v3735_v10  ;;  %3736 = vmatprep.subr.bf16.mxu1 %v3735_v10 }
 0x155   :  { %v3923_v43 = vpop.eup %3922  ;;  %v286_v20 = vmul.f32 %v3921_v40, %v4647_v25 }
 0x156   :  { %3443 = vmatprep.mubr.bf16.mxu1 %v295_v41  ;;  %v285_v46 = vmul.f32 %v3923_v43, %v4649_v26 }
 0x157   :  { %3770 = vmatpush3.bf16.msra.mxu0 %v3735_v10  ;;  %3738 = vmatpush3.bf16.msra.mxu1 %v3735_v10 }
 0x158   :  { %v3925_v21 = vpop.eup %3924  ;;  %v296_v47 = vpack.c.bf16 %v286_v20, %v285_v46  ;;  %3772 = vmatprep.subr.bf16.mxu0 %v3739_v42  ;;  %3740 = vmatprep.subr.bf16.mxu1 %v3739_v42 }
 0x159   :  { %v3927_v49 = vpop.eup %3926  ;;  %512 = vmatmul.mubr.bf16.gmra.mrb[8].mxu0 %v293_v14  ;;  %v288_v50 = vmul.f32 %v3925_v21, %v4655_v31 }
 0x15a   :  { %521 = vmatprep.mubr.bf16.mxu0 %v5908_v56  ;;  %3444 = vmatmul.mubr.bf16.gmra.mrb[8].mxu1 %v296_v47  ;;  %v287_v25 = vmul.f32 %v3927_v49, %v4657_v32  ;;  %v3751_v32 = vpack.c.bf16 %v684_v1, %v683_v58 }
 0x15b   :  { %3774 = vmatpush3.bf16.msra.mxu0 %v3739_v42  ;;  %3742 = vmatpush3.bf16.msra.mxu1 %v3739_v42 }
 0x15c   :  { %v3929_v26 = vpop.eup %3928  ;;  %v297_v53 = vpack.c.bf16 %v288_v50, %v287_v25  ;;  %3776 = vmatprep.subr.bf16.mxu0 %v3743_v48  ;;  %3744 = vmatprep.subr.bf16.mxu1 %v3743_v48 }
 0x15d   :  { %v3931_v55 = vpop.eup %3930  ;;  %v290_v57 = vmul.f32 %v3929_v26, %v4663_v38  ;;  %v4712_v38 = vld [vmem:[%s5902_s6] ss:$0 sm:$0xff] }
 0x15e   :  { %3447 = vmatprep.mubr.bf16.mxu1 %v297_v53  ;;  %v289_v31 = vmul.f32 %v3931_v55, %v4665_v39  ;;  %v4717_v39 = vld [vmem:[%s5902_s6 + $0x1] ss:$0 sm:$0xff] }
 0x15f   :  { %3778 = vmatpush3.bf16.msra.mxu0 %v3743_v48  ;;  %3746 = vmatpush3.bf16.msra.mxu1 %v3743_v48 }
 0x160   :  { %v298_v60 = vpack.c.bf16 %v290_v57, %v289_v31  ;;  %3780 = vmatprep.subr.bf16.mxu0 %v3747_v54  ;;  %3748 = vmatprep.subr.bf16.mxu1 %v3747_v54 }
 0x161   :  { %522 = vmatmul.mubr.bf16.gmra.mrb[12].mxu0 %v4691_v29 }
 0x162   :  { %531 = vmatprep.mubr.bf16.mxu0 %v5908_v56  ;;  %3448 = vmatmul.mubr.bf16.gmra.mrb[12].mxu1 %v298_v60 }
 0x163   :  { %3782 = vmatpush3.bf16.msra.mxu0 %v3747_v54  ;;  %3750 = vmatpush3.bf16.msra.mxu1 %v3747_v54 }
 0x164   :  { %3784 = vmatprep.subr.bf16.mxu0 %v3751_v32  ;;  %3752 = vmatprep.subr.bf16.mxu1 %v3751_v32 }
 0x167   :  { %3786 = vmatpush3.bf16.msra.mxu0 %v3751_v32  ;;  %3754 = vmatpush3.bf16.msra.mxu1 %v3751_v32 }
 0x169   :  { %532 = vmatmul.mubr.bf16.gmra.mrb[16].mxu0 %v295_v41 }
 0x16a   :  { %541 = vmatprep.mubr.bf16.mxu0 %v5908_v56 }
 0x171   :  { %542 = vmatmul.mubr.bf16.gmra.mrb[20].mxu0 %v296_v47 }
 0x172   :  { %551 = vmatprep.mubr.bf16.mxu0 %v5908_v56 }
 0x179   :  { %552 = vmatmul.mubr.bf16.gmra.mrb[24].mxu0 %v297_v53 }
 0x17a   :  { %561 = vmatprep.mubr.bf16.mxu0 %v5908_v56 }
 0x181   :  { %562 = vmatmul.mubr.bf16.gmra.mrb[28].mxu0 %v298_v60 }
 0x21c   :  { %v4719_v61 = vpop.f32.mrb[0].mxu0 }
 0x21d   :  { %v685_v62 = vmul.f32 %v4719_v61, %v4719_v61  ;;  %v4723_v63 = vpop.f32.mrb[1].mxu0  ;;  %v3437_v0 = vpop.f32.mrb[0].mxu1 }
 0x21e   :  { %v846_v2 = vmul.f32 %v4723_v63, %v4723_v63  ;;  %v1692_v3 = vmul.f32 %v3437_v0, %v4712_v38  ;;  %v2031_v4 = vmul.f32 %v3437_v0, %v4717_v39  ;;  %v4729_v6 = vpop.f32.mrb[2].mxu0  ;;  %v606_v5 = vpop.f32.mrb[1].mxu1 }
 0x21f   :  { %v686_v7 = vmul.f32 %v4729_v6, %v4729_v6  ;;  %v1690_v12 = vmul.f32 %v4712_v38, %v606_v5  ;;  %v2029_v13 = vmul.f32 %v4717_v39, %v606_v5  ;;  %v4735_v14 = vpop.f32.mrb[3].mxu0  ;;  %v3438_v8 = vpop.f32.mrb[2].mxu1  ;;  %3483 = vmatprep.mubr.f32.mxu1 %v685_v62 }
 0x220   :  { %v847_v15 = vmul.f32 %v4735_v14, %v4735_v14  ;;  %v1693_v16 = vmul.f32 %v3438_v8, %v4712_v38  ;;  %v2032_v17 = vmul.f32 %v3438_v8, %v4717_v39  ;;  %v609_v18 = vpop.f32.mrb[3].mxu1  ;;  %3539 = vmatprep.mubr.f32.mxu0 %v846_v2 }
 0x221   :  { %v1691_v19 = vmul.f32 %v4712_v38, %v609_v18  ;;  %v2030_v9 = vmul.f32 %v4717_v39, %v609_v18  ;;  %3484 = vmatmul.mubr.f32.vlgmr.msra.gmra.mrb[16].mxu1 %v686_v7 }
 0x222   :  { %v4743_v22 = vpack.c.bf16 %v1693_v16, %v1692_v3  ;;  %v4745_v23 = vpack.c.bf16 %v2032_v17, %v2031_v4  ;;  %3540 = vmatmul.mubr.f32.vlgmr.msra.gmra.mrb[32].mxu0 %v847_v15 }
 0x223   :  { %v4747_v24 = vpack.c.bf16 %v1691_v19, %v1690_v12  ;;  %v4749_v27 = vpack.c.bf16 %v2030_v9, %v2029_v13 }
 0x224   :  { %5920 = vst [vmem:[#allocation24_spill] sm:$0xff] %v4743_v22  ;;  %v4751_v59 = vpop.f32.mrb[4].mxu0 }
 0x225   :  { %5921 = vst [vmem:[#allocation25_spill] sm:$0xff] %v4747_v24  ;;  %v687_v28 = vmul.f32 %v4751_v59, %v4751_v59  ;;  %v4755_v29 = vpop.f32.mrb[5].mxu0  ;;  %v3441_v30 = vpop.f32.mrb[4].mxu1 }
 0x226   :  { %v848_v33 = vmul.f32 %v4755_v29, %v4755_v29  ;;  %v4759_v10 = vpop.f32.mrb[6].mxu0  ;;  %v1696_v34 = vmul.f32 %v3441_v30, %v4712_v38  ;;  %v2035_v35 = vmul.f32 %v3441_v30, %v4717_v39  ;;  %v622_v36 = vpop.f32.mrb[5].mxu1 }
 0x227   :  { %v688_v11 = vmul.f32 %v4759_v10, %v4759_v10  ;;  %v4765_v37 = vpop.f32.mrb[7].mxu0  ;;  %3486 = vmatprep.mubr.f32.mxu1 %v687_v28  ;;  %v1694_v40 = vmul.f32 %v4712_v38, %v622_v36  ;;  %v2033_v41 = vmul.f32 %v4717_v39, %v622_v36  ;;  %v3442_v42 = vpop.f32.mrb[6].mxu1 }
 0x228   :  { %v849_v43 = vmul.f32 %v4765_v37, %v4765_v37  ;;  %3542 = vmatprep.mubr.f32.mxu0 %v848_v33  ;;  %v1697_v20 = vmul.f32 %v3442_v42, %v4712_v38  ;;  %v2036_v44 = vmul.f32 %v3442_v42, %v4717_v39  ;;  %v625_v45 = vpop.f32.mrb[7].mxu1 }
 0x229   :  { %3487 = vmatmul.mubr.f32.gmra.mrb[18].mxu1 %v688_v11  ;;  %v1695_v46 = vmul.f32 %v4712_v38, %v625_v45  ;;  %v2034_v21 = vmul.f32 %v4717_v39, %v625_v45 }
 0x22a   :  { %3543 = vmatmul.mubr.f32.gmra.mrb[34].mxu0 %v849_v43  ;;  %v4775_v47 = vpack.c.bf16 %v1697_v20, %v1696_v34  ;;  %v4777_v48 = vpack.c.bf16 %v2036_v44, %v2035_v35 }
 0x22b   :  { %v4779_v49 = vpack.c.bf16 %v1695_v46, %v1694_v40  ;;  %v4781_v50 = vpack.c.bf16 %v2034_v21, %v2033_v41 }
 0x22c   :  { %5922 = vst [vmem:[#allocation26_spill] sm:$0xff] %v4775_v47  ;;  %v4783_v51 = vpop.f32.mrb[8].mxu0 }
 0x22d   :  { %5923 = vst [vmem:[#allocation27_spill] sm:$0xff] %v4779_v49  ;;  %v689_v52 = vmul.f32 %v4783_v51, %v4783_v51  ;;  %v4787_v25 = vpop.f32.mrb[9].mxu0  ;;  %v3445_v26 = vpop.f32.mrb[8].mxu1 }
 0x22e   :  { %v850_v53 = vmul.f32 %v4787_v25, %v4787_v25  ;;  %v4791_v54 = vpop.f32.mrb[10].mxu0  ;;  %v1700_v55 = vmul.f32 %v3445_v26, %v4712_v38  ;;  %v2039_v57 = vmul.f32 %v3445_v26, %v4717_v39  ;;  %v638_v58 = vpop.f32.mrb[9].mxu1 }
 0x22f   :  { %v690_v1 = vmul.f32 %v4791_v54, %v4791_v54  ;;  %v4797_v31 = vpop.f32.mrb[11].mxu0  ;;  %3489 = vmatprep.mubr.f32.mxu1 %v689_v52  ;;  %v1698_v60 = vmul.f32 %v4712_v38, %v638_v58  ;;  %v2037_v32 = vmul.f32 %v4717_v39, %v638_v58  ;;  %v3446_v62 = vpop.f32.mrb[10].mxu1 }
 0x230   :  { %v851_v0 = vmul.f32 %v4797_v31, %v4797_v31  ;;  %3545 = vmatprep.mubr.f32.mxu0 %v850_v53  ;;  %v1701_v2 = vmul.f32 %v3446_v62, %v4712_v38  ;;  %v2040_v3 = vmul.f32 %v3446_v62, %v4717_v39  ;;  %v641_v4 = vpop.f32.mrb[11].mxu1 }
 0x231   :  { %3490 = vmatmul.mubr.f32.gmra.mrb[20].mxu1 %v690_v1  ;;  %v1699_v5 = vmul.f32 %v4712_v38, %v641_v4  ;;  %v2038_v7 = vmul.f32 %v4717_v39, %v641_v4 }
 0x232   :  { %3546 = vmatmul.mubr.f32.gmra.mrb[36].mxu0 %v851_v0  ;;  %v4807_v12 = vpack.c.bf16 %v1701_v2, %v1700_v55  ;;  %v4809_v13 = vpack.c.bf16 %v2040_v3, %v2039_v57 }
 0x233   :  { %v4811_v8 = vpack.c.bf16 %v1699_v5, %v1698_v60  ;;  %v4813_v15 = vpack.c.bf16 %v2038_v7, %v2037_v32 }
 0x234   :  { %5924 = vst [vmem:[#allocation28_spill] sm:$0xff] %v4807_v12  ;;  %v4815_v16 = vpop.f32.mrb[12].mxu0 }
 0x235   :  { %5925 = vst [vmem:[#allocation29_spill] sm:$0xff] %v4811_v8  ;;  %v691_v17 = vmul.f32 %v4815_v16, %v4815_v16  ;;  %v4819_v18 = vpop.f32.mrb[13].mxu0  ;;  %v3449_v19 = vpop.f32.mrb[12].mxu1 }
 0x236   :  { %v852_v9 = vmul.f32 %v4819_v18, %v4819_v18  ;;  %v4823_v28 = vpop.f32.mrb[14].mxu0  ;;  %v1704_v30 = vmul.f32 %v3449_v19, %v4712_v38  ;;  %v2043_v33 = vmul.f32 %v3449_v19, %v4717_v39  ;;  %v654_v34 = vpop.f32.mrb[13].mxu1 }
 0x237   :  { %v692_v35 = vmul.f32 %v4823_v28, %v4823_v28  ;;  %v4829_v36 = vpop.f32.mrb[15].mxu0  ;;  %3492 = vmatprep.mubr.f32.mxu1 %v691_v17  ;;  %v1702_v11 = vmul.f32 %v4712_v38, %v654_v34  ;;  %v2041_v40 = vmul.f32 %v4717_v39, %v654_v34  ;;  %v3450_v41 = vpop.f32.mrb[14].mxu1 }
 0x238   :  { %v853_v42 = vmul.f32 %v4829_v36, %v4829_v36  ;;  %3548 = vmatprep.mubr.f32.mxu0 %v852_v9  ;;  %v1705_v43 = vmul.f32 %v3450_v41, %v4712_v38  ;;  %v2044_v20 = vmul.f32 %v3450_v41, %v4717_v39  ;;  %v657_v44 = vpop.f32.mrb[15].mxu1 }
 0x239   :  { %3493 = vmatmul.mubr.f32.gmra.mrb[22].mxu1 %v692_v35  ;;  %v1703_v45 = vmul.f32 %v4712_v38, %v657_v44  ;;  %v2042_v46 = vmul.f32 %v4717_v39, %v657_v44 }
 0x23a   :  { %3549 = vmatmul.mubr.f32.gmra.mrb[38].mxu0 %v853_v42  ;;  %v4839_v21 = vpack.c.bf16 %v1705_v43, %v1704_v30  ;;  %v4841_v52 = vpack.c.bf16 %v2044_v20, %v2043_v33 }
 0x23b   :  { %v4843_v26 = vpack.c.bf16 %v1703_v45, %v1702_v11  ;;  %v4845_v53 = vpack.c.bf16 %v2042_v46, %v2041_v40 }
 0x23c   :  { %5926 = vst [vmem:[#allocation30_spill] sm:$0xff] %v4839_v21  ;;  %5927 = vst [vmem:[#allocation31_spill] sm:$0xff] %v4841_v52  ;;  %v4847_v55 = vpop.f32.mrb[16].mxu0 }
 0x23d   :  { %5928 = vst [vmem:[#allocation32_spill] sm:$0xff] %v4843_v26  ;;  %5929 = vst [vmem:[#allocation33_spill] sm:$0xff] %v4845_v53  ;;  %v693_v57 = vmul.f32 %v4847_v55, %v4847_v55  ;;  %v4851_v58 = vpop.f32.mrb[17].mxu0 }
 0x23e   :  { %v854_v38 = vmul.f32 %v4851_v58, %v4851_v58  ;;  %v4855_v39 = vpop.f32.mrb[18].mxu0 }
 0x23f   :  { %v694_v1 = vmul.f32 %v4855_v39, %v4855_v39  ;;  %v4859_v60 = vpop.f32.mrb[19].mxu0  ;;  %3495 = vmatprep.mubr.f32.mxu1 %v693_v57 }
 0x240   :  { %v855_v32 = vmul.f32 %v4859_v60, %v4859_v60  ;;  %3551 = vmatprep.mubr.f32.mxu0 %v854_v38 }
 0x241   :  { %3496 = vmatmul.mubr.f32.gmra.mrb[24].mxu1 %v694_v1 }
 0x242   :  { %3552 = vmatmul.mubr.f32.gmra.mrb[40].mxu0 %v855_v32 }
 0x244   :  { %v4863_v62 = vpop.f32.mrb[20].mxu0 }
 0x245   :  { %v695_v0 = vmul.f32 %v4863_v62, %v4863_v62  ;;  %v4867_v2 = vpop.f32.mrb[21].mxu0 }
 0x246   :  { %v856_v3 = vmul.f32 %v4867_v2, %v4867_v2  ;;  %v4871_v4 = vpop.f32.mrb[22].mxu0 }
 0x247   :  { %v696_v5 = vmul.f32 %v4871_v4, %v4871_v4  ;;  %v4875_v7 = vpop.f32.mrb[23].mxu0  ;;  %3498 = vmatprep.mubr.f32.mxu1 %v695_v0 }
 0x248   :  { %v857_v17 = vmul.f32 %v4875_v7, %v4875_v7  ;;  %3554 = vmatprep.mubr.f32.mxu0 %v856_v3 }
 0x249   :  { %3499 = vmatmul.mubr.f32.gmra.mrb[26].mxu1 %v696_v5 }
 0x24a   :  { %3555 = vmatmul.mubr.f32.gmra.mrb[42].mxu0 %v857_v17 }
 0x24c   :  { %v4879_v19 = vpop.f32.mrb[24].mxu0 }
 0x24d   :  { %v697_v9 = vmul.f32 %v4879_v19, %v4879_v19  ;;  %v4883_v30 = vpop.f32.mrb[25].mxu0 }
 0x24e   :  { %v858_v33 = vmul.f32 %v4883_v30, %v4883_v30  ;;  %v4887_v34 = vpop.f32.mrb[26].mxu0 }
 0x24f   :  { %v698_v35 = vmul.f32 %v4887_v34, %v4887_v34  ;;  %v4891_v11 = vpop.f32.mrb[27].mxu0  ;;  %3501 = vmatprep.mubr.f32.mxu1 %v697_v9 }
 0x250   :  { %v859_v40 = vmul.f32 %v4891_v11, %v4891_v11  ;;  %3557 = vmatprep.mubr.f32.mxu0 %v858_v33 }
 0x251   :  { %3502 = vmatmul.mubr.f32.gmra.mrb[28].mxu1 %v698_v35 }
 0x252   :  { %3558 = vmatmul.mubr.f32.gmra.mrb[44].mxu0 %v859_v40 }
 0x254   :  { %v4895_v41 = vpop.f32.mrb[28].mxu0 }
 0x255   :  { %v699_v42 = vmul.f32 %v4895_v41, %v4895_v41  ;;  %v4899_v43 = vpop.f32.mrb[29].mxu0 }
 0x256   :  { %v860_v20 = vmul.f32 %v4899_v43, %v4899_v43  ;;  %v4903_v44 = vpop.f32.mrb[30].mxu0 }
 0x257   :  { %v700_v45 = vmul.f32 %v4903_v44, %v4903_v44  ;;  %v4907_v46 = vpop.f32.mrb[31].mxu0  ;;  %3504 = vmatprep.mubr.f32.mxu1 %v699_v42 }
 0x258   :  { %v861_v57 = vmul.f32 %v4907_v46, %v4907_v46  ;;  %3560 = vmatprep.mubr.f32.mxu0 %v860_v20 }
 0x259   :  { %3505 = vmatmul.mubr.f32.gmra.mrb[30].mxu1 %v700_v45 }
 0x25a   :  { %3561 = vmatmul.mubr.f32.gmra.mrb[46].mxu0 %v861_v57 }
 0x2f4   :  { %v3485_v38 = vpop.f32.mrb[16].mxu1 }
 0x2f5   :  { %v1008_v1 = vmul.f32 0.015625, %v3485_v38  ;;  %v767_v32 = vpop.f32.mrb[17].mxu1  ;;  %v3541_v0 = vpop.f32.mrb[32].mxu0 }
 0x2f6   :  { %v1007_v3 = vmul.f32 0.015625, %v767_v32  ;;  %v1072_v5 = vmul.f32 0.015625, %v3541_v0  ;;  %v928_v17 = vpop.f32.mrb[33].mxu0 }
 0x2f7   :  { %v1024_v9 = vadd.f32 1e-06, %v1008_v1  ;;  %v1071_v33 = vmul.f32 0.015625, %v928_v17 }
 0x2f8   :  { %v1023_v35 = vadd.f32 1e-06, %v1007_v3  ;;  %v1088_v40 = vadd.f32 1e-06, %v1072_v5 }
 0x2f9   :  { %3932 = vrsqrt.f32 %v1024_v9  ;;  %v1087_v56 = vadd.f32 1e-06, %v1071_v33 }
 0x2fa   :  { %3934 = vrsqrt.f32 %v1023_v35 }
 0x2fb   :  { %3936 = vrsqrt.f32 %v1088_v40 }
 0x2fc   :  { %3938 = vrsqrt.f32 %v1087_v56  ;;  %v3488_v42 = vpop.f32.mrb[18].mxu1 }
 0x2fd   :  { %v1010_v20 = vmul.f32 0.015625, %v3488_v42  ;;  %v777_v45 = vpop.f32.mrb[19].mxu1  ;;  %v3544_v57 = vpop.f32.mrb[34].mxu0 }
 0x2fe   :  { %v1009_v21 = vmul.f32 0.015625, %v777_v45  ;;  %v1074_v38 = vmul.f32 0.015625, %v3544_v57  ;;  %v938_v26 = vpop.f32.mrb[35].mxu0 }
 0x2ff   :  { %v1026_v12 = vadd.f32 1e-06, %v1010_v20  ;;  %v1073_v32 = vmul.f32 0.015625, %v938_v26 }
 0x300   :  { %v1025_v0 = vadd.f32 1e-06, %v1009_v21  ;;  %v1090_v8 = vadd.f32 1e-06, %v1074_v38 }
 0x301   :  { %3940 = vrsqrt.f32 %v1026_v12  ;;  %v1089_v1 = vadd.f32 1e-06, %v1073_v32 }
 0x302   :  { %3942 = vrsqrt.f32 %v1025_v0 }
 0x303   :  { %v3933_v3 = vpop.eup %3932  ;;  %3944 = vrsqrt.f32 %v1090_v8 }
 0x304   :  { %v3935_v5 = vpop.eup %3934  ;;  %3946 = vrsqrt.f32 %v1089_v1  ;;  %v3491_v17 = vpop.f32.mrb[20].mxu1  ;;  %v4912_v56 = vmul.f32 %v3933_v3, %v4729_v6  ;;  %v4927_v3 = vld [vmem:[#allocation8 + $0x10] sm:$0xff] }
 0x305   :  { %v3937_v9 = vpop.eup %3936  ;;  %v1012_v33 = vmul.f32 0.015625, %v3491_v17  ;;  %v787_v35 = vpop.f32.mrb[21].mxu1  ;;  %v4915_v42 = vmul.f32 %v3935_v5, %v4719_v61 }
 0x306   :  { %v3547_v40 = vpop.f32.mrb[36].mxu0  ;;  %v3939_v21 = vpop.eup %3938  ;;  %v1011_v26 = vmul.f32 0.015625, %v787_v35  ;;  %v4918_v45 = vmul.f32 %v3937_v9, %v4735_v14 }
 0x307   :  { %v1076_v12 = vmul.f32 0.015625, %v3547_v40  ;;  %v948_v20 = vpop.f32.mrb[37].mxu0  ;;  %v1028_v8 = vadd.f32 1e-06, %v1012_v33  ;;  %v4921_v38 = vmul.f32 %v3939_v21, %v4723_v63 }
 0x308   :  { %v1075_v57 = vmul.f32 0.015625, %v948_v20  ;;  %v1027_v6 = vadd.f32 1e-06, %v1011_v26  ;;  %1265 = vrot.lane.b32.xlu1 %v4918_v45, %s4416_s4 }
 0x309   :  { %v1092_v32 = vadd.f32 1e-06, %v1076_v12  ;;  %3948 = vrsqrt.f32 %v1028_v8  ;;  %1263 = vrot.lane.b32.xlu0 %v4921_v38, %s4416_s4 }
 0x30a   :  { %v1091_v61 = vadd.f32 1e-06, %v1075_v57  ;;  %3950 = vrsqrt.f32 %v1027_v6 }
 0x30b   :  { %v3941_v0 = vpop.eup %3940  ;;  %3952 = vrsqrt.f32 %v1092_v32 }
 0x30c   :  { %v3943_v14 = vpop.eup %3942  ;;  %3954 = vrsqrt.f32 %v1091_v61  ;;  %v3494_v1 = vpop.f32.mrb[22].mxu1  ;;  %v4930_v63 = vmul.f32 %v3941_v0, %v4759_v10 }
 0x30d   :  { %v3945_v5 = vpop.eup %3944  ;;  %v1014_v17 = vmul.f32 0.015625, %v3494_v1  ;;  %v797_v9 = vpop.f32.mrb[23].mxu1  ;;  %v4933_v35 = vmul.f32 %v3943_v14, %v4751_v59  ;;  %v4947_v1 = vld [vmem:[#allocation8 + $0x20] sm:$0xff] }
 0x30e   :  { %v3550_v33 = vpop.f32.mrb[38].mxu0  ;;  %v3947_v40 = vpop.eup %3946  ;;  %v1013_v21 = vmul.f32 0.015625, %v797_v9  ;;  %v4936_v20 = vmul.f32 %v3945_v5, %v4765_v37 }
 0x30f   :  { %v1078_v26 = vmul.f32 0.015625, %v3550_v33  ;;  %v958_v12 = vpop.f32.mrb[39].mxu0  ;;  %v1030_v8 = vadd.f32 1e-06, %v1014_v17  ;;  %v4939_v6 = vmul.f32 %v3947_v40, %v4755_v29  ;;  %v4943_v10 = vmul.f32 %v4927_v3, %v4933_v35 }
 0x310   :  { %v1077_v57 = vmul.f32 0.015625, %v958_v12  ;;  %v1029_v32 = vadd.f32 1e-06, %v1013_v21 }
 0x311   :  { %v1094_v61 = vadd.f32 1e-06, %v1078_v26  ;;  %3956 = vrsqrt.f32 %v1030_v8  ;;  %1267 = vrot.lane.b32.xlu1 %v4939_v6, %s4416_s4 }
 0x312   :  { %v1093_v59 = vadd.f32 1e-06, %v1077_v57  ;;  %3958 = vrsqrt.f32 %v1029_v32 }
 0x313   :  { %v3949_v0 = vpop.eup %3948  ;;  %3960 = vrsqrt.f32 %v1094_v61 }
 0x314   :  { %v3951_v37 = vpop.eup %3950  ;;  %3962 = vrsqrt.f32 %v1093_v59  ;;  %v3497_v14 = vpop.f32.mrb[24].mxu1  ;;  %v4950_v29 = vmul.f32 %v3949_v0, %v4791_v54 }
 0x315   :  { %v3953_v5 = vpop.eup %3952  ;;  %v1016_v17 = vmul.f32 0.015625, %v3497_v14  ;;  %1269 = vrot.lane.b32.xlu1 %v4936_v20, %s4416_s4  ;;  %v807_v9 = vpop.f32.mrb[25].mxu1  ;;  %v4955_v40 = vmul.f32 %v3951_v37, %v4783_v51 }
 0x316   :  { %v3553_v33 = vpop.f32.mrb[40].mxu0  ;;  %v3955_v21 = vpop.eup %3954  ;;  %v1015_v26 = vmul.f32 0.015625, %v807_v9  ;;  %v4958_v57 = vmul.f32 %v3953_v5, %v4797_v31  ;;  %v4971_v5 = vld [vmem:[#allocation8 + $0x30] sm:$0xff] }
 0x317   :  { %v1080_v12 = vmul.f32 0.015625, %v3553_v33  ;;  %v968_v8 = vpop.f32.mrb[41].mxu0  ;;  %v1032_v32 = vadd.f32 1e-06, %v1016_v17  ;;  %v4961_v61 = vmul.f32 %v3955_v21, %v4787_v25  ;;  %v4965_v59 = vmul.f32 %v4947_v1, %v4955_v40 }
 0x318   :  { %v1079_v54 = vmul.f32 0.015625, %v968_v8  ;;  %v1031_v0 = vadd.f32 1e-06, %v1015_v26 }
 0x319   :  { %v1096_v14 = vadd.f32 1e-06, %v1080_v12  ;;  %3964 = vrsqrt.f32 %v1032_v32  ;;  %1273 = vrot.lane.b32.xlu1 %v4958_v57, %s4416_s4  ;;  %1271 = vrot.lane.b32.xlu0 %v4961_v61, %s4416_s4 }
 0x31a   :  { %v1095_v51 = vadd.f32 1e-06, %v1079_v54  ;;  %3966 = vrsqrt.f32 %v1031_v0 }
 0x31b   :  { %v3957_v31 = vpop.eup %3956  ;;  %3968 = vrsqrt.f32 %v1096_v14 }
 0x31c   :  { %v3959_v37 = vpop.eup %3958  ;;  %3970 = vrsqrt.f32 %v1095_v51  ;;  %v3500_v25 = vpop.f32.mrb[26].mxu1  ;;  %v4974_v17 = vmul.f32 %v3957_v31, %v4823_v28 }
 0x31d   :  { %v3961_v9 = vpop.eup %3960  ;;  %v1018_v33 = vmul.f32 0.015625, %v3500_v25  ;;  %v817_v21 = vpop.f32.mrb[27].mxu1  ;;  %v4977_v12 = vmul.f32 %v3959_v37, %v4815_v16 }
 0x31e   :  { %v3556_v26 = vpop.f32.mrb[42].mxu0  ;;  %v3963_v8 = vpop.eup %3962  ;;  %v1017_v32 = vmul.f32 0.015625, %v817_v21  ;;  %v4980_v14 = vmul.f32 %v3961_v9, %v4829_v36  ;;  %v4993_v9 = vld [vmem:[#allocation8 + $0x40] sm:$0xff] }
 0x31f   :  { %v1082_v54 = vmul.f32 0.015625, %v3556_v26  ;;  %v978_v0 = vpop.f32.mrb[43].mxu0  ;;  %v1034_v51 = vadd.f32 1e-06, %v1018_v33  ;;  %v4983_v49 = vmul.f32 %v3963_v8, %v4819_v18  ;;  %v4987_v28 = vmul.f32 %v4971_v5, %v4977_v12 }
 0x320   :  { %v1081_v47 = vmul.f32 0.015625, %v978_v0  ;;  %v1033_v31 = vadd.f32 1e-06, %v1017_v32  ;;  %1277 = vrot.lane.b32.xlu1 %v4980_v14, %s4416_s4 }
 0x321   :  { %v1098_v25 = vadd.f32 1e-06, %v1082_v54  ;;  %3972 = vrsqrt.f32 %v1034_v51  ;;  %1275 = vrot.lane.b32.xlu0 %v4983_v49, %s4416_s4 }
 0x322   :  { %v1097_v16 = vadd.f32 1e-06, %v1081_v47  ;;  %3974 = vrsqrt.f32 %v1033_v31 }
 0x323   :  { %v3965_v36 = vpop.eup %3964  ;;  %3976 = vrsqrt.f32 %v1098_v25 }
 0x324   :  { %v3967_v37 = vpop.eup %3966  ;;  %3978 = vrsqrt.f32 %v1097_v16  ;;  %v3503_v18 = vpop.f32.mrb[28].mxu1  ;;  %v4996_v33 = vmul.f32 %v3965_v36, %v4855_v39 }
 0x325   :  { %v3969_v21 = vpop.eup %3968  ;;  %v1020_v26 = vmul.f32 0.015625, %v3503_v18  ;;  %v827_v8 = vpop.f32.mrb[29].mxu1  ;;  %v4999_v47 = vmul.f32 %v3967_v37, %v4847_v55 }
 0x326   :  { %v3559_v32 = vpop.f32.mrb[44].mxu0  ;;  %v3971_v54 = vpop.eup %3970  ;;  %v1019_v0 = vmul.f32 0.015625, %v827_v8  ;;  %v5002_v25 = vmul.f32 %v3969_v21, %v4859_v60  ;;  %v5015_v21 = vld [vmem:[#allocation8 + $0x50] sm:$0xff] }
 0x327   :  { %v1084_v51 = vmul.f32 0.015625, %v3559_v32  ;;  %v988_v31 = vpop.f32.mrb[45].mxu0  ;;  %v1036_v16 = vadd.f32 1e-06, %v1020_v26  ;;  %v5005_v24 = vmul.f32 %v3971_v54, %v4851_v58  ;;  %v5009_v39 = vmul.f32 %v4993_v9, %v4999_v47 }
 0x328   :  { %v1083_v22 = vmul.f32 0.015625, %v988_v31  ;;  %v1035_v36 = vadd.f32 1e-06, %v1019_v0  ;;  %1281 = vrot.lane.b32.xlu1 %v5002_v25, %s4416_s4 }
 0x329   :  { %v1100_v18 = vadd.f32 1e-06, %v1084_v51  ;;  %3980 = vrsqrt.f32 %v1036_v16  ;;  %1279 = vrot.lane.b32.xlu0 %v5005_v24, %s4416_s4 }
 0x32a   :  { %v1099_v55 = vadd.f32 1e-06, %v1083_v22  ;;  %3982 = vrsqrt.f32 %v1035_v36 }
 0x32b   :  { %v3973_v60 = vpop.eup %3972  ;;  %3984 = vrsqrt.f32 %v1100_v18 }
 0x32c   :  { %v3975_v37 = vpop.eup %3974  ;;  %3986 = vrsqrt.f32 %v1099_v55  ;;  %v3506_v58 = vpop.f32.mrb[30].mxu1  ;;  %v5018_v26 = vmul.f32 %v3973_v60, %v4871_v4 }
 0x32d   :  { %v3977_v8 = vpop.eup %3976  ;;  %v1022_v32 = vmul.f32 0.015625, %v3506_v58  ;;  %v837_v54 = vpop.f32.mrb[31].mxu1  ;;  %v1065_v22 = vmul.f32 %v3975_v37, %v4863_v62 }
 0x32e   :  { %v3562_v0 = vpop.f32.mrb[46].mxu0  ;;  %v3979_v51 = vpop.eup %3978  ;;  %v1021_v31 = vmul.f32 0.015625, %v837_v54  ;;  %v5022_v18 = vmul.f32 %v3977_v8, %v4875_v7 }
 0x32f   :  { %v1086_v16 = vmul.f32 0.015625, %v3562_v0  ;;  %v998_v36 = vpop.f32.mrb[47].mxu0  ;;  %v1038_v55 = vadd.f32 1e-06, %v1022_v32  ;;  %v5025_v53 = vmul.f32 %v3979_v51, %v4867_v2  ;;  %v5028_v4 = vmul.f32 %v5015_v21, %v1065_v22  ;;  %v5034_v2 = vld [vmem:[#allocation8 + $0x60] sm:$0xff] }
 0x330   :  { %v1085_v52 = vmul.f32 0.015625, %v998_v36  ;;  %v1037_v60 = vadd.f32 1e-06, %v1021_v31  ;;  %1285 = vrot.lane.b32.xlu1 %v5022_v18, %s4416_s4  ;;  %v5053_v36 = vld [vmem:[#allocation8 + $0x70] sm:$0xff] }
 0x331   :  { %v1102_v58 = vadd.f32 1e-06, %v1086_v16  ;;  %3988 = vrsqrt.f32 %v1038_v55  ;;  %1283 = vrot.lane.b32.xlu0 %v5025_v53, %s4416_s4 }
 0x332   :  { %v1101_v62 = vadd.f32 1e-06, %v1085_v52  ;;  %3990 = vrsqrt.f32 %v1037_v60 }
 0x333   :  { %v3981_v7 = vpop.eup %3980  ;;  %3992 = vrsqrt.f32 %v1102_v58 }
 0x334   :  { %v3983_v37 = vpop.eup %3982  ;;  %3994 = vrsqrt.f32 %v1101_v62  ;;  %v5037_v8 = vmul.f32 %v3981_v7, %v4887_v34 }
 0x335   :  { %v3985_v32 = vpop.eup %3984  ;;  %v1067_v54 = vmul.f32 %v3983_v37, %v4879_v19 }
 0x336   :  { %v3987_v0 = vpop.eup %3986  ;;  %v5041_v51 = vmul.f32 %v3985_v32, %v4891_v11  ;;  %v5115_v32 = vld [vmem:[#allocation10 + $0x10] sm:$0xff] }
 0x337   :  { %v5044_v52 = vmul.f32 %v3987_v0, %v4883_v30  ;;  %v5047_v31 = vmul.f32 %v5034_v2, %v1067_v54 }
 0x338   :  { %1289 = vrot.lane.b32.xlu1 %v5041_v51, %s4416_s4 }
 0x339   :  { %1287 = vrot.lane.b32.xlu0 %v5044_v52, %s4416_s4 }
 0x33b   :  { %v3989_v34 = vpop.eup %3988 }
 0x33c   :  { %v3991_v16 = vpop.eup %3990  ;;  %v5056_v19 = vmul.f32 %v3989_v34, %v4903_v44  ;;  %v5102_v44 = vld [vmem:[#allocation10 + $0x8] sm:$0xff]  ;;  %v1249_v34 = vmul.f32 %v4927_v3, %v4939_v6 }
 0x33d   :  { %v3993_v11 = vpop.eup %3992  ;;  %v1069_v30 = vmul.f32 %v3991_v16, %v4895_v41  ;;  %v5098_v41 = vld [vmem:[#allocation8] sm:$0xff]  ;;  %v5120_v16 = vld [vmem:[#allocation8 + $0x18] sm:$0xff] }
 0x33e   :  { %v3995_v55 = vpop.eup %3994  ;;  %v5060_v60 = vmul.f32 %v3993_v11, %v4907_v46  ;;  %v5122_v11 = vld [vmem:[#allocation10 + $0x18] sm:$0xff] }
 0x33f   :  { %v5063_v58 = vmul.f32 %v3995_v55, %v4899_v43  ;;  %v5066_v62 = vmul.f32 %v5053_v36, %v1069_v30  ;;  %v5100_v43 = vld [vmem:[#allocation10] sm:$0xff]  ;;  %v1250_v55 = vmul.f32 %v5120_v16, %v4936_v20 }
 0x340   :  { %1293 = vrot.lane.b32.xlu1 %v5060_v60, %s4416_s4 }
 0x341   :  { %1291 = vrot.lane.b32.xlu0 %v5063_v58, %s4416_s4 }
 0x344   :  { %1183 = vrot.lane.b32.xlu1 %v4915_v42, %s4416_s4 }
 0x348   :  { %1185 = vrot.lane.b32.xlu1 %v4912_v56, %s4416_s4 }
 0x34c   :  { %1187 = vrot.lane.b32.xlu1 %v4933_v35, %s4416_s4 }
 0x350   :  { %1189 = vrot.lane.b32.xlu1 %v4930_v63, %s4416_s4 }
 0x354   :  { %1191 = vrot.lane.b32.xlu1 %v4955_v40, %s4416_s4 }
 0x358   :  { %1193 = vrot.lane.b32.xlu1 %v4950_v29, %s4416_s4 }
 0x35c   :  { %1195 = vrot.lane.b32.xlu1 %v4977_v12, %s4416_s4  ;;  %v1247_v12 = vmul.f32 %v5098_v41, %v4921_v38 }
 0x360   :  { %1197 = vrot.lane.b32.xlu1 %v4974_v17, %s4416_s4 }
 0x364   :  { %1199 = vrot.lane.b32.xlu1 %v4999_v47, %s4416_s4  ;;  %v5108_v47 = vld [vmem:[#allocation8 + $0x8] sm:$0xff] }
 0x365   :  { %v1248_v37 = vmul.f32 %v5108_v47, %v4918_v45 }
 0x368   :  { %1201 = vrot.lane.b32.xlu1 %v4996_v33, %s4416_s4 }
 0x36c   :  { %1203 = vrot.lane.b32.xlu1 %v1065_v22, %s4416_s4 }
 0x370   :  { %1205 = vrot.lane.b32.xlu1 %v5018_v26, %s4416_s4 }
 0x374   :  { %1207 = vrot.lane.b32.xlu1 %v1067_v54, %s4416_s4 }
 0x378   :  { %1209 = vrot.lane.b32.xlu1 %v5037_v8, %s4416_s4 }
 0x37a   :  { %v1266_v46 = vpop.permute.xlu1 %1265 }
 0x37b   :  { %v1264_v35 = vpop.permute.xlu0 %1263  ;;  %v1296_v22 = vmul.f32 %v1266_v46, %v5102_v44 }
 0x37c   :  { %v1295_v40 = vmul.f32 %v1264_v35, %v5100_v43  ;;  %1211 = vrot.lane.b32.xlu1 %v1069_v30, %s4416_s4  ;;  %v5127_v35 = vld [vmem:[#allocation10 + $0x20] sm:$0xff] }
 0x37d   :  { %v1312_v54 = vadd.f32 %v1296_v22, %v1248_v37  ;;  %v1251_v22 = vmul.f32 %v4947_v1, %v4961_v61  ;;  %v5134_v37 = vld [vmem:[#allocation8 + $0x28] sm:$0xff]  ;;  %v1253_v1 = vmul.f32 %v4971_v5, %v4983_v49  ;;  %v1255_v49 = vmul.f32 %v4993_v9, %v5005_v24 }
 0x37e   :  { %v1311_v7 = vadd.f32 %v1295_v40, %v1247_v12  ;;  %v5129_v12 = vld [vmem:[#allocation10 + $0x28] sm:$0xff]  ;;  %v1257_v24 = vmul.f32 %v5015_v21, %v5025_v53  ;;  %v1259_v53 = vmul.f32 %v5034_v2, %v5044_v52  ;;  %v1261_v2 = vmul.f32 %v5053_v36, %v5063_v58 }
 0x380   :  { %1213 = vrot.lane.b32.xlu1 %v5056_v19, %s4416_s4  ;;  %1327 = vxpose.xlu0.b32.start [1/16] %v1311_v7, 128 }
 0x383   :  { %v1268_v0 = vpop.permute.xlu1 %1267 }
 0x384   :  { %v1297_v38 = vmul.f32 %v1268_v0, %v5115_v32  ;;  %1328 = vxpose.xlu0.b32.cont [2/16] %v1312_v54, 128  ;;  %v1252_v0 = vmul.f32 %v5134_v37, %v4958_v57 }
 0x386   :  { %v1313_v30 = vadd.f32 %v1297_v38, %v1249_v34  ;;  %v5139_v34 = vld [vmem:[#allocation10 + $0x30] sm:$0xff] }
 0x387   :  { %v1270_v45 = vpop.permute.xlu1 %1269 }
 0x388   :  { %v1298_v46 = vmul.f32 %v1270_v45, %v5122_v11  ;;  %1329 = vxpose.xlu0.b32.cont [3/16] %v1313_v30, 128  ;;  %v5141_v30 = vld [vmem:[#allocation10 + $0x38] sm:$0xff] }
 0x38a   :  { %v1314_v40 = vadd.f32 %v1298_v46, %v1250_v55  ;;  %v5146_v46 = vld [vmem:[#allocation8 + $0x38] sm:$0xff] }
 0x38b   :  { %v1274_v3 = vpop.permute.xlu1 %1273  ;;  %v1272_v6 = vpop.permute.xlu0 %1271  ;;  %v1254_v57 = vmul.f32 %v5146_v46, %v4980_v14 }
 0x38c   :  { %v1299_v7 = vmul.f32 %v1272_v6, %v5127_v35  ;;  %1330 = vxpose.xlu0.b32.cont [4/16] %v1314_v40, 128  ;;  %v1300_v20 = vmul.f32 %v1274_v3, %v5129_v12  ;;  %v5151_v6 = vld [vmem:[#allocation10 + $0x40] sm:$0xff] }
 0x38e   :  { %v1315_v54 = vadd.f32 %v1299_v7, %v1251_v22  ;;  %v1316_v38 = vadd.f32 %v1300_v20, %v1252_v0  ;;  %v5153_v7 = vld [vmem:[#allocation10 + $0x48] sm:$0xff] }
 0x38f   :  { %v5158_v0 = vld [vmem:[#allocation8 + $0x48] sm:$0xff] }
 0x390   :  { %1331 = vxpose.xlu0.b32.cont [5/16] %v1315_v54, 128  ;;  %v1256_v14 = vmul.f32 %v5158_v0, %v5002_v25 }
 0x392   :  { %v1278_v45 = vpop.permute.xlu1 %1277 }
 0x393   :  { %v1276_v55 = vpop.permute.xlu0 %1275  ;;  %v1302_v40 = vmul.f32 %v1278_v45, %v5141_v30 }
 0x394   :  { %v1301_v61 = vmul.f32 %v1276_v55, %v5139_v34  ;;  %1332 = vxpose.xlu0.b32.cont [6/16] %v1316_v38, 128  ;;  %v5163_v55 = vld [vmem:[#allocation10 + $0x50] sm:$0xff] }
 0x395   :  { %v1318_v22 = vadd.f32 %v1302_v40, %v1254_v57  ;;  %v5170_v57 = vld [vmem:[#allocation8 + $0x58] sm:$0xff] }
 0x396   :  { %v1317_v3 = vadd.f32 %v1301_v61, %v1253_v1  ;;  %v5165_v61 = vld [vmem:[#allocation10 + $0x58] sm:$0xff]  ;;  %v1258_v25 = vmul.f32 %v5170_v57, %v5022_v18 }
 0x398   :  { %1333 = vxpose.xlu0.b32.cont [7/16] %v1317_v3, 128 }
 0x39a   :  { %v1282_v20 = vpop.permute.xlu1 %1281 }
 0x39b   :  { %v1280_v54 = vpop.permute.xlu0 %1279  ;;  %v1304_v38 = vmul.f32 %v1282_v20, %v5153_v7 }
 0x39c   :  { %v1303_v5 = vmul.f32 %v1280_v54, %v5151_v6  ;;  %1334 = vxpose.xlu0.b32.cont [8/16] %v1318_v22, 128  ;;  %v5175_v54 = vld [vmem:[#allocation10 + $0x60] sm:$0xff] }
 0x39d   :  { %v1320_v1 = vadd.f32 %v1304_v38, %v1256_v14  ;;  %v5182_v14 = vld [vmem:[#allocation8 + $0x68] sm:$0xff] }
 0x39e   :  { %v1319_v45 = vadd.f32 %v1303_v5, %v1255_v49  ;;  %v5177_v5 = vld [vmem:[#allocation10 + $0x68] sm:$0xff]  ;;  %v1260_v18 = vmul.f32 %v5182_v14, %v5041_v51 }
 0x3a0   :  { %1335 = vxpose.xlu0.b32.cont [9/16] %v1319_v45, 128 }
 0x3a2   :  { %v1286_v40 = vpop.permute.xlu1 %1285 }
 0x3a3   :  { %v1284_v3 = vpop.permute.xlu0 %1283  ;;  %v1306_v22 = vmul.f32 %v1286_v40, %v5165_v61 }
 0x3a4   :  { %v1305_v9 = vmul.f32 %v1284_v3, %v5163_v55  ;;  %1336 = vxpose.xlu0.b32.cont [10/16] %v1320_v1, 128  ;;  %v5187_v3 = vld [vmem:[#allocation10 + $0x70] sm:$0xff] }
 0x3a5   :  { %v1322_v49 = vadd.f32 %v1306_v22, %v1258_v25  ;;  %v5189_v22 = vld [vmem:[#allocation10 + $0x78] sm:$0xff] }
 0x3a6   :  { %v1321_v20 = vadd.f32 %v1305_v9, %v1257_v24  ;;  %v5194_v25 = vld [vmem:[#allocation8 + $0x78] sm:$0xff] }
 0x3a8   :  { %1337 = vxpose.xlu0.b32.cont [11/16] %v1321_v20, 128 }
 0x3aa   :  { %v1290_v38 = vpop.permute.xlu1 %1289 }
 0x3ab   :  { %v1288_v45 = vpop.permute.xlu0 %1287  ;;  %v1308_v1 = vmul.f32 %v1290_v38, %v5177_v5 }
 0x3ac   :  { %v1307_v21 = vmul.f32 %v1288_v45, %v5175_v54  ;;  %1338 = vxpose.xlu0.b32.cont [12/16] %v1322_v49, 128 }
 0x3ad   :  { %v1324_v24 = vadd.f32 %v1308_v1, %v1260_v18  ;;  %v5207_v18 = vld [vmem:[%s5901_s5] ss:$0 sm:$0xff] }
 0x3ae   :  { %v1323_v40 = vadd.f32 %v1307_v21, %v1259_v53  ;;  %v1262_v53 = vmul.f32 %v5194_v25, %v5060_v60  ;;  %v1167_v21 = vmul.f32 %v5098_v41, %v4915_v42  ;;  %v5213_v60 = vld [vmem:[%s5901_s5 + $0x1] ss:$0 sm:$0xff]  ;;  %s4420_s5 = smov [#allocation17]  }
 0x3af   :  { %s3111_s30 = sshll.u32 %s4420_s5, 4  ;;  %s3112_s30 = int_to_ptr.vmem [resolvable:$true] %s3111_s30 }
 0x3b0   :  { %1339 = vxpose.xlu0.b32.cont [13/16] %v1323_v40, 128  ;;  %v1168_v40 = vmul.f32 %v5108_v47, %v4912_v56  ;;  %s4370_s12 = scalar_lea.vmem %s3112_s30, 2048  ;;  %p4375_p3 = scmp.lt.s32.totalorder %s3112_s30, %s3112_s30 }
 0x3b1   :  { %p4371_p2 = scmp.ne.s32.totalorder %s3112_s30, %s4370_s12  ;;  %p4376_p4 = scmp.lt.s32.totalorder %s4370_s12, %s4370_s12 }
 0x3b2   :  { %v1294_v9 = vpop.permute.xlu1 %1293 }
 0x3b3   :  { %v1292_v20 = vpop.permute.xlu0 %1291  ;;  %v1310_v49 = vmul.f32 %v1294_v9, %v5189_v22  ;;  %p4377_p5 = por %p4376_p4, %p4375_p3 }
 0x3b4   :  { %v1309_v52 = vmul.f32 %v1292_v20, %v5187_v3  ;;  %1340 = vxpose.xlu0.b32.cont [14/16] %v1324_v24, 128 }
 0x3b5   :  { %v1326_v1 = vadd.f32 %v1310_v49, %v1262_v53  ;;  %v1170_v49 = vmul.f32 %v5120_v16, %v4930_v63  ;;  %p4378_p6 = pnand %p4377_p5, %p4371_p2 }
 0x3b6   :  { %v1325_v38 = vadd.f32 %v1309_v52, %v1261_v2  ;;  %v1184_v51 = vpop.permute.xlu1 %1183 }
 0x3b7   :  { %v1215_v45 = vmul.f32 %v1184_v51, %v5100_v43 }
 0x3b8   :  { %1341 = vxpose.xlu0.b32.cont [15/16] %v1325_v38, 128 }
 0x3b9   :  { %v1231_v36 = vadd.f32 %v1215_v45, %v1167_v21 }
 0x3ba   :  { %v1186_v58 = vpop.permute.xlu1 %1185 }
 0x3bb   :  { %v1216_v43 = vmul.f32 %v1186_v58, %v5102_v44  ;;  %v1388_v41 = vmul.f32 %v5207_v18, %v1231_v36  ;;  %v1727_v9 = vmul.f32 %v5213_v60, %v1231_v36 }
 0x3bc   :  { %1342 = vxpose.xlu0.b32.end [16/16] %v1326_v1, 128 }
 0x3bd   :  { %v1232_v42 = vadd.f32 %v1216_v43, %v1168_v40  ;;  %v1172_v40 = vmul.f32 %v5134_v37, %v4950_v29 }
 0x3be   :  { %v1188_v24 = vpop.permute.xlu1 %1187 }
 0x3bf   :  { %v1389_v56 = vmul.f32 %v5207_v18, %v1232_v42  ;;  %v1728_v47 = vmul.f32 %v5213_v60, %v1232_v42  ;;  %v1217_v20 = vmul.f32 %v1188_v24, %v5115_v32 }
 0x3c1   :  { %v1233_v44 = vadd.f32 %v1217_v20, %v4943_v10  ;;  %v1404_v2 = vpack.c.bf16 %v1389_v56, %v1388_v41  ;;  %v1743_v52 = vpack.c.bf16 %v1728_v47, %v1727_v9 }
 0x3c2   :  { %v1190_v38 = vpop.permute.xlu1 %1189 }
 0x3c3   :  { %v5224_v51 = vmul.f32 %v5207_v18, %v1233_v44  ;;  %v5227_v45 = vmul.f32 %v5213_v60, %v1233_v44  ;;  %v1218_v53 = vmul.f32 %v1190_v38, %v5122_v11  ;;  %3579 = vmatprep.mubr.bf16.mxu1 %v1404_v2  ;;  %3611 = vmatprep.mubr.bf16.mxu0 %v1743_v52 }
 0x3c5   :  { %v1234_v21 = vadd.f32 %v1218_v53, %v1170_v49 }
 0x3c6   :  { %v1192_v32 = vpop.permute.xlu1 %1191 }
 0x3c7   :  { %v5231_v10 = vmul.f32 %v5207_v18, %v1234_v21  ;;  %v5234_v1 = vmul.f32 %v5213_v60, %v1234_v21  ;;  %v1219_v63 = vmul.f32 %v1192_v32, %v5127_v35 }
 0x3c9   :  { %v1405_v16 = vpack.c.bf16 %v5231_v10, %v5224_v51  ;;  %v1744_v36 = vpack.c.bf16 %v5234_v1, %v5227_v45  ;;  %v1235_v11 = vadd.f32 %v1219_v63, %v4965_v59  ;;  %v5429_v45 = vld [vmem:[#allocation11] sm:$0xff] }
 0x3ca   :  { %v1194_v58 = vpop.permute.xlu1 %1193 }
 0x3cb   :  { %v5245_v43 = vmul.f32 %v5207_v18, %v1235_v11  ;;  %v5248_v42 = vmul.f32 %v5213_v60, %v1235_v11  ;;  %v1220_v35 = vmul.f32 %v1194_v58, %v5129_v12  ;;  %v1174_v12 = vmul.f32 %v5146_v46, %v4974_v17 }
 0x3cd   :  { %v1236_v41 = vadd.f32 %v1220_v35, %v1172_v40 }
 0x3ce   :  { %v1196_v24 = vpop.permute.xlu1 %1195 }
 0x3cf   :  { %v5252_v9 = vmul.f32 %v5207_v18, %v1236_v41  ;;  %v5255_v56 = vmul.f32 %v5213_v60, %v1236_v41  ;;  %v1221_v59 = vmul.f32 %v1196_v24, %v5139_v34 }
 0x3d1   :  { %v1237_v29 = vadd.f32 %v1221_v59, %v4987_v28  ;;  %v1406_v37 = vpack.c.bf16 %v5252_v9, %v5245_v43  ;;  %v1745_v47 = vpack.c.bf16 %v5255_v56, %v5248_v42  ;;  %v5435_v42 = vld [vmem:[#allocation11 + $0x8] sm:$0xff] }
 0x3d2   :  { %v1198_v20 = vpop.permute.xlu1 %1197 }
 0x3d3   :  { %v5266_v44 = vmul.f32 %v5207_v18, %v1237_v29  ;;  %v5269_v2 = vmul.f32 %v5213_v60, %v1237_v29  ;;  %v1222_v34 = vmul.f32 %v1198_v20, %v5141_v30  ;;  %v1176_v30 = vmul.f32 %v5158_v0, %v4996_v33 }
 0x3d5   :  { %v1238_v52 = vadd.f32 %v1222_v34, %v1174_v12 }
 0x3d6   :  { %v1200_v28 = vpop.permute.xlu1 %1199 }
 0x3d7   :  { %v5273_v49 = vmul.f32 %v5207_v18, %v1238_v52  ;;  %v5276_v38 = vmul.f32 %v5213_v60, %v1238_v52  ;;  %v1223_v53 = vmul.f32 %v1200_v28, %v5151_v6 }
 0x3d9   :  { %v1239_v17 = vadd.f32 %v1223_v53, %v5009_v39  ;;  %v1407_v46 = vpack.c.bf16 %v5273_v49, %v5266_v44  ;;  %v1746_v21 = vpack.c.bf16 %v5276_v38, %v5269_v2 }
 0x3da   :  { %v1202_v32 = vpop.permute.xlu1 %1201 }
 0x3db   :  { %v5287_v63 = vmul.f32 %v5207_v18, %v1239_v17  ;;  %v5290_v11 = vmul.f32 %v5213_v60, %v1239_v17  ;;  %v1224_v6 = vmul.f32 %v1202_v32, %v5153_v7  ;;  %v1178_v7 = vmul.f32 %v5170_v57, %v5018_v26 }
 0x3dd   :  { %v1240_v58 = vadd.f32 %v1224_v6, %v1176_v30 }
 0x3de   :  { %v1204_v39 = vpop.permute.xlu1 %1203 }
 0x3df   :  { %v5294_v40 = vmul.f32 %v5207_v18, %v1240_v58  ;;  %v5297_v35 = vmul.f32 %v5213_v60, %v1240_v58  ;;  %v1225_v41 = vmul.f32 %v1204_v39, %v5163_v55 }
 0x3e1   :  { %v1241_v33 = vadd.f32 %v1225_v41, %v5028_v4  ;;  %v1408_v0 = vpack.c.bf16 %v5294_v40, %v5287_v63  ;;  %v1747_v24 = vpack.c.bf16 %v5297_v35, %v5290_v11  ;;  %v5454_v11 = vld [vmem:[#allocation11 + $0x18] sm:$0xff] }
 0x3e2   :  { %v1206_v59 = vpop.permute.xlu1 %1205 }
 0x3e3   :  { %v5308_v29 = vmul.f32 %v5207_v18, %v1241_v33  ;;  %v5311_v20 = vmul.f32 %v5213_v60, %v1241_v33  ;;  %v1226_v55 = vmul.f32 %v1206_v59, %v5165_v61  ;;  %v1180_v61 = vmul.f32 %v5182_v14, %v5037_v8 }
 0x3e5   :  { %v1242_v12 = vadd.f32 %v1226_v55, %v1178_v7 }
 0x3e6   :  { %v1208_v4 = vpop.permute.xlu1 %1207 }
 0x3e7   :  { %v5315_v34 = vmul.f32 %v5207_v18, %v1242_v12  ;;  %v5318_v52 = vmul.f32 %v5213_v60, %v1242_v12  ;;  %v1227_v28 = vmul.f32 %v1208_v4, %v5175_v54 }
 0x3e9   :  { %v1243_v26 = vadd.f32 %v1227_v28, %v5047_v31  ;;  %v1409_v57 = vpack.c.bf16 %v5315_v34, %v5308_v29  ;;  %v1748_v53 = vpack.c.bf16 %v5318_v52, %v5311_v20  ;;  %v5464_v34 = vld [vmem:[#allocation11 + $0x30] sm:$0xff] }
 0x3ea   :  { %v1210_v17 = vpop.permute.xlu1 %1209 }
 0x3eb   :  { %v5329_v32 = vmul.f32 %v5207_v18, %v1243_v26  ;;  %v5332_v30 = vmul.f32 %v5213_v60, %v1243_v26  ;;  %v1228_v54 = vmul.f32 %v1210_v17, %v5177_v5  ;;  %v1182_v5 = vmul.f32 %v5194_v25, %v5056_v19 }
 0x3ed   :  { %v1244_v6 = vadd.f32 %v1228_v54, %v1180_v61 }
 0x3ee   :  { %v1212_v31 = vpop.permute.xlu1 %1211 }
 0x3ef   :  { %v5336_v58 = vmul.f32 %v5207_v18, %v1244_v6  ;;  %v5339_v39 = vmul.f32 %v5213_v60, %v1244_v6  ;;  %v1229_v41 = vmul.f32 %v1212_v31, %v5187_v3 }
 0x3f1   :  { %v1245_v8 = vadd.f32 %v1229_v41, %v5066_v62  ;;  %v1410_v14 = vpack.c.bf16 %v5336_v58, %v5329_v32  ;;  %v1749_v33 = vpack.c.bf16 %v5339_v39, %v5332_v30  ;;  %v5472_v30 = vld [vmem:[#allocation11 + $0x50] sm:$0xff] }
 0x3f2   :  { %v1214_v59 = vpop.permute.xlu1 %1213 }
 0x3f3   :  { %v5350_v7 = vmul.f32 %v5207_v18, %v1245_v8  ;;  %v5353_v55 = vmul.f32 %v5213_v60, %v1245_v8  ;;  %v1230_v3 = vmul.f32 %v1214_v59, %v5189_v22 }
 0x3f5   :  { %v1246_v12 = vadd.f32 %v1230_v3, %v1182_v5 }
 0x3f7   :  { %v5357_v62 = vmul.f32 %v5207_v18, %v1246_v12  ;;  %v5360_v4 = vmul.f32 %v5213_v60, %v1246_v12 }
 0x3f9   :  { %v1411_v28 = vpack.c.bf16 %v5357_v62, %v5350_v7  ;;  %v1750_v19 = vpack.c.bf16 %v5360_v4, %v5353_v55 }
 0x400   :  { %v1343_v25 = vpop.trf.xlu0 }
 0x404   :  { %v1344_v26 = vpop.trf.xlu0 }
 0x405   :  { %v1359_v17 = vpack.c.bf16 %v1344_v26, %v1343_v25 }
 0x407   :  { %3563 = vmatprep.subr.bf16.mxu1 %v1359_v17  ;;  %3595 = vmatprep.subr.bf16.mxu0 %v1359_v17 }
 0x408   :  { %3564 = vmatpush3.bf16.msra.mxu1 %v1359_v17  ;;  %3596 = vmatpush3.bf16.msra.mxu0 %v1359_v17  ;;  %v1345_v22 = vpop.trf.xlu0 }
 0x40c   :  { %v1346_v61 = vpop.trf.xlu0 }
 0x40d   :  { %v1360_v18 = vpack.c.bf16 %v1346_v61, %v1345_v22 }
 0x40f   :  { %3565 = vmatprep.subr.bf16.mxu1 %v1360_v18  ;;  %3597 = vmatprep.subr.bf16.mxu0 %v1360_v18 }
 0x410   :  { %3566 = vmatpush3.bf16.msra.mxu1 %v1360_v18  ;;  %3598 = vmatpush3.bf16.msra.mxu0 %v1360_v18  ;;  %v1347_v60 = vpop.trf.xlu0 }
 0x414   :  { %v1348_v54 = vpop.trf.xlu0 }
 0x415   :  { %v1361_v6 = vpack.c.bf16 %v1348_v54, %v1347_v60 }
 0x417   :  { %3567 = vmatprep.subr.bf16.mxu1 %v1361_v6  ;;  %3599 = vmatprep.subr.bf16.mxu0 %v1361_v6 }
 0x418   :  { %3568 = vmatpush3.bf16.msra.mxu1 %v1361_v6  ;;  %3600 = vmatpush3.bf16.msra.mxu0 %v1361_v6  ;;  %v1349_v31 = vpop.trf.xlu0 }
 0x41c   :  { %v1350_v41 = vpop.trf.xlu0 }
 0x41d   :  { %v1362_v8 = vpack.c.bf16 %v1350_v41, %v1349_v31  ;;  %v5487_v31 = vld [vmem:[#allocation11 + $0x38] sm:$0xff] }
 0x41f   :  { %3569 = vmatprep.subr.bf16.mxu1 %v1362_v8  ;;  %3601 = vmatprep.subr.bf16.mxu0 %v1362_v8 }
 0x420   :  { %3570 = vmatpush3.bf16.msra.mxu1 %v1362_v8  ;;  %3602 = vmatpush3.bf16.msra.mxu0 %v1362_v8  ;;  %v1351_v59 = vpop.trf.xlu0 }
 0x424   :  { %v1352_v5 = vpop.trf.xlu0 }
 0x425   :  { %v1363_v3 = vpack.c.bf16 %v1352_v5, %v1351_v59 }
 0x427   :  { %3571 = vmatprep.subr.bf16.mxu1 %v1363_v3  ;;  %3603 = vmatprep.subr.bf16.mxu0 %v1363_v3 }
 0x428   :  { %3572 = vmatpush3.bf16.msra.mxu1 %v1363_v3  ;;  %3604 = vmatpush3.bf16.msra.mxu0 %v1363_v3  ;;  %v1353_v12 = vpop.trf.xlu0 }
 0x42c   :  { %v1354_v25 = vpop.trf.xlu0 }
 0x42d   :  { %v1364_v26 = vpack.c.bf16 %v1354_v25, %v1353_v12  ;;  %v5495_v25 = vld [vmem:[#allocation11 + $0x28] sm:$0xff] }
 0x42f   :  { %3573 = vmatprep.subr.bf16.mxu1 %v1364_v26  ;;  %3605 = vmatprep.subr.bf16.mxu0 %v1364_v26 }
 0x430   :  { %3574 = vmatpush3.bf16.msra.mxu1 %v1364_v26  ;;  %3606 = vmatpush3.bf16.msra.mxu0 %v1364_v26  ;;  %v1355_v17 = vpop.trf.xlu0  ;;  %v5497_v26 = vld [vmem:[#allocation11 + $0x60] sm:$0xff] }
 0x434   :  { %v1356_v22 = vpop.trf.xlu0 }
 0x435   :  { %v1365_v61 = vpack.c.bf16 %v1356_v22, %v1355_v17 }
 0x437   :  { %3575 = vmatprep.subr.bf16.mxu1 %v1365_v61  ;;  %3607 = vmatprep.subr.bf16.mxu0 %v1365_v61 }
 0x438   :  { %3576 = vmatpush3.bf16.msra.mxu1 %v1365_v61  ;;  %3608 = vmatpush3.bf16.msra.mxu0 %v1365_v61  ;;  %v1357_v18 = vpop.trf.xlu0 }
 0x43c   :  { %v1358_v60 = vpop.trf.xlu0 }
 0x43d   :  { %v1366_v54 = vpack.c.bf16 %v1358_v60, %v1357_v18 }
 0x43f   :  { %3577 = vmatprep.subr.bf16.mxu1 %v1366_v54  ;;  %3609 = vmatprep.subr.bf16.mxu0 %v1366_v54 }
 0x440   :  { %3578 = vmatpush3.bf16.msra.mxu1 %v1366_v54  ;;  %3610 = vmatpush3.bf16.msra.mxu0 %v1366_v54 }
 0x441   :  { %3627 = vmatprep.subr.bf16.mxu1 %v4749_v27 }
 0x443   :  { %3580 = vmatmul.mubr.bf16.vlgmr.msra.gmra.mrb[32].mxu1 %v1405_v16  ;;  %3612 = vmatmul.mubr.bf16.vlgmr.msra.gmra.mrb[48].mxu0 %v1744_v36 }
 0x444   :  { %3583 = vmatprep.mubr.bf16.mxu1 %v1406_v37  ;;  %3615 = vmatprep.mubr.bf16.mxu0 %v1745_v47  ;;  %v5440_v47 = vld [vmem:[#allocation11 + $0x10] sm:$0xff] }
 0x445   :  { %3628 = vmatpush3.bf16.msra.mxu1 %v4749_v27  ;;  %v5931_v27 = vld [vmem:[#allocation31_spill] sm:$0xff] }
 0x446   :  { %3629 = vmatprep.subr.bf16.mxu1 %v4745_v23 }
 0x449   :  { %3630 = vmatpush3.bf16.msra.mxu1 %v4745_v23  ;;  %v5930_v23 = vld [vmem:[#allocation33_spill] sm:$0xff] }
 0x44a   :  { %3631 = vmatprep.subr.bf16.mxu1 %v4781_v50 }
 0x44b   :  { %3584 = vmatmul.mubr.bf16.gmra.mrb[36].mxu1 %v1407_v46  ;;  %3616 = vmatmul.mubr.bf16.gmra.mrb[52].mxu0 %v1746_v21 }
 0x44c   :  { %3587 = vmatprep.mubr.bf16.mxu1 %v1408_v0  ;;  %3619 = vmatprep.mubr.bf16.mxu0 %v1747_v24 }
 0x44d   :  { %3632 = vmatpush3.bf16.msra.mxu1 %v4781_v50 }
 0x44e   :  { %3633 = vmatprep.subr.bf16.mxu1 %v4777_v48 }
 0x451   :  { %3634 = vmatpush3.bf16.msra.mxu1 %v4777_v48  ;;  %v5932_v48 = vld [vmem:[#allocation25_spill] sm:$0xff] }
 0x452   :  { %3635 = vmatprep.subr.bf16.mxu1 %v4813_v15 }
 0x453   :  { %3588 = vmatmul.mubr.bf16.gmra.mrb[40].mxu1 %v1409_v57  ;;  %3620 = vmatmul.mubr.bf16.gmra.mrb[56].mxu0 %v1748_v53 }
 0x454   :  { %3591 = vmatprep.mubr.bf16.mxu1 %v1410_v14  ;;  %3623 = vmatprep.mubr.bf16.mxu0 %v1749_v33  ;;  %v1371_v33 = vld [vmem:[#allocation11 + $0x20] sm:$0xff] }
 0x455   :  { %3636 = vmatpush3.bf16.msra.mxu1 %v4813_v15 }
 0x456   :  { %3637 = vmatprep.subr.bf16.mxu1 %v4809_v13 }
 0x459   :  { %3638 = vmatpush3.bf16.msra.mxu1 %v4809_v13 }
 0x45a   :  { %3639 = vmatprep.subr.bf16.mxu1 %v5930_v23 }
 0x45b   :  { %3592 = vmatmul.mubr.bf16.gmra.mrb[44].mxu1 %v1411_v28  ;;  %3624 = vmatmul.mubr.bf16.gmra.mrb[60].mxu0 %v1750_v19 }
 0x45d   :  { %3640 = vmatpush3.bf16.msra.mxu1 %v5930_v23 }
 0x45e   :  { %3641 = vmatprep.subr.bf16.mxu1 %v5931_v27 }
 0x461   :  { %3642 = vmatpush3.bf16.msra.mxu1 %v5931_v27 }
 0x462   :  { %3659 = vmatprep.subr.bf16.mxu1 %v5932_v48 }
 0x516   :  { %v5425_v50 = vpop.f32.mrb[32].mxu1  ;;  %v3613_v13 = vpop.f32.mrb[48].mxu0 }
 0x517   :  { %v5427_v15 = vpop.f32.mrb[33].mxu1  ;;  %v1785_v51 = vpop.f32.mrb[49].mxu0  ;;  %v1850_v9 = vmul.f32 0.125, %v3613_v13 }
 0x518   :  { %v1848_v10 = vmul.f32 0.125, %v1785_v51  ;;  %v5431_v1 = vpop.f32.mrb[34].mxu1  ;;  %v3614_v16 = vpop.f32.mrb[50].mxu0  ;;  %v1375_v51 = vld [vmem:[#allocation11 + $0x40] sm:$0xff] }
 0x519   :  { %v5433_v36 = vpop.f32.mrb[35].mxu1  ;;  %v1788_v43 = vpop.f32.mrb[51].mxu0  ;;  %v1851_v2 = vmul.f32 0.125, %v3614_v16  ;;  %v5450_v46 = vadd.f32 %v1850_v9, %v5440_v47  ;;  %v1509_v16 = vmul.f32 0.125, %v5427_v15 }
 0x51a   :  { %v1849_v56 = vmul.f32 0.125, %v1788_v43  ;;  %v5438_v37 = vadd.f32 %v1848_v10, %v5429_v45  ;;  %v1381_v10 = vld [vmem:[#allocation11 + $0x70] sm:$0xff] }
 0x51b   :  { %v5462_v20 = vadd.f32 %v1851_v2, %v5454_v11  ;;  %v1376_v2 = vld [vmem:[#allocation11 + $0x48] sm:$0xff] }
 0x51c   :  { %1880 = vmax.xlane.f32.xlu1 %v5438_v37  ;;  %v5444_v44 = vadd.f32 %v1849_v56, %v5435_v42 }
 0x51e   :  { %1882 = vmax.xlane.f32.xlu0 %v5444_v44  ;;  %v5447_v49 = vpop.f32.mrb[36].mxu1  ;;  %v3617_v38 = vpop.f32.mrb[52].mxu0 }
 0x51f   :  { %v5452_v21 = vpop.f32.mrb[37].mxu1  ;;  %v1801_v63 = vpop.f32.mrb[53].mxu0  ;;  %v1854_v29 = vmul.f32 0.125, %v3617_v38  ;;  %v1511_v38 = vmul.f32 0.125, %v5425_v50  ;;  %v1380_v50 = vld [vmem:[#allocation11 + $0x68] sm:$0xff] }
 0x520   :  { %1884 = vmax.xlane.f32.xlu1 %v5450_v46  ;;  %v5457_v40 = vpop.f32.mrb[38].mxu1  ;;  %v3618_v35 = vpop.f32.mrb[54].mxu0  ;;  %v1852_v52 = vmul.f32 0.125, %v1801_v63  ;;  %v1513_v15 = vmul.f32 0.125, %v5452_v21 }
 0x521   :  { %v5459_v0 = vpop.f32.mrb[39].mxu1  ;;  %v1804_v24 = vpop.f32.mrb[55].mxu0  ;;  %v5470_v32 = vadd.f32 %v1854_v29, %v5464_v34  ;;  %v1855_v19 = vmul.f32 0.125, %v3618_v35  ;;  %v1378_v29 = vld [vmem:[#allocation11 + $0x58] sm:$0xff] }
 0x522   :  { %v5484_v6 = vadd.f32 %v1852_v52, %v1371_v33  ;;  %v1853_v41 = vmul.f32 0.125, %v1804_v24  ;;  %v5523_v24 = vadd.f32 %v1509_v16, %v5429_v45  ;;  %v1515_v45 = vmul.f32 0.125, %v5447_v49 }
 0x523   :  { %v5493_v5 = vadd.f32 %v1855_v19, %v5487_v31  ;;  %v1382_v19 = vld [vmem:[#allocation11 + $0x78] sm:$0xff]  ;;  %v1512_v49 = vmul.f32 0.125, %v5431_v1  ;;  %v1516_v1 = vmul.f32 0.125, %v5457_v40 }
 0x524   :  { %1886 = vmax.xlane.f32.xlu1 %v5462_v20  ;;  %v5505_v27 = vadd.f32 %v1853_v41, %v5495_v25 }
 0x526   :  { %v5467_v57 = vpop.f32.mrb[40].mxu1  ;;  %v3621_v53 = vpop.f32.mrb[56].mxu0 }
 0x527   :  { %v1858_v58 = vmul.f32 0.125, %v3621_v53  ;;  %v5474_v39 = vpop.f32.mrb[41].mxu1  ;;  %v1817_v14 = vpop.f32.mrb[57].mxu0 }
 0x528   :  { %1892 = vmax.xlane.f32.xlu1 %v5470_v32  ;;  %v5477_v7 = vpop.f32.mrb[42].mxu1  ;;  %v3622_v55 = vpop.f32.mrb[58].mxu0  ;;  %v1856_v54 = vmul.f32 0.125, %v1817_v14  ;;  %v1517_v21 = vmul.f32 0.125, %v5474_v39  ;;  %v5562_v39 = vadd.f32 %v1512_v49, %v5454_v11 }
 0x529   :  { %v5479_v62 = vpop.f32.mrb[43].mxu1  ;;  %v1820_v4 = vpop.f32.mrb[59].mxu0  ;;  %v5482_v28 = vadd.f32 %v1858_v58, %v5472_v30  ;;  %v1859_v63 = vmul.f32 0.125, %v3622_v55  ;;  %v5531_v58 = vadd.f32 %v1511_v38, %v5440_v47  ;;  %v1510_v47 = vmul.f32 0.125, %v5433_v36 }
 0x52a   :  { %v1857_v43 = vmul.f32 0.125, %v1820_v4  ;;  %v5513_v9 = vadd.f32 %v1856_v54, %v1375_v51  ;;  %v5538_v4 = vadd.f32 %v1513_v15, %v1371_v33  ;;  %v1519_v33 = vmul.f32 0.125, %v5467_v57 }
 0x52b   :  { %1900 = vmax.xlane.f32.xlu0 %v5482_v28  ;;  %v5528_v53 = vadd.f32 %v1859_v63, %v1378_v29  ;;  %v1514_v36 = vmul.f32 0.125, %v5459_v0  ;;  %v1518_v11 = vmul.f32 0.125, %v5479_v62  ;;  %v1520_v40 = vmul.f32 0.125, %v5477_v7 }
 0x52c   :  { %1888 = vmax.xlane.f32.xlu1 %v5484_v6  ;;  %v5520_v35 = vadd.f32 %v1857_v43, %v1376_v2 }
 0x52d   :  { %v5572_v57 = vadd.f32 %v1514_v36, %v5495_v25  ;;  %v5591_v25 = vadd.f32 %v1520_v40, %v1378_v29 }
 0x52e   :  { %v5490_v8 = vpop.f32.mrb[44].mxu1  ;;  %v3625_v59 = vpop.f32.mrb[60].mxu0 }
 0x52f   :  { %v1494_v3 = vpop.f32.mrb[45].mxu1  ;;  %v1833_v12 = vpop.f32.mrb[61].mxu0  ;;  %v1862_v23 = vmul.f32 0.125, %v3625_v59  ;;  %v5547_v59 = vadd.f32 %v1515_v45, %v5464_v34 }
 0x530   :  { %v1860_v17 = vmul.f32 0.125, %v1833_v12  ;;  %1894 = vmax.xlane.f32.xlu1 %v5493_v5  ;;  %v5500_v22 = vpop.f32.mrb[46].mxu1  ;;  %v3626_v61 = vpop.f32.mrb[62].mxu0  ;;  %v5554_v12 = vadd.f32 %v1510_v47, %v5435_v42  ;;  %v1521_v34 = vmul.f32 0.125, %v1494_v3  ;;  %v1523_v42 = vmul.f32 0.125, %v5490_v8 }
 0x531   :  { %v5502_v18 = vpop.f32.mrb[47].mxu1  ;;  %v1836_v60 = vpop.f32.mrb[63].mxu0  ;;  %v5515_v56 = vadd.f32 %v1862_v23, %v1381_v10  ;;  %v1863_v14 = vmul.f32 0.125, %v3626_v61  ;;  %v5565_v61 = vadd.f32 %v1519_v33, %v5472_v30  ;;  %v5581_v30 = vadd.f32 %v1516_v1, %v5487_v31 }
 0x532   :  { %v5508_v13 = vadd.f32 %v1860_v17, %v5497_v26  ;;  %v1861_v52 = vmul.f32 0.125, %v1836_v60  ;;  %v5556_v17 = vadd.f32 %v1517_v21, %v1375_v51  ;;  %v5575_v0 = vadd.f32 %v1521_v34, %v5497_v26 }
 0x533   :  { %v5544_v41 = vadd.f32 %v1863_v14, %v1382_v19  ;;  %v5583_v3 = vadd.f32 %v1523_v42, %v1381_v10  ;;  %v5588_v8 = vadd.f32 %v1518_v11, %v1376_v2  ;;  %v1524_v26 = vmul.f32 0.125, %v5500_v22 }
 0x534   :  { %1890 = vmax.xlane.f32.xlu1 %v5505_v27  ;;  %1904 = vmax.xlane.f32.xlu0 %v5508_v13  ;;  %v5536_v55 = vadd.f32 %v1861_v52, %v1380_v50  ;;  %v1522_v31 = vmul.f32 0.125, %v5502_v18 }
 0x535   :  { %v5595_v62 = vadd.f32 %v1524_v26, %v1382_v19 }
 0x536   :  { %v5599_v60 = vadd.f32 %v1522_v31, %v1380_v50 }
 0x538   :  { %1896 = vmax.xlane.f32.xlu1 %v5513_v9  ;;  %1908 = vmax.xlane.f32.xlu0 %v5515_v56 }
 0x53c   :  { %1898 = vmax.xlane.f32.xlu1 %v5520_v35  ;;  %1541 = vmax.xlane.f32.xlu0 %v5523_v24 }
 0x540   :  { %1902 = vmax.xlane.f32.xlu1 %v5528_v53  ;;  %1545 = vmax.xlane.f32.xlu0 %v5531_v58 }
 0x544   :  { %1906 = vmax.xlane.f32.xlu1 %v5536_v55  ;;  %1549 = vmax.xlane.f32.xlu0 %v5538_v4 }
 0x548   :  { %1910 = vmax.xlane.f32.xlu1 %v5544_v41  ;;  %1553 = vmax.xlane.f32.xlu0 %v5547_v59 }
 0x54c   :  { %1543 = vmax.xlane.f32.xlu1 %v5554_v12  ;;  %1557 = vmax.xlane.f32.xlu0 %v5556_v17 }
 0x550   :  { %1547 = vmax.xlane.f32.xlu1 %v5562_v39  ;;  %1561 = vmax.xlane.f32.xlu0 %v5565_v61 }
 0x554   :  { %1551 = vmax.xlane.f32.xlu1 %v5572_v57  ;;  %1565 = vmax.xlane.f32.xlu0 %v5575_v0 }
 0x558   :  { %1555 = vmax.xlane.f32.xlu1 %v5581_v30  ;;  %1569 = vmax.xlane.f32.xlu0 %v5583_v3 }
 0x55c   :  { %1559 = vmax.xlane.f32.xlu1 %v5588_v8 }
 0x560   :  { %1563 = vmax.xlane.f32.xlu1 %v5591_v25 }
 0x564   :  { %1571 = vmax.xlane.f32.xlu1 %v5595_v62 }
 0x568   :  { %1567 = vmax.xlane.f32.xlu1 %v5599_v60 }
 0x5a9   :  { %v1881_v7 = vpop.xlane.xlu1 %1880 }
 0x5aa   :  { %v1912_v54 = vsub.f32 %v5438_v37, %v1881_v7 }
 0x5ab   :  { %v1883_v23 = vpop.xlane.xlu0 %1882 }
 0x5ac   :  { %v1928_v51 = vmul.f32 1.442695, %v1912_v54  ;;  %v1913_v10 = vsub.f32 %v5444_v44, %v1883_v23 }
 0x5ad   :  { %v1885_v22 = vpop.xlane.xlu1 %1884 }
 0x5ae   :  { %3996 = vpow2.f32 %v1928_v51  ;;  %v1930_v16 = vmul.f32 1.442695, %v1913_v10  ;;  %v1914_v43 = vsub.f32 %v5450_v46, %v1885_v22 }
 0x5b0   :  { %3998 = vpow2.f32 %v1930_v16  ;;  %v1932_v18 = vmul.f32 1.442695, %v1914_v43 }
 0x5b1   :  { %v1887_v2 = vpop.xlane.xlu1 %1886 }
 0x5b2   :  { %4000 = vpow2.f32 %v1932_v18  ;;  %v1915_v38 = vsub.f32 %v5462_v20, %v1887_v2 }
 0x5b4   :  { %v1934_v63 = vmul.f32 1.442695, %v1915_v38 }
 0x5b5   :  { %v1893_v29 = vpop.xlane.xlu1 %1892 }
 0x5b6   :  { %4002 = vpow2.f32 %v1934_v63  ;;  %v1918_v52 = vsub.f32 %v5470_v32, %v1893_v29 }
 0x5b8   :  { %v5606_v15 = vpop.eup %3996  ;;  %v1901_v20 = vpop.xlane.xlu0 %1900  ;;  %v1940_v19 = vmul.f32 1.442695, %v1918_v52 }
 0x5b9   :  { %v1889_v37 = vpop.xlane.xlu1 %1888  ;;  %1960 = vadd.xlane.f32.xlu0 %v5606_v15  ;;  %v1922_v36 = vsub.f32 %v5482_v28, %v1901_v20 }
 0x5ba   :  { %v5609_v44 = vpop.eup %3998  ;;  %v1916_v46 = vsub.f32 %v5484_v6, %v1889_v37 }
 0x5bb   :  { %1962 = vadd.xlane.f32.xlu1 %v5609_v44 }
 0x5bc   :  { %v5614_v50 = vpop.eup %4000  ;;  %v1936_v45 = vmul.f32 1.442695, %v1916_v46 }
 0x5bd   :  { %v1895_v14 = vpop.xlane.xlu1 %1894  ;;  %1964 = vadd.xlane.f32.xlu0 %v5614_v50 }
 0x5be   :  { %4004 = vpow2.f32 %v1936_v45  ;;  %v1919_v21 = vsub.f32 %v5493_v5, %v1895_v14  ;;  %v1948_v5 = vmul.f32 1.442695, %v1922_v36 }
 0x5bf   :  { %4006 = vpow2.f32 %v1940_v19 }
 0x5c0   :  { %v5617_v47 = vpop.eup %4002  ;;  %v1942_v34 = vmul.f32 1.442695, %v1919_v21 }
 0x5c1   :  { %v1891_v49 = vpop.xlane.xlu1 %1890  ;;  %v1905_v33 = vpop.xlane.xlu0 %1904  ;;  %1966 = vadd.xlane.f32.xlu1 %v5617_v47 }
 0x5c2   :  { %v1917_v32 = vsub.f32 %v5505_v27, %v1891_v49  ;;  %v1924_v31 = vsub.f32 %v5508_v13, %v1905_v33 }
 0x5c4   :  { %v1938_v6 = vmul.f32 1.442695, %v1917_v32  ;;  %v1952_v51 = vmul.f32 1.442695, %v1924_v31 }
 0x5c5   :  { %v1897_v1 = vpop.xlane.xlu1 %1896  ;;  %v1909_v42 = vpop.xlane.xlu0 %1908 }
 0x5c6   :  { %4008 = vpow2.f32 %v1938_v6  ;;  %v1920_v11 = vsub.f32 %v5513_v9, %v1897_v1  ;;  %v1926_v9 = vsub.f32 %v5515_v56, %v1909_v42 }
 0x5c7   :  { %4010 = vpow2.f32 %v1942_v34 }
 0x5c8   :  { %v5624_v40 = vpop.eup %4004  ;;  %v1944_v26 = vmul.f32 1.442695, %v1920_v11  ;;  %v1956_v18 = vmul.f32 1.442695, %v1926_v9 }
 0x5c9   :  { %v1899_v7 = vpop.xlane.xlu1 %1898  ;;  %v1542_v54 = vpop.xlane.xlu0 %1541  ;;  %1968 = vadd.xlane.f32.xlu0 %v5624_v40 }
 0x5ca   :  { %4012 = vpow2.f32 %v1944_v26  ;;  %v1921_v28 = vsub.f32 %v5520_v35, %v1899_v7  ;;  %v5629_v27 = vpop.eup %4006  ;;  %v1573_v35 = vsub.f32 %v5523_v24, %v1542_v54 }
 0x5cb   :  { %4014 = vpow2.f32 %v1948_v5 }
 0x5cc   :  { %v1946_v23 = vmul.f32 1.442695, %v1921_v28 }
 0x5cd   :  { %v1903_v10 = vpop.xlane.xlu1 %1902  ;;  %v1546_v22 = vpop.xlane.xlu0 %1545  ;;  %1972 = vadd.xlane.f32.xlu0 %v5629_v27 }
 0x5ce   :  { %4016 = vpow2.f32 %v1946_v23  ;;  %v1923_v13 = vsub.f32 %v5528_v53, %v1903_v10  ;;  %v1589_v53 = vmul.f32 1.442695, %v1573_v35  ;;  %v1575_v52 = vsub.f32 %v5531_v58, %v1546_v22 }
 0x5cf   :  { %4018 = vpow2.f32 %v1952_v51 }
 0x5d0   :  { %v5634_v16 = vpop.eup %4008  ;;  %v1950_v43 = vmul.f32 1.442695, %v1923_v13  ;;  %v1593_v19 = vmul.f32 1.442695, %v1575_v52 }
 0x5d1   :  { %v1907_v2 = vpop.xlane.xlu1 %1906  ;;  %v1550_v38 = vpop.xlane.xlu0 %1549  ;;  %1970 = vadd.xlane.f32.xlu1 %v5634_v16 }
 0x5d2   :  { %4020 = vpow2.f32 %v1950_v43  ;;  %v1925_v56 = vsub.f32 %v5536_v55, %v1907_v2  ;;  %v5639_v63 = vpop.eup %4010  ;;  %v1577_v21 = vsub.f32 %v5538_v4, %v1550_v38 }
 0x5d3   :  { %4022 = vpow2.f32 %v1956_v18 }
 0x5d4   :  { %v5641_v29 = vpop.eup %4012  ;;  %v1954_v37 = vmul.f32 1.442695, %v1925_v56  ;;  %v1597_v36 = vmul.f32 1.442695, %v1577_v21 }
 0x5d5   :  { %v1911_v46 = vpop.xlane.xlu1 %1910  ;;  %v1554_v45 = vpop.xlane.xlu0 %1553  ;;  %1976 = vadd.xlane.f32.xlu0 %v5641_v29  ;;  %1974 = vadd.xlane.f32.xlu1 %v5639_v63 }
 0x5d6   :  { %4024 = vpow2.f32 %v1954_v37  ;;  %v1927_v24 = vsub.f32 %v5544_v41, %v1911_v46  ;;  %v5647_v20 = vpop.eup %4014  ;;  %v1579_v34 = vsub.f32 %v5547_v59, %v1554_v45 }
 0x5d7   :  { %4026 = vpow2.f32 %v1589_v53 }
 0x5d8   :  { %v5649_v55 = vpop.eup %4016  ;;  %v1958_v14 = vmul.f32 1.442695, %v1927_v24  ;;  %v1601_v5 = vmul.f32 1.442695, %v1579_v34 }
 0x5d9   :  { %v1544_v49 = vpop.xlane.xlu1 %1543  ;;  %v1558_v58 = vpop.xlane.xlu0 %1557  ;;  %1980 = vadd.xlane.f32.xlu0 %v5647_v20  ;;  %1978 = vadd.xlane.f32.xlu1 %v5649_v55 }
 0x5da   :  { %4028 = vpow2.f32 %v1958_v14  ;;  %v1574_v33 = vsub.f32 %v5554_v12, %v1544_v49  ;;  %v5655_v32 = vpop.eup %4018  ;;  %v1581_v31 = vsub.f32 %v5556_v17, %v1558_v58 }
 0x5db   :  { %4030 = vpow2.f32 %v1593_v19 }
 0x5dc   :  { %v5657_v41 = vpop.eup %4020  ;;  %v1591_v6 = vmul.f32 1.442695, %v1574_v33  ;;  %v1605_v23 = vmul.f32 1.442695, %v1581_v31  ;;  %v3855_v31 = vld [vmem:[#allocation13 + $0x18] sm:$0xff]  }
 0x5dd   :  { %v1548_v1 = vpop.xlane.xlu1 %1547  ;;  %1984 = vadd.xlane.f32.xlu0 %v5655_v32  ;;  %1982 = vadd.xlane.f32.xlu1 %v5657_v41  ;;  %v5663_v42 = vpop.eup %4022 }
 0x5de   :  { %4032 = vpow2.f32 %v1591_v6  ;;  %v1576_v4 = vsub.f32 %v5562_v39, %v1548_v1  ;;  %v1562_v12 = vpop.xlane.xlu0 %1561 }
 0x5df   :  { %4034 = vpow2.f32 %v1597_v36  ;;  %v1583_v51 = vsub.f32 %v5565_v61, %v1562_v12  ;;  %v3852_v12 = vld [vmem:[#allocation13] sm:$0xff]  }
 0x5e0   :  { %v5665_v11 = vpop.eup %4024  ;;  %v1595_v26 = vmul.f32 1.442695, %v1576_v4  ;;  %3691 = vmatprep.subr.bf16.mxu0 %v3852_v12 }
 0x5e1   :  { %v1552_v7 = vpop.xlane.xlu1 %1551  ;;  %1988 = vadd.xlane.f32.xlu0 %v5663_v42  ;;  %1986 = vadd.xlane.f32.xlu1 %v5665_v11  ;;  %v5671_v54 = vpop.eup %4026  ;;  %v1609_v43 = vmul.f32 1.442695, %v1583_v51 }
 0x5e2   :  { %4036 = vpow2.f32 %v1595_v26  ;;  %v1578_v59 = vsub.f32 %v5572_v57, %v1552_v7  ;;  %v1566_v9 = vpop.xlane.xlu0 %1565  ;;  %v3853_v26 = vld [vmem:[#allocation13 + $0x8] sm:$0xff]   ;;  %3692 = vmatpush3.bf16.msra.mxu0 %v3852_v12  ;;  %v3856_v7 = vld [vmem:[#allocation13 + $0x20] sm:$0xff]  }
 0x5e3   :  { %4038 = vpow2.f32 %v1601_v5  ;;  %v1585_v18 = vsub.f32 %v5575_v0, %v1566_v9  ;;  %3693 = vmatprep.subr.bf16.mxu0 %v3853_v26  ;;  %v3854_v5 = vld [vmem:[#allocation13 + $0x10] sm:$0xff]  }
 0x5e4   :  { %v5673_v39 = vpop.eup %4028  ;;  %v1599_v28 = vmul.f32 1.442695, %v1578_v59  ;;  %v3857_v59 = vld [vmem:[#allocation13 + $0x28] sm:$0xff]  }
 0x5e5   :  { %v1556_v10 = vpop.xlane.xlu1 %1555  ;;  %1621 = vadd.xlane.f32.xlu0 %v5671_v54  ;;  %1990 = vadd.xlane.f32.xlu1 %v5673_v39  ;;  %v5679_v22 = vpop.eup %4030  ;;  %v1613_v37 = vmul.f32 1.442695, %v1585_v18 }
 0x5e6   :  { %4040 = vpow2.f32 %v1599_v28  ;;  %v1580_v17 = vsub.f32 %v5581_v30, %v1556_v10  ;;  %v1570_v30 = vpop.xlane.xlu0 %1569  ;;  %3694 = vmatpush3.bf16.msra.mxu0 %v3853_v26  ;;  %v3858_v28 = vld [vmem:[#allocation13 + $0x30] sm:$0xff]  }
 0x5e7   :  { %4042 = vpow2.f32 %v1605_v23  ;;  %v1587_v0 = vsub.f32 %v5583_v3, %v1570_v30  ;;  %3695 = vmatprep.subr.bf16.mxu0 %v3854_v5 }
 0x5e8   :  { %v5681_v57 = vpop.eup %4032  ;;  %v1603_v13 = vmul.f32 1.442695, %v1580_v17 }
 0x5e9   :  { %v1560_v35 = vpop.xlane.xlu1 %1559  ;;  %1625 = vadd.xlane.f32.xlu0 %v5679_v22  ;;  %1623 = vadd.xlane.f32.xlu1 %v5681_v57  ;;  %v5687_v2 = vpop.eup %4034  ;;  %v1617_v14 = vmul.f32 1.442695, %v1587_v0 }
 0x5ea   :  { %4044 = vpow2.f32 %v1603_v13  ;;  %v1582_v61 = vsub.f32 %v5588_v8, %v1560_v35  ;;  %3696 = vmatpush3.bf16.msra.mxu0 %v3854_v5  ;;  %v5936_v5 = vld [vmem:[#allocation29_spill] sm:$0xff] }
 0x5eb   :  { %4046 = vpow2.f32 %v1609_v43  ;;  %3697 = vmatprep.subr.bf16.mxu0 %v3855_v31 }
 0x5ec   :  { %v5689_v38 = vpop.eup %4036  ;;  %v1607_v56 = vmul.f32 1.442695, %v1582_v61 }
 0x5ed   :  { %v1564_v53 = vpop.xlane.xlu1 %1563  ;;  %1629 = vadd.xlane.f32.xlu0 %v5687_v2  ;;  %1627 = vadd.xlane.f32.xlu1 %v5689_v38  ;;  %v5695_v46 = vpop.eup %4038 }
 0x5ee   :  { %4048 = vpow2.f32 %v1607_v56  ;;  %v1584_v52 = vsub.f32 %v5591_v25, %v1564_v53  ;;  %3698 = vmatpush3.bf16.msra.mxu0 %v3855_v31 }
 0x5ef   :  { %4050 = vpow2.f32 %v1613_v37  ;;  %3699 = vmatprep.subr.bf16.mxu0 %v3856_v7 }
 0x5f0   :  { %v5697_v8 = vpop.eup %4040  ;;  %v1611_v45 = vmul.f32 1.442695, %v1584_v52 }
 0x5f1   :  { %1633 = vadd.xlane.f32.xlu0 %v5695_v46  ;;  %v1572_v24 = vpop.xlane.xlu1 %1571  ;;  %1631 = vadd.xlane.f32.xlu1 %v5697_v8  ;;  %v5701_v19 = vpop.eup %4042 }
 0x5f2   :  { %4052 = vpow2.f32 %v1611_v45  ;;  %v1588_v25 = vsub.f32 %v5595_v62, %v1572_v24  ;;  %3700 = vmatpush3.bf16.msra.mxu0 %v3856_v7 }
 0x5f3   :  { %4054 = vpow2.f32 %v1617_v14  ;;  %3701 = vmatprep.subr.bf16.mxu0 %v3857_v59  ;;  %v5934_v14 = vld [vmem:[#allocation27_spill] sm:$0xff] }
 0x5f4   :  { %v5703_v21 = vpop.eup %4044  ;;  %v1619_v36 = vmul.f32 1.442695, %v1588_v25  ;;  %v5935_v25 = vld [vmem:[#allocation26_spill] sm:$0xff] }
 0x5f5   :  { %1637 = vadd.xlane.f32.xlu0 %v5701_v19  ;;  %1635 = vadd.xlane.f32.xlu1 %v5703_v21  ;;  %v1568_v3 = vpop.xlane.xlu1 %1567  ;;  %v5709_v58 = vpop.eup %4046 }
 0x5f6   :  { %v1586_v49 = vsub.f32 %v5599_v60, %v1568_v3  ;;  %3702 = vmatpush3.bf16.msra.mxu0 %v3857_v59 }
 0x5f7   :  { %3703 = vmatprep.subr.bf16.mxu0 %v3858_v28 }
 0x5f8   :  { %v5711_v33 = vpop.eup %4048  ;;  %v1615_v6 = vmul.f32 1.442695, %v1586_v49 }
 0x5f9   :  { %1641 = vadd.xlane.f32.xlu0 %v5709_v58  ;;  %1639 = vadd.xlane.f32.xlu1 %v5711_v33  ;;  %v5715_v34 = vpop.eup %4050 }
 0x5fa   :  { %4056 = vpow2.f32 %v1615_v6  ;;  %3704 = vmatpush3.bf16.msra.mxu0 %v3858_v28 }
 0x5fb   :  { %4058 = vpow2.f32 %v1619_v36 }
 0x5fc   :  { %v5717_v1 = vpop.eup %4052 }
 0x5fd   :  { %1645 = vadd.xlane.f32.xlu0 %v5715_v34  ;;  %1643 = vadd.xlane.f32.xlu1 %v5717_v1  ;;  %v5721_v62 = vpop.eup %4054 }
 0x601   :  { %1649 = vadd.xlane.f32.xlu0 %v5721_v62 }
 0x604   :  { %v5724_v60 = vpop.eup %4056 }
 0x605   :  { %1647 = vadd.xlane.f32.xlu1 %v5724_v60  ;;  %v5727_v4 = vpop.eup %4058 }
 0x609   :  { %1651 = vadd.xlane.f32.xlu1 %v5727_v4 }
 0x646   :  { %v1961_v23 = vpop.xlane.xlu0 %1960 }
 0x647   :  { %4060 = vrcp.f32 %v1961_v23 }
 0x648   :  { %v1963_v51 = vpop.xlane.xlu1 %1962 }
 0x649   :  { %4062 = vrcp.f32 %v1963_v51 }
 0x64a   :  { %v1965_v9 = vpop.xlane.xlu0 %1964 }
 0x64b   :  { %4064 = vrcp.f32 %v1965_v9 }
 0x64e   :  { %v1967_v10 = vpop.xlane.xlu1 %1966 }
 0x64f   :  { %4066 = vrcp.f32 %v1967_v10 }
 0x651   :  { %v4061_v17 = vpop.eup %4060 }
 0x652   :  { %v2008_v43 = vmul.f32 %v4061_v17, %v5606_v15  ;;  %v5933_v15 = vld [vmem:[#allocation24_spill] sm:$0xff] }
 0x653   :  { %v4063_v13 = vpop.eup %4062 }
 0x654   :  { %v2009_v18 = vmul.f32 %v4063_v13, %v5609_v44 }
 0x655   :  { %v4065_v61 = vpop.eup %4064 }
 0x656   :  { %v2053_v35 = vpack.c.bf16 %v2009_v18, %v2008_v43  ;;  %v1969_v30 = vpop.xlane.xlu0 %1968  ;;  %v2010_v37 = vmul.f32 %v4065_v61, %v5614_v50 }
 0x657   :  { %4068 = vrcp.f32 %v1969_v30 }
 0x658   :  { %3643 = vmatprep.mubr.bf16.mxu1 %v2053_v35 }
 0x659   :  { %v4067_v56 = vpop.eup %4066 }
 0x65a   :  { %v2011_v53 = vmul.f32 %v4067_v56, %v5617_v47  ;;  %v1973_v52 = vpop.xlane.xlu0 %1972 }
 0x65c   :  { %v2054_v0 = vpack.c.bf16 %v2011_v53, %v2010_v37 }
 0x65e   :  { %3644 = vmatmul.mubr.bf16.vlgmr.msra.gmra.mrb[48].mxu1 %v2054_v0  ;;  %v1971_v45 = vpop.xlane.xlu1 %1970 }
 0x65f   :  { %3660 = vmatpush3.bf16.msra.mxu1 %v5932_v48  ;;  %4070 = vrcp.f32 %v1971_v45 }
 0x660   :  { %3661 = vmatprep.subr.bf16.mxu1 %v5933_v15  ;;  %4072 = vrcp.f32 %v1973_v52 }
 0x661   :  { %v4069_v3 = vpop.eup %4068 }
 0x662   :  { %v1977_v44 = vpop.xlane.xlu0 %1976  ;;  %v1975_v24 = vpop.xlane.xlu1 %1974  ;;  %v2012_v36 = vmul.f32 %v4069_v3, %v5624_v40 }
 0x663   :  { %3662 = vmatpush3.bf16.msra.mxu1 %v5933_v15  ;;  %4074 = vrcp.f32 %v1975_v24 }
 0x664   :  { %3663 = vmatprep.subr.bf16.mxu1 %v5934_v14  ;;  %4076 = vrcp.f32 %v1977_v44 }
 0x666   :  { %v1981_v50 = vpop.xlane.xlu0 %1980  ;;  %v1979_v47 = vpop.xlane.xlu1 %1978 }
 0x667   :  { %3664 = vmatpush3.bf16.msra.mxu1 %v5934_v14  ;;  %4078 = vrcp.f32 %v1979_v47 }
 0x668   :  { %3665 = vmatprep.subr.bf16.mxu1 %v5935_v25  ;;  %4080 = vrcp.f32 %v1981_v50 }
 0x669   :  { %v4071_v48 = vpop.eup %4070 }
 0x66a   :  { %v1985_v49 = vpop.xlane.xlu0 %1984  ;;  %v1983_v6 = vpop.xlane.xlu1 %1982  ;;  %v2013_v12 = vmul.f32 %v4071_v48, %v5634_v16  ;;  %v5937_v16 = vld [vmem:[#allocation28_spill] sm:$0xff] }
 0x66b   :  { %3666 = vmatpush3.bf16.msra.mxu1 %v5935_v25  ;;  %v4073_v26 = vpop.eup %4072  ;;  %4082 = vrcp.f32 %v1983_v6 }
 0x66c   :  { %3667 = vmatprep.subr.bf16.mxu1 %v5936_v5  ;;  %v2055_v31 = vpack.c.bf16 %v2013_v12, %v2012_v36  ;;  %4084 = vrcp.f32 %v1985_v49  ;;  %v2014_v23 = vmul.f32 %v4073_v26, %v5629_v27  ;;  %v5938_v27 = vld [vmem:[#allocation32_spill] sm:$0xff] }
 0x66d   :  { %v4075_v7 = vpop.eup %4074 }
 0x66e   :  { %v1989_v59 = vpop.xlane.xlu0 %1988  ;;  %3647 = vmatprep.mubr.bf16.mxu1 %v2055_v31  ;;  %v1987_v28 = vpop.xlane.xlu1 %1986  ;;  %v2015_v40 = vmul.f32 %v4075_v7, %v5639_v63 }
 0x66f   :  { %3668 = vmatpush3.bf16.msra.mxu1 %v5936_v5  ;;  %v4077_v51 = vpop.eup %4076  ;;  %4086 = vrcp.f32 %v1987_v28 }
 0x670   :  { %3669 = vmatprep.subr.bf16.mxu1 %v5937_v16  ;;  %v2056_v9 = vpack.c.bf16 %v2015_v40, %v2014_v23  ;;  %4088 = vrcp.f32 %v1989_v59  ;;  %v2016_v43 = vmul.f32 %v4077_v51, %v5641_v29  ;;  %v5939_v29 = vld [vmem:[#allocation30_spill] sm:$0xff] }
 0x671   :  { %v4079_v10 = vpop.eup %4078 }
 0x672   :  { %v1622_v17 = vpop.xlane.xlu0 %1621  ;;  %v1991_v13 = vpop.xlane.xlu1 %1990  ;;  %3648 = vmatmul.mubr.bf16.gmra.mrb[52].mxu1 %v2056_v9  ;;  %v2017_v18 = vmul.f32 %v4079_v10, %v5649_v55 }
 0x673   :  { %v4081_v35 = vpop.eup %4080  ;;  %3670 = vmatpush3.bf16.msra.mxu1 %v5937_v16  ;;  %4090 = vrcp.f32 %v1991_v13 }
 0x674   :  { %3671 = vmatprep.subr.bf16.mxu1 %v5938_v27  ;;  %v2057_v63 = vpack.c.bf16 %v2017_v18, %v2016_v43  ;;  %4092 = vrcp.f32 %v1622_v17  ;;  %v2018_v37 = vmul.f32 %v4081_v35, %v5647_v20 }
 0x675   :  { %v4083_v61 = vpop.eup %4082 }
 0x676   :  { %v1626_v30 = vpop.xlane.xlu0 %1625  ;;  %v1624_v56 = vpop.xlane.xlu1 %1623  ;;  %3651 = vmatprep.mubr.bf16.mxu1 %v2057_v63  ;;  %v2019_v53 = vmul.f32 %v4083_v61, %v5657_v41 }
 0x677   :  { %v4085_v0 = vpop.eup %4084  ;;  %3672 = vmatpush3.bf16.msra.mxu1 %v5938_v27  ;;  %4094 = vrcp.f32 %v1624_v56 }
 0x678   :  { %3673 = vmatprep.subr.bf16.mxu1 %v5939_v29  ;;  %v2058_v55 = vpack.c.bf16 %v2019_v53, %v2018_v37  ;;  %4096 = vrcp.f32 %v1626_v30  ;;  %v2020_v44 = vmul.f32 %v4085_v0, %v5655_v32 }
 0x679   :  { %v4087_v52 = vpop.eup %4086 }
 0x67a   :  { %v1630_v45 = vpop.xlane.xlu0 %1629  ;;  %v1628_v15 = vpop.xlane.xlu1 %1627  ;;  %3652 = vmatmul.mubr.bf16.gmra.mrb[56].mxu1 %v2058_v55  ;;  %v2021_v24 = vmul.f32 %v4087_v52, %v5665_v11 }
 0x67b   :  { %v4089_v14 = vpop.eup %4088  ;;  %3674 = vmatpush3.bf16.msra.mxu1 %v5939_v29  ;;  %4098 = vrcp.f32 %v1628_v15 }
 0x67c   :  { %v2059_v20 = vpack.c.bf16 %v2021_v24, %v2020_v44  ;;  %4100 = vrcp.f32 %v1630_v45  ;;  %v2022_v3 = vmul.f32 %v4089_v14, %v5663_v42 }
 0x67d   :  { %v4091_v41 = vpop.eup %4090 }
 0x67e   :  { %v1634_v50 = vpop.xlane.xlu0 %1633  ;;  %v1632_v47 = vpop.xlane.xlu1 %1631  ;;  %3655 = vmatprep.mubr.bf16.mxu1 %v2059_v20  ;;  %v2023_v25 = vmul.f32 %v4091_v41, %v5673_v39 }
 0x67f   :  { %v4093_v48 = vpop.eup %4092  ;;  %4102 = vrcp.f32 %v1632_v47 }
 0x680   :  { %v2060_v49 = vpack.c.bf16 %v2023_v25, %v2022_v3  ;;  %4104 = vrcp.f32 %v1634_v50  ;;  %v1669_v36 = vmul.f32 %v4093_v48, %v5671_v54 }
 0x681   :  { %v4095_v32 = vpop.eup %4094 }
 0x682   :  { %v1638_v11 = vpop.xlane.xlu0 %1637  ;;  %v1636_v6 = vpop.xlane.xlu1 %1635  ;;  %3656 = vmatmul.mubr.bf16.gmra.mrb[60].mxu1 %v2060_v49  ;;  %v1670_v12 = vmul.f32 %v4095_v32, %v5681_v57 }
 0x683   :  { %v4097_v26 = vpop.eup %4096  ;;  %4106 = vrcp.f32 %v1636_v6 }
 0x684   :  { %v1714_v5 = vpack.c.bf16 %v1670_v12, %v1669_v36  ;;  %4108 = vrcp.f32 %v1638_v11  ;;  %v1671_v39 = vmul.f32 %v4097_v26, %v5679_v22 }
 0x685   :  { %v4099_v31 = vpop.eup %4098 }
 0x686   :  { %v1642_v42 = vpop.xlane.xlu0 %1641  ;;  %v1640_v7 = vpop.xlane.xlu1 %1639  ;;  %v1672_v59 = vmul.f32 %v4099_v31, %v5689_v38  ;;  %3675 = vmatprep.mubr.bf16.mxu1 %v1714_v5 }
 0x687   :  { %v4101_v28 = vpop.eup %4100  ;;  %4110 = vrcp.f32 %v1640_v7  ;;  %v5940_v7 = vmov 0  }
 0x688   :  { %v1715_v23 = vpack.c.bf16 %v1672_v59, %v1671_v39  ;;  %4112 = vrcp.f32 %v1642_v42  ;;  %v1673_v57 = vmul.f32 %v4101_v28, %v5687_v2  ;;  %v3860_v39 = vld [vmem:[#allocation14] ss:$8 sps:$4 sm:$0xff]   ;;  %v3862_v59 = vld [vmem:[#allocation14 + $0x4] ss:$8 sps:$4 sm:$0xff]   ;;  %v3865_v28 = vld [vmem:[#allocation14 + $0x14] ss:$8 sps:$4 sm:$0xff]  }
 0x689   :  { %v4103_v40 = vpop.eup %4102 }
 0x68a   :  { %v1644_v54 = vpop.xlane.xlu1 %1643  ;;  %3676 = vmatmul.mubr.bf16.vlgmr.msra.gmra.mrb[48].mxu1 %v1715_v23  ;;  %v1674_v51 = vmul.f32 %v4103_v40, %v5697_v8  ;;  %v4105_v16 = vpop.eup %4104  ;;  %v3863_v23 = vld [vmem:[#allocation14 + $0x10] ss:$8 sps:$4 sm:$0xff]   ;;  %v3868_v40 = vld [vmem:[#allocation14 + $0x24] ss:$8 sps:$4 sm:$0xff]  }
 0x68b   :  { %v1646_v9 = vpop.xlane.xlu0 %1645  ;;  %4114 = vrcp.f32 %v1644_v54  ;;  %v1675_v22 = vmul.f32 %v4105_v16, %v5695_v46  ;;  %v3866_v54 = vld [vmem:[#allocation14 + $0x20] ss:$8 sps:$4 sm:$0xff]  }
 0x68c   :  { %v1716_v10 = vpack.c.bf16 %v1674_v51, %v1673_v57  ;;  %4116 = vrcp.f32 %v1646_v9  ;;  %v4156_v16 = vld [vmem:[#allocation2] sm:$0xff] }
 0x68d   :  { %v4107_v17 = vpop.eup %4106 }
 0x68e   :  { %3679 = vmatprep.mubr.bf16.mxu1 %v1716_v10  ;;  %v1676_v38 = vmul.f32 %v4107_v17, %v5703_v21  ;;  %v4109_v13 = vpop.eup %4108 }
 0x68f   :  { %v1650_v35 = vpop.xlane.xlu0 %1649  ;;  %v1677_v2 = vmul.f32 %v4109_v13, %v5701_v19  ;;  %v4158_v13 = vld [vmem:[#allocation2 + $0x8] sm:$0xff] }
 0x690   :  { %v1717_v43 = vpack.c.bf16 %v1676_v38, %v1675_v22  ;;  %v4157_v22 = vld [vmem:[#allocation2 + $0x10] sm:$0xff] }
 0x691   :  { %v4111_v18 = vpop.eup %4110 }
 0x692   :  { %v1648_v27 = vpop.xlane.xlu1 %1647  ;;  %3680 = vmatmul.mubr.bf16.gmra.mrb[52].mxu1 %v1717_v43  ;;  %v1678_v8 = vmul.f32 %v4111_v18, %v5711_v33  ;;  %v4113_v63 = vpop.eup %4112 }
 0x693   :  { %4118 = vrcp.f32 %v1648_v27  ;;  %v1679_v46 = vmul.f32 %v4113_v63, %v5709_v58  ;;  %v3859_v58 = vld [vmem:[#allocation13 + $0x38] sm:$0xff]  }
 0x694   :  { %4120 = vrcp.f32 %v1650_v35  ;;  %v1718_v61 = vpack.c.bf16 %v1678_v8, %v1677_v2  ;;  %3705 = vmatprep.subr.bf16.mxu0 %v3859_v58  ;;  %v4159_v35 = vld [vmem:[#allocation2 + $0x18] sm:$0xff] }
 0x695   :  { %v4115_v30 = vpop.eup %4114  ;;  %3706 = vmatpush3.bf16.msra.mxu0 %v3859_v58 }
 0x696   :  { %v1652_v56 = vpop.xlane.xlu1 %1651  ;;  %3683 = vmatprep.mubr.bf16.mxu1 %v1718_v61  ;;  %v1680_v21 = vmul.f32 %v4115_v30, %v5717_v1  ;;  %v4117_v53 = vpop.eup %4116  ;;  %2656 = vmatprep.subr.bf16.mxu0 %v3862_v59  ;;  %v4160_v30 = vld [vmem:[#allocation2 + $0x20] sm:$0xff]  ;;  %v3875_v59 = vld [vmem:[#allocation14 + $0x50] ss:$8 sps:$4 sm:$0xff]  }
 0x697   :  { %4122 = vrcp.f32 %v1652_v56  ;;  %v1681_v29 = vmul.f32 %v4117_v53, %v5715_v34  ;;  %v4161_v53 = vld [vmem:[#allocation2 + $0x30] sm:$0xff] }
 0x698   :  { %v1719_v37 = vpack.c.bf16 %v1680_v21, %v1679_v46 }
 0x69a   :  { %3684 = vmatmul.mubr.bf16.gmra.mrb[56].mxu1 %v1719_v37 }
 0x69d   :  { %v4119_v0 = vpop.eup %4118 }
 0x69e   :  { %v1682_v19 = vmul.f32 %v4119_v0, %v5724_v60  ;;  %v4121_v33 = vpop.eup %4120 }
 0x69f   :  { %v1683_v45 = vmul.f32 %v4121_v33, %v5721_v62 }
 0x6a0   :  { %v1720_v55 = vpack.c.bf16 %v1682_v19, %v1681_v29  ;;  %v4162_v29 = vld [vmem:[#allocation2 + $0x28] sm:$0xff] }
 0x6a1   :  { %v4123_v52 = vpop.eup %4122 }
 0x6a2   :  { %3687 = vmatprep.mubr.bf16.mxu1 %v1720_v55  ;;  %v1684_v15 = vmul.f32 %v4123_v52, %v5727_v4  ;;  %v4163_v55 = vld [vmem:[#allocation2 + $0x38] sm:$0xff] }
 0x6a4   :  { %v1721_v44 = vpack.c.bf16 %v1684_v15, %v1683_v45 }
 0x6a6   :  { %3688 = vmatmul.mubr.bf16.gmra.mrb[60].mxu1 %v1721_v44 }
 0x75d   :  { %v3677_v1 = vpop.f32.mrb[48].mxu1 }
 0x75e   :  { %v2192_v24 = vpop.f32.mrb[49].mxu1 }
 0x75f   :  { %v3678_v14 = vpop.f32.mrb[50].mxu1 }
 0x760   :  { %v2256_v20 = vpack.c.bf16 %v3678_v14, %v3677_v1  ;;  %v2195_v34 = vpop.f32.mrb[51].mxu1  ;;  %v4164_v1 = vld [vmem:[#allocation2 + $0x40] sm:$0xff] }
 0x761   :  { %v2255_v41 = vpack.c.bf16 %v2195_v34, %v2192_v24 }
 0x763   :  { %3707 = vmatprep.mubr.bf16.mxu0 %v2255_v41  ;;  %v4165_v41 = vld [vmem:[#allocation2 + $0x50] sm:$0xff] }
 0x764   :  { %3708 = vmatmul.mubr.bf16.vlgmr.msra.gmra.mrb[64].mxu0 %v2256_v20 }
 0x765   :  { %v3681_v60 = vpop.f32.mrb[52].mxu1  ;;  %2657 = vmatpush1.bf16.msra.mxu0 %v3860_v39 }
 0x766   :  { %v2208_v50 = vpop.f32.mrb[53].mxu1  ;;  %2658 = vmatprep.subr.bf16.mxu0 %v3865_v28 }
 0x767   :  { %v3682_v47 = vpop.f32.mrb[54].mxu1 }
 0x768   :  { %v2258_v3 = vpack.c.bf16 %v3682_v47, %v3681_v60  ;;  %v2211_v62 = vpop.f32.mrb[55].mxu1 }
 0x769   :  { %v2257_v25 = vpack.c.bf16 %v2211_v62, %v2208_v50  ;;  %2659 = vmatpush1.bf16.msra.mxu0 %v3863_v23  ;;  %v4166_v50 = vld [vmem:[#allocation2 + $0x48] sm:$0xff]  ;;  %v3871_v62 = vld [vmem:[#allocation14 + $0x34] ss:$8 sps:$4 sm:$0xff]  }
 0x76a   :  { %2660 = vmatprep.subr.bf16.mxu0 %v3868_v40  ;;  %v4169_v23 = vld [vmem:[#allocation2 + $0x70] sm:$0xff] }
 0x76b   :  { %3711 = vmatprep.mubr.bf16.mxu0 %v2257_v25  ;;  %v3869_v25 = vld [vmem:[#allocation14 + $0x30] ss:$8 sps:$4 sm:$0xff]  }
 0x76c   :  { %3712 = vmatmul.mubr.bf16.gmra.mrb[68].mxu0 %v2258_v3 }
 0x76d   :  { %v3685_v4 = vpop.f32.mrb[56].mxu1  ;;  %2661 = vmatpush1.bf16.msra.mxu0 %v3866_v54  ;;  %v4170_v54 = vld [vmem:[#allocation2 + $0x68] sm:$0xff] }
 0x76e   :  { %v2224_v48 = vpop.f32.mrb[57].mxu1  ;;  %2662 = vmatprep.subr.bf16.mxu0 %v3871_v62 }
 0x76f   :  { %v3686_v49 = vpop.f32.mrb[58].mxu1 }
 0x770   :  { %v2260_v32 = vpack.c.bf16 %v3686_v49, %v3685_v4  ;;  %v2227_v11 = vpop.f32.mrb[59].mxu1  ;;  %v4167_v4 = vld [vmem:[#allocation2 + $0x58] sm:$0xff] }
 0x771   :  { %v2259_v6 = vpack.c.bf16 %v2227_v11, %v2224_v48  ;;  %2663 = vmatpush1.bf16.msra.mxu0 %v3869_v25  ;;  %v3874_v11 = vld [vmem:[#allocation14 + $0x44] ss:$8 sps:$4 sm:$0xff]  }
 0x772   :  { %2664 = vmatprep.subr.bf16.mxu0 %v3874_v11 }
 0x773   :  { %3715 = vmatprep.mubr.bf16.mxu0 %v2259_v6  ;;  %v3872_v6 = vld [vmem:[#allocation14 + $0x40] ss:$8 sps:$4 sm:$0xff]  }
 0x774   :  { %3716 = vmatmul.mubr.bf16.gmra.mrb[72].mxu0 %v2260_v32 }
 0x775   :  { %2665 = vmatpush1.bf16.msra.mxu0 %v3872_v6 }
 0x779   :  { %v3689_v36 = vpop.f32.mrb[60].mxu1 }
 0x77a   :  { %v2240_v12 = vpop.f32.mrb[61].mxu1 }
 0x77b   :  { %v3690_v26 = vpop.f32.mrb[62].mxu1 }
 0x77c   :  { %v2262_v5 = vpack.c.bf16 %v3690_v26, %v3689_v36  ;;  %v2243_v31 = vpop.f32.mrb[63].mxu1 }
 0x77d   :  { %v2261_v42 = vpack.c.bf16 %v2243_v31, %v2240_v12  ;;  %v4168_v31 = vld [vmem:[#allocation2 + $0x60] sm:$0xff] }
 0x77f   :  { %3719 = vmatprep.mubr.bf16.mxu0 %v2261_v42 }
 0x780   :  { %3720 = vmatmul.mubr.bf16.gmra.mrb[76].mxu0 %v2262_v5  ;;  %v3877_v5 = vld [vmem:[#allocation14 + $0x54] ss:$8 sps:$4 sm:$0xff]  }
 0x781   :  { %2688 = vmatprep.mubr.bf16.mxu0 %v5940_v7  ;;  %2666 = vmatprep.subr.bf16.mxu0 %v3877_v5 }
 0x782   :  { %2667 = vmatpush1.bf16.msra.mxu0 %v3875_v59 }
 0x837   :  { %v3709_v57 = vpop.f32.mrb[64].mxu0 }
 0x838   :  { %v2361_v51 = vpop.f32.mrb[65].mxu0  ;;  %v5780_v38 = vadd.f32 %v4157_v22, %v3709_v57 }
 0x839   :  { %v5778_v9 = vadd.f32 %v4156_v16, %v2361_v51  ;;  %v3710_v10 = vpop.f32.mrb[66].mxu0  ;;  %v3880_v16 = vld [vmem:[#allocation14 + $0x64] ss:$8 sps:$4 sm:$0xff]  }
 0x83a   :  { %v2364_v17 = vpop.f32.mrb[67].mxu0  ;;  %v5786_v27 = vadd.f32 %v4159_v35, %v3710_v10  ;;  %v2442_v63 = vmul.f32 %v5780_v38, %v5780_v38  ;;  %v4171_v10 = vld [vmem:[#allocation2 + $0x78] sm:$0xff]  ;;  %2668 = vmatprep.subr.bf16.mxu0 %v3880_v16 }
 0x83b   :  { %v5782_v43 = vadd.f32 %v4158_v13, %v2364_v17  ;;  %v2440_v18 = vmul.f32 %v5778_v9, %v5778_v9  ;;  %v3878_v13 = vld [vmem:[#allocation14 + $0x60] ss:$8 sps:$4 sm:$0xff]   ;;  %v3883_v35 = vld [vmem:[#allocation14 + $0x74] ss:$8 sps:$4 sm:$0xff]  }
 0x83c   :  { %v2443_v21 = vmul.f32 %v5786_v27, %v5786_v27  ;;  %2669 = vmatpush1.bf16.msra.mxu0 %v3878_v13 }
 0x83d   :  { %2456 = vadd.xlane.f32.xlu0 %v2440_v18  ;;  %v2441_v2 = vmul.f32 %v5782_v43, %v5782_v43  ;;  %2670 = vmatprep.subr.bf16.mxu0 %v3883_v35 }
 0x83f   :  { %2458 = vadd.xlane.f32.xlu1 %v2441_v2  ;;  %v3713_v8 = vpop.f32.mrb[68].mxu0 }
 0x840   :  { %v2377_v61 = vpop.f32.mrb[69].mxu0  ;;  %v5796_v0 = vadd.f32 %v4161_v53, %v3713_v8  ;;  %v3881_v8 = vld [vmem:[#allocation14 + $0x70] ss:$8 sps:$4 sm:$0xff]  }
 0x841   :  { %v5792_v56 = vadd.f32 %v4160_v30, %v2377_v61  ;;  %2460 = vadd.xlane.f32.xlu0 %v2442_v63  ;;  %v3714_v46 = vpop.f32.mrb[70].mxu0  ;;  %2671 = vmatpush1.bf16.msra.mxu0 %v3881_v8  ;;  %v3884_v63 = vld [vmem:[#allocation16 + $0x40] sm:$0xff]   ;;  %v3886_v30 = vld [vmem:[#allocation16 + $0x48] sm:$0xff]   ;;  %v3890_v53 = vld [vmem:[#allocation16 + $0x58] sm:$0xff]  }
 0x842   :  { %v2380_v37 = vpop.f32.mrb[71].mxu0  ;;  %v5802_v52 = vadd.f32 %v4163_v55, %v3714_v46  ;;  %v2446_v44 = vmul.f32 %v5796_v0, %v5796_v0  ;;  %v3885_v61 = vld [vmem:[#allocation16] sm:$0xff]   ;;  %3355 = vmatprep.subr.bf16.mxu1 %v3884_v63  ;;  %v3887_v46 = vld [vmem:[#allocation16 + $0x8] sm:$0xff]  }
 0x843   :  { %v5798_v19 = vadd.f32 %v4162_v29, %v2380_v37  ;;  %2462 = vadd.xlane.f32.xlu1 %v2443_v21  ;;  %v2444_v33 = vmul.f32 %v5792_v56, %v5792_v56  ;;  %3356 = vmatpush3.bf16.msra.mxu1 %v3885_v61  ;;  %v3888_v21 = vld [vmem:[#allocation16 + $0x50] sm:$0xff]   ;;  %v3891_v29 = vld [vmem:[#allocation16 + $0x18] sm:$0xff]   ;;  %v3893_v55 = vld [vmem:[#allocation16 + $0x20] sm:$0xff]  }
 0x844   :  { %v2447_v20 = vmul.f32 %v5802_v52, %v5802_v52  ;;  %3357 = vmatprep.subr.bf16.mxu1 %v3886_v30  ;;  %v3889_v37 = vld [vmem:[#allocation16 + $0x10] sm:$0xff]  }
 0x845   :  { %2464 = vadd.xlane.f32.xlu0 %v2444_v33  ;;  %v2445_v45 = vmul.f32 %v5798_v19, %v5798_v19  ;;  %v3892_v33 = vld [vmem:[#allocation16 + $0x60] sm:$0xff]  }
 0x847   :  { %2466 = vadd.xlane.f32.xlu1 %v2445_v45  ;;  %v3717_v15 = vpop.f32.mrb[72].mxu0  ;;  %3358 = vmatpush3.bf16.msra.mxu1 %v3887_v46  ;;  %v3894_v45 = vld [vmem:[#allocation16 + $0x68] sm:$0xff]  }
 0x848   :  { %v2393_v58 = vpop.f32.mrb[73].mxu0  ;;  %v5812_v60 = vadd.f32 %v4165_v41, %v3717_v15  ;;  %3359 = vmatprep.subr.bf16.mxu1 %v3888_v21 }
 0x849   :  { %v5808_v24 = vadd.f32 %v4164_v1, %v2393_v58  ;;  %2468 = vadd.xlane.f32.xlu0 %v2446_v44  ;;  %v3718_v14 = vpop.f32.mrb[74].mxu0 }
 0x84a   :  { %v2396_v34 = vpop.f32.mrb[75].mxu0  ;;  %v5818_v48 = vadd.f32 %v4167_v4, %v3718_v14  ;;  %v2450_v32 = vmul.f32 %v5812_v60, %v5812_v60 }
 0x84b   :  { %v5814_v47 = vadd.f32 %v4166_v50, %v2396_v34  ;;  %2470 = vadd.xlane.f32.xlu1 %v2447_v20  ;;  %v2448_v3 = vmul.f32 %v5808_v24, %v5808_v24  ;;  %3360 = vmatpush3.bf16.msra.mxu1 %v3889_v37 }
 0x84c   :  { %v2451_v36 = vmul.f32 %v5818_v48, %v5818_v48  ;;  %3361 = vmatprep.subr.bf16.mxu1 %v3890_v53 }
 0x84d   :  { %2472 = vadd.xlane.f32.xlu0 %v2448_v3  ;;  %v2449_v49 = vmul.f32 %v5814_v47, %v5814_v47 }
 0x84f   :  { %2474 = vadd.xlane.f32.xlu1 %v2449_v49  ;;  %3362 = vmatpush3.bf16.msra.mxu1 %v3891_v29 }
 0x850   :  { %3363 = vmatprep.subr.bf16.mxu1 %v3892_v33 }
 0x851   :  { %2476 = vadd.xlane.f32.xlu0 %v2450_v32 }
 0x853   :  { %v3721_v12 = vpop.f32.mrb[76].mxu0  ;;  %2478 = vadd.xlane.f32.xlu1 %v2451_v36  ;;  %3364 = vmatpush3.bf16.msra.mxu1 %v3893_v55 }
 0x854   :  { %v2409_v26 = vpop.f32.mrb[77].mxu0  ;;  %v5828_v40 = vadd.f32 %v4169_v23, %v3721_v12  ;;  %3365 = vmatprep.subr.bf16.mxu1 %v3894_v45 }
 0x855   :  { %v5826_v42 = vadd.f32 %v4168_v31, %v2409_v26  ;;  %v3722_v39 = vpop.f32.mrb[78].mxu0 }
 0x856   :  { %v2412_v28 = vpop.f32.mrb[79].mxu0  ;;  %v5834_v17 = vadd.f32 %v4171_v10, %v3722_v39  ;;  %v2454_v18 = vmul.f32 %v5828_v40, %v5828_v40 }
 0x857   :  { %v5830_v57 = vadd.f32 %v4170_v54, %v2412_v28  ;;  %v2452_v51 = vmul.f32 %v5826_v42, %v5826_v42 }
 0x858   :  { %v2455_v2 = vmul.f32 %v5834_v17, %v5834_v17 }
 0x859   :  { %2480 = vadd.xlane.f32.xlu0 %v2452_v51  ;;  %v2453_v22 = vmul.f32 %v5830_v57, %v5830_v57 }
 0x85b   :  { %2482 = vadd.xlane.f32.xlu1 %v2453_v22 }
 0x85d   :  { %2484 = vadd.xlane.f32.xlu0 %v2454_v18 }
 0x85f   :  { %2486 = vadd.xlane.f32.xlu1 %v2455_v2 }
 0x8ca   :  { %v2457_v15 = vpop.xlane.xlu0 %2456 }
 0x8cb   :  { %v2488_v44 = vmul.f32 0.0078125, %v2457_v15 }
 0x8cc   :  { %v2459_v58 = vpop.xlane.xlu1 %2458 }
 0x8cd   :  { %v2504_v1 = vadd.f32 1e-06, %v2488_v44  ;;  %v2489_v14 = vmul.f32 0.0078125, %v2459_v58 }
 0x8ce   :  { %v2461_v20 = vpop.xlane.xlu0 %2460 }
 0x8cf   :  { %4124 = vrsqrt.f32 %v2504_v1  ;;  %v2505_v34 = vadd.f32 1e-06, %v2489_v14  ;;  %v2490_v41 = vmul.f32 0.0078125, %v2461_v20 }
 0x8d0   :  { %v2463_v50 = vpop.xlane.xlu1 %2462 }
 0x8d1   :  { %4126 = vrsqrt.f32 %v2505_v34  ;;  %v2491_v3 = vmul.f32 0.0078125, %v2463_v50  ;;  %v2506_v62 = vadd.f32 1e-06, %v2490_v41 }
 0x8d2   :  { %v2465_v4 = vpop.xlane.xlu0 %2464 }
 0x8d3   :  { %v2507_v25 = vadd.f32 1e-06, %v2491_v3  ;;  %v2492_v11 = vmul.f32 0.0078125, %v2465_v4 }
 0x8d4   :  { %v2467_v49 = vpop.xlane.xlu1 %2466 }
 0x8d5   :  { %4128 = vrsqrt.f32 %v2507_v25  ;;  %v2493_v32 = vmul.f32 0.0078125, %v2467_v49  ;;  %v2508_v5 = vadd.f32 1e-06, %v2492_v11 }
 0x8d6   :  { %4130 = vrsqrt.f32 %v2506_v62  ;;  %v2469_v59 = vpop.xlane.xlu0 %2468 }
 0x8d7   :  { %v2509_v36 = vadd.f32 1e-06, %v2493_v32  ;;  %v2494_v51 = vmul.f32 0.0078125, %v2469_v59 }
 0x8d8   :  { %v2471_v12 = vpop.xlane.xlu1 %2470 }
 0x8d9   :  { %v4125_v6 = vpop.eup %4124  ;;  %4132 = vrsqrt.f32 %v2509_v36  ;;  %v2495_v28 = vmul.f32 0.0078125, %v2471_v12  ;;  %v2510_v18 = vadd.f32 1e-06, %v2494_v51 }
 0x8da   :  { %v2536_v31 = vmul.f32 %v4125_v6, %v5778_v9  ;;  %4134 = vrsqrt.f32 %v2508_v5  ;;  %v2473_v35 = vpop.xlane.xlu0 %2472 }
 0x8db   :  { %v4127_v26 = vpop.eup %4126  ;;  %v2511_v10 = vadd.f32 1e-06, %v2495_v28  ;;  %v2496_v30 = vmul.f32 0.0078125, %v2473_v35 }
 0x8dc   :  { %v2537_v39 = vmul.f32 %v4127_v26, %v5782_v43  ;;  %v2475_v22 = vpop.xlane.xlu1 %2474 }
 0x8dd   :  { %4136 = vrsqrt.f32 %v2511_v10  ;;  %v2497_v8 = vmul.f32 0.0078125, %v2475_v22  ;;  %v2512_v29 = vadd.f32 1e-06, %v2496_v30 }
 0x8de   :  { %v2552_v23 = vpack.c.bf16 %v2537_v39, %v2536_v31  ;;  %4138 = vrsqrt.f32 %v2510_v18  ;;  %v2477_v33 = vpop.xlane.xlu0 %2476 }
 0x8df   :  { %v4129_v54 = vpop.eup %4128  ;;  %v2513_v21 = vadd.f32 1e-06, %v2497_v8  ;;  %v2498_v58 = vmul.f32 0.0078125, %v2477_v33  ;;  %v3898_v33 = vld [vmem:[#allocation16 + $0x78] sm:$0xff]  }
 0x8e0   :  { %2689 = vmatmul.mubr.bf16.vlgmr.msra.gmra.mrb[80].mxu0 %v2552_v23  ;;  %v4131_v16 = vpop.eup %4130  ;;  %v2539_v13 = vmul.f32 %v4129_v54, %v5786_v27  ;;  %v2479_v37 = vpop.xlane.xlu1 %2478 }
 0x8e1   :  { %2698 = vmatprep.mubr.bf16.mxu0 %v5940_v7  ;;  %v2538_v2 = vmul.f32 %v4131_v16, %v5780_v38  ;;  %4140 = vrsqrt.f32 %v2513_v21  ;;  %v2499_v45 = vmul.f32 0.0078125, %v2479_v37  ;;  %v2514_v41 = vadd.f32 1e-06, %v2498_v58  ;;  %v3895_v37 = vld [vmem:[#allocation16 + $0x28] sm:$0xff]  }
 0x8e2   :  { %4142 = vrsqrt.f32 %v2512_v29  ;;  %3366 = vmatpush3.bf16.msra.mxu1 %v3895_v37  ;;  %v3897_v29 = vld [vmem:[#allocation16 + $0x30] sm:$0xff]  }
 0x8e3   :  { %v2553_v63 = vpack.c.bf16 %v2539_v13, %v2538_v2  ;;  %v4133_v61 = vpop.eup %4132  ;;  %v2515_v14 = vadd.f32 1e-06, %v2499_v45 }
 0x8e4   :  { %v4135_v46 = vpop.eup %4134  ;;  %v2541_v53 = vmul.f32 %v4133_v61, %v5798_v19 }
 0x8e5   :  { %v2540_v55 = vmul.f32 %v4135_v46, %v5792_v56  ;;  %4144 = vrsqrt.f32 %v2515_v14 }
 0x8e6   :  { %v2481_v50 = vpop.xlane.xlu0 %2480  ;;  %4146 = vrsqrt.f32 %v2514_v41 }
 0x8e7   :  { %v2554_v15 = vpack.c.bf16 %v2541_v53, %v2540_v55  ;;  %v4137_v44 = vpop.eup %4136  ;;  %v2500_v49 = vmul.f32 0.0078125, %v2481_v50  ;;  %v3896_v53 = vld [vmem:[#allocation16 + $0x70] sm:$0xff]   ;;  %v3899_v55 = vld [vmem:[#allocation16 + $0x38] sm:$0xff]  }
 0x8e8   :  { %2699 = vmatmul.mubr.bf16.gmra.mrb[84].mxu0 %v2553_v63  ;;  %v4139_v1 = vpop.eup %4138  ;;  %v2483_v20 = vpop.xlane.xlu1 %2482  ;;  %v2543_v34 = vmul.f32 %v4137_v44, %v5802_v52  ;;  %3367 = vmatprep.subr.bf16.mxu1 %v3896_v53 }
 0x8e9   :  { %2708 = vmatprep.mubr.bf16.mxu0 %v5940_v7  ;;  %v2542_v3 = vmul.f32 %v4139_v1, %v5796_v0  ;;  %v2501_v62 = vmul.f32 0.0078125, %v2483_v20  ;;  %v2516_v12 = vadd.f32 1e-06, %v2500_v49  ;;  %3368 = vmatpush3.bf16.msra.mxu1 %v3897_v29 }
 0x8ea   :  { %v2485_v26 = vpop.xlane.xlu0 %2484  ;;  %3369 = vmatprep.subr.bf16.mxu1 %v3898_v33 }
 0x8eb   :  { %v2555_v25 = vpack.c.bf16 %v2543_v34, %v2542_v3  ;;  %v4141_v4 = vpop.eup %4140  ;;  %v2517_v11 = vadd.f32 1e-06, %v2501_v62  ;;  %v2502_v28 = vmul.f32 0.0078125, %v2485_v26 }
 0x8ec   :  { %v4143_v32 = vpop.eup %4142  ;;  %v2487_v6 = vpop.xlane.xlu1 %2486  ;;  %v2545_v36 = vmul.f32 %v4141_v4, %v5814_v47 }
 0x8ed   :  { %v2544_v5 = vmul.f32 %v4143_v32, %v5808_v24  ;;  %4148 = vrsqrt.f32 %v2517_v11  ;;  %v2503_v31 = vmul.f32 0.0078125, %v2487_v6  ;;  %v2518_v16 = vadd.f32 1e-06, %v2502_v28  ;;  %3370 = vmatpush3.bf16.msra.mxu1 %v3899_v55 }
 0x8ee   :  { %4150 = vrsqrt.f32 %v2516_v12 }
 0x8ef   :  { %v2556_v39 = vpack.c.bf16 %v2545_v36, %v2544_v5  ;;  %v4145_v59 = vpop.eup %4144  ;;  %v2519_v54 = vadd.f32 1e-06, %v2503_v31 }
 0x8f0   :  { %2709 = vmatmul.mubr.bf16.gmra.mrb[88].mxu0 %v2554_v15  ;;  %v4147_v23 = vpop.eup %4146  ;;  %v2547_v51 = vmul.f32 %v4145_v59, %v5818_v48 }
 0x8f1   :  { %2718 = vmatprep.mubr.bf16.mxu0 %v5940_v7  ;;  %v2546_v10 = vmul.f32 %v4147_v23, %v5812_v60  ;;  %4152 = vrsqrt.f32 %v2519_v54 }
 0x8f2   :  { %4154 = vrsqrt.f32 %v2518_v16 }
 0x8f3   :  { %v2557_v22 = vpack.c.bf16 %v2547_v51, %v2546_v10 }
 0x8f7   :  { %v4149_v13 = vpop.eup %4148 }
 0x8f8   :  { %2719 = vmatmul.mubr.bf16.gmra.mrb[92].mxu0 %v2555_v25  ;;  %v4151_v18 = vpop.eup %4150  ;;  %v2549_v35 = vmul.f32 %v4149_v13, %v5830_v57 }
 0x8f9   :  { %2728 = vmatprep.mubr.bf16.mxu0 %v5940_v7  ;;  %v2548_v2 = vmul.f32 %v4151_v18, %v5826_v42 }
 0x8fb   :  { %v2558_v8 = vpack.c.bf16 %v2549_v35, %v2548_v2  ;;  %v4153_v63 = vpop.eup %4152 }
 0x8fc   :  { %v4155_v61 = vpop.eup %4154  ;;  %v2551_v30 = vmul.f32 %v4153_v63, %v5834_v17 }
 0x8fd   :  { %v2550_v46 = vmul.f32 %v4155_v61, %v5828_v40 }
 0x8ff   :  { %v2559_v21 = vpack.c.bf16 %v2551_v30, %v2550_v46 }
 0x900   :  { %2729 = vmatmul.mubr.bf16.gmra.mrb[96].mxu0 %v2556_v39 }
 0x901   :  { %2738 = vmatprep.mubr.bf16.mxu0 %v5940_v7 }
 0x908   :  { %2739 = vmatmul.mubr.bf16.gmra.mrb[100].mxu0 %v2557_v22 }
 0x909   :  { %2748 = vmatprep.mubr.bf16.mxu0 %v5940_v7 }
 0x910   :  { %2749 = vmatmul.mubr.bf16.gmra.mrb[104].mxu0 %v2558_v8 }
 0x911   :  { %2758 = vmatprep.mubr.bf16.mxu0 %v5940_v7 }
 0x918   :  { %2759 = vmatmul.mubr.bf16.gmra.mrb[108].mxu0 %v2559_v21 }
 0x9b3   :  { %v2690_v45 = vpop.f32.mrb[80].mxu0 }
 0x9b4   :  { %v2769_v15 = vmax.f32 %v2690_v45, 0.0  ;;  %v2692_v44 = vpop.f32.mrb[81].mxu0 }
 0x9b5   :  { %v2770_v7 = vmax.f32 %v2692_v44, 0.0  ;;  %v2694_v58 = vpop.f32.mrb[82].mxu0 }
 0x9b6   :  { %v2771_v1 = vmax.f32 %v2694_v58, 0.0  ;;  %v2696_v14 = vpop.f32.mrb[83].mxu0  ;;  %v2801_v34 = vmul.f32 %v2769_v15, %v2769_v15 }
 0x9b7   :  { %v2772_v20 = vmax.f32 %v2696_v14, 0.0  ;;  %v2802_v50 = vmul.f32 %v2770_v7, %v2770_v7 }
 0x9b8   :  { %v2803_v41 = vmul.f32 %v2771_v1, %v2771_v1 }
 0x9b9   :  { %v2804_v3 = vmul.f32 %v2772_v20, %v2772_v20 }
 0x9ba   :  { %v2833_v62 = vpack.c.bf16 %v2803_v41, %v2801_v34 }
 0x9bb   :  { %v2834_v25 = vpack.c.bf16 %v2804_v3, %v2802_v50  ;;  %v2700_v4 = vpop.f32.mrb[84].mxu0 }
 0x9bc   :  { %v2773_v49 = vmax.f32 %v2700_v4, 0.0  ;;  %v2702_v32 = vpop.f32.mrb[85].mxu0 }
 0x9bd   :  { %v2774_v11 = vmax.f32 %v2702_v32, 0.0  ;;  %v2704_v6 = vpop.f32.mrb[86].mxu0  ;;  %3009 = vmatprep.mubr.bf16.mxu1 %v2834_v25 }
 0x9be   :  { %v2775_v36 = vmax.f32 %v2704_v6, 0.0  ;;  %v2706_v12 = vpop.f32.mrb[87].mxu0  ;;  %3010 = vmatmul.mubr.bf16.vlgmr.msra.gmra.mrb[64].mxu1 %v2833_v62  ;;  %v2805_v5 = vmul.f32 %v2773_v49, %v2773_v49 }
 0x9bf   :  { %v2776_v26 = vmax.f32 %v2706_v12, 0.0  ;;  %v2806_v39 = vmul.f32 %v2774_v11, %v2774_v11 }
 0x9c0   :  { %v2807_v31 = vmul.f32 %v2775_v36, %v2775_v36 }
 0x9c1   :  { %v2808_v59 = vmul.f32 %v2776_v26, %v2776_v26 }
 0x9c2   :  { %v2835_v28 = vpack.c.bf16 %v2807_v31, %v2805_v5 }
 0x9c3   :  { %v2836_v23 = vpack.c.bf16 %v2808_v59, %v2806_v39  ;;  %v2710_v54 = vpop.f32.mrb[88].mxu0 }
 0x9c4   :  { %v2777_v51 = vmax.f32 %v2710_v54, 0.0  ;;  %v2712_v16 = vpop.f32.mrb[89].mxu0 }
 0x9c5   :  { %v2778_v10 = vmax.f32 %v2712_v16, 0.0  ;;  %v2714_v22 = vpop.f32.mrb[90].mxu0  ;;  %3017 = vmatprep.mubr.bf16.mxu1 %v2836_v23 }
 0x9c6   :  { %v2779_v13 = vmax.f32 %v2714_v22, 0.0  ;;  %v2716_v18 = vpop.f32.mrb[91].mxu0  ;;  %3018 = vmatmul.mubr.bf16.gmra.mrb[68].mxu1 %v2835_v28  ;;  %v2809_v2 = vmul.f32 %v2777_v51, %v2777_v51 }
 0x9c7   :  { %v2780_v35 = vmax.f32 %v2716_v18, 0.0  ;;  %v2810_v63 = vmul.f32 %v2778_v10, %v2778_v10 }
 0x9c8   :  { %v2811_v8 = vmul.f32 %v2779_v13, %v2779_v13 }
 0x9c9   :  { %v2812_v61 = vmul.f32 %v2780_v35, %v2780_v35 }
 0x9ca   :  { %v2837_v30 = vpack.c.bf16 %v2811_v8, %v2809_v2 }
 0x9cb   :  { %v2838_v46 = vpack.c.bf16 %v2812_v61, %v2810_v63  ;;  %v2720_v21 = vpop.f32.mrb[92].mxu0 }
 0x9cc   :  { %v2781_v37 = vmax.f32 %v2720_v21, 0.0  ;;  %v2722_v53 = vpop.f32.mrb[93].mxu0 }
 0x9cd   :  { %v2782_v29 = vmax.f32 %v2722_v53, 0.0  ;;  %v2724_v33 = vpop.f32.mrb[94].mxu0  ;;  %3025 = vmatprep.mubr.bf16.mxu1 %v2838_v46 }
 0x9ce   :  { %v2783_v55 = vmax.f32 %v2724_v33, 0.0  ;;  %v2726_v45 = vpop.f32.mrb[95].mxu0  ;;  %3026 = vmatmul.mubr.bf16.gmra.mrb[72].mxu1 %v2837_v30  ;;  %v2813_v44 = vmul.f32 %v2781_v37, %v2781_v37 }
 0x9cf   :  { %v2784_v15 = vmax.f32 %v2726_v45, 0.0  ;;  %v2814_v58 = vmul.f32 %v2782_v29, %v2782_v29 }
 0x9d0   :  { %v2815_v7 = vmul.f32 %v2783_v55, %v2783_v55 }
 0x9d1   :  { %v2816_v1 = vmul.f32 %v2784_v15, %v2784_v15 }
 0x9d2   :  { %v2839_v14 = vpack.c.bf16 %v2815_v7, %v2813_v44 }
 0x9d3   :  { %v2840_v20 = vpack.c.bf16 %v2816_v1, %v2814_v58  ;;  %v2730_v34 = vpop.f32.mrb[96].mxu0 }
 0x9d4   :  { %v2785_v41 = vmax.f32 %v2730_v34, 0.0  ;;  %v2732_v50 = vpop.f32.mrb[97].mxu0 }
 0x9d5   :  { %v2786_v3 = vmax.f32 %v2732_v50, 0.0  ;;  %v2734_v62 = vpop.f32.mrb[98].mxu0  ;;  %3033 = vmatprep.mubr.bf16.mxu1 %v2840_v20 }
 0x9d6   :  { %v2787_v25 = vmax.f32 %v2734_v62, 0.0  ;;  %v2736_v4 = vpop.f32.mrb[99].mxu0  ;;  %3034 = vmatmul.mubr.bf16.gmra.mrb[76].mxu1 %v2839_v14  ;;  %v2817_v32 = vmul.f32 %v2785_v41, %v2785_v41 }
 0x9d7   :  { %v2788_v49 = vmax.f32 %v2736_v4, 0.0  ;;  %v2818_v6 = vmul.f32 %v2786_v3, %v2786_v3 }
 0x9d8   :  { %v2819_v11 = vmul.f32 %v2787_v25, %v2787_v25 }
 0x9d9   :  { %v2820_v36 = vmul.f32 %v2788_v49, %v2788_v49 }
 0x9da   :  { %v2841_v12 = vpack.c.bf16 %v2819_v11, %v2817_v32 }
 0x9db   :  { %v2842_v26 = vpack.c.bf16 %v2820_v36, %v2818_v6  ;;  %v2740_v5 = vpop.f32.mrb[100].mxu0 }
 0x9dc   :  { %v2789_v31 = vmax.f32 %v2740_v5, 0.0  ;;  %v2742_v39 = vpop.f32.mrb[101].mxu0 }
 0x9dd   :  { %v2790_v59 = vmax.f32 %v2742_v39, 0.0  ;;  %v2744_v28 = vpop.f32.mrb[102].mxu0  ;;  %3041 = vmatprep.mubr.bf16.mxu1 %v2842_v26 }
 0x9de   :  { %v2791_v23 = vmax.f32 %v2744_v28, 0.0  ;;  %v2746_v54 = vpop.f32.mrb[103].mxu0  ;;  %3042 = vmatmul.mubr.bf16.gmra.mrb[80].mxu1 %v2841_v12  ;;  %v2821_v16 = vmul.f32 %v2789_v31, %v2789_v31 }
 0x9df   :  { %v2792_v51 = vmax.f32 %v2746_v54, 0.0  ;;  %v2822_v22 = vmul.f32 %v2790_v59, %v2790_v59 }
 0x9e0   :  { %v2823_v10 = vmul.f32 %v2791_v23, %v2791_v23 }
 0x9e1   :  { %v2824_v13 = vmul.f32 %v2792_v51, %v2792_v51 }
 0x9e2   :  { %v2843_v18 = vpack.c.bf16 %v2823_v10, %v2821_v16 }
 0x9e3   :  { %v2844_v35 = vpack.c.bf16 %v2824_v13, %v2822_v22  ;;  %v2750_v2 = vpop.f32.mrb[104].mxu0 }
 0x9e4   :  { %v2793_v8 = vmax.f32 %v2750_v2, 0.0  ;;  %v2752_v63 = vpop.f32.mrb[105].mxu0 }
 0x9e5   :  { %v2794_v61 = vmax.f32 %v2752_v63, 0.0  ;;  %v2754_v30 = vpop.f32.mrb[106].mxu0  ;;  %3049 = vmatprep.mubr.bf16.mxu1 %v2844_v35 }
 0x9e6   :  { %v2795_v46 = vmax.f32 %v2754_v30, 0.0  ;;  %v2756_v21 = vpop.f32.mrb[107].mxu0  ;;  %3050 = vmatmul.mubr.bf16.gmra.mrb[84].mxu1 %v2843_v18  ;;  %v2825_v53 = vmul.f32 %v2793_v8, %v2793_v8 }
 0x9e7   :  { %v2796_v37 = vmax.f32 %v2756_v21, 0.0  ;;  %v2826_v33 = vmul.f32 %v2794_v61, %v2794_v61 }
 0x9e8   :  { %v2827_v29 = vmul.f32 %v2795_v46, %v2795_v46 }
 0x9e9   :  { %v2828_v55 = vmul.f32 %v2796_v37, %v2796_v37 }
 0x9ea   :  { %v2845_v45 = vpack.c.bf16 %v2827_v29, %v2825_v53 }
 0x9eb   :  { %v2846_v15 = vpack.c.bf16 %v2828_v55, %v2826_v33  ;;  %v2760_v44 = vpop.f32.mrb[108].mxu0 }
 0x9ec   :  { %v2797_v7 = vmax.f32 %v2760_v44, 0.0  ;;  %v2762_v58 = vpop.f32.mrb[109].mxu0 }
 0x9ed   :  { %v2798_v1 = vmax.f32 %v2762_v58, 0.0  ;;  %v2764_v14 = vpop.f32.mrb[110].mxu0  ;;  %3057 = vmatprep.mubr.bf16.mxu1 %v2846_v15 }
 0x9ee   :  { %v2799_v20 = vmax.f32 %v2764_v14, 0.0  ;;  %v2766_v34 = vpop.f32.mrb[111].mxu0  ;;  %3058 = vmatmul.mubr.bf16.gmra.mrb[88].mxu1 %v2845_v45  ;;  %v2829_v50 = vmul.f32 %v2797_v7, %v2797_v7 }
 0x9ef   :  { %v2800_v41 = vmax.f32 %v2766_v34, 0.0  ;;  %v2830_v62 = vmul.f32 %v2798_v1, %v2798_v1 }
 0x9f0   :  { %v2831_v3 = vmul.f32 %v2799_v20, %v2799_v20 }
 0x9f1   :  { %v2832_v25 = vmul.f32 %v2800_v41, %v2800_v41 }
 0x9f2   :  { %v2847_v4 = vpack.c.bf16 %v2831_v3, %v2829_v50 }
 0x9f3   :  { %v2848_v49 = vpack.c.bf16 %v2832_v25, %v2830_v62 }
 0x9f5   :  { %3065 = vmatprep.mubr.bf16.mxu1 %v2848_v49 }
 0x9f6   :  { %3066 = vmatmul.mubr.bf16.gmra.mrb[92].mxu1 %v2847_v4 }
 0xa91   :  { %v3371_v32 = vpop.f32.mrb[64].mxu1 }
 0xa92   :  { %v3372_v11 = vpop.f32.mrb[65].mxu1 }
 0xa93   :  { %v3373_v6 = vadd.f32 %v3372_v11, %v3371_v32  ;;  %v3374_v36 = vpop.f32.mrb[66].mxu1 }
 0xa94   :  { %v3375_v12 = vpop.f32.mrb[67].mxu1 }
 0xa95   :  { %v3074_v26 = vadd.f32 %v3373_v6, %v5778_v9  ;;  %v3376_v5 = vadd.f32 %v3375_v12, %v3374_v36 }
 0xa97   :  { %3090 = vst [vmem:[#allocation17] sm:$0xff] %v3074_v26  ;;  %v3075_v31 = vadd.f32 %v3376_v5, %v5782_v43 }
 0xa99   :  { %3091 = vst [vmem:[#allocation17 + $0x8] sm:$0xff] %v3075_v31  ;;  %v3377_v39 = vpop.f32.mrb[68].mxu1 }
 0xa9a   :  { %v3378_v59 = vpop.f32.mrb[69].mxu1 }
 0xa9b   :  { %v3379_v28 = vadd.f32 %v3378_v59, %v3377_v39  ;;  %v3380_v23 = vpop.f32.mrb[70].mxu1 }
 0xa9c   :  { %v3381_v54 = vpop.f32.mrb[71].mxu1 }
 0xa9d   :  { %v3076_v51 = vadd.f32 %v3379_v28, %v5780_v38  ;;  %v3382_v16 = vadd.f32 %v3381_v54, %v3380_v23 }
 0xa9f   :  { %3092 = vst [vmem:[#allocation17 + $0x10] sm:$0xff] %v3076_v51  ;;  %v3077_v10 = vadd.f32 %v3382_v16, %v5786_v27 }
 0xaa1   :  { %3093 = vst [vmem:[#allocation17 + $0x18] sm:$0xff] %v3077_v10  ;;  %v3383_v22 = vpop.f32.mrb[72].mxu1 }
 0xaa2   :  { %v3384_v13 = vpop.f32.mrb[73].mxu1 }
 0xaa3   :  { %v3385_v9 = vadd.f32 %v3384_v13, %v3383_v22  ;;  %v3386_v18 = vpop.f32.mrb[74].mxu1 }
 0xaa4   :  { %v3387_v35 = vpop.f32.mrb[75].mxu1 }
 0xaa5   :  { %v3078_v43 = vadd.f32 %v3385_v9, %v5792_v56  ;;  %v3388_v2 = vadd.f32 %v3387_v35, %v3386_v18 }
 0xaa7   :  { %3094 = vst [vmem:[#allocation17 + $0x20] sm:$0xff] %v3078_v43  ;;  %v3079_v8 = vadd.f32 %v3388_v2, %v5798_v19 }
 0xaa9   :  { %3095 = vst [vmem:[#allocation17 + $0x28] sm:$0xff] %v3079_v8  ;;  %v3389_v63 = vpop.f32.mrb[76].mxu1 }
 0xaaa   :  { %v3390_v61 = vpop.f32.mrb[77].mxu1 }
 0xaab   :  { %v3391_v38 = vadd.f32 %v3390_v61, %v3389_v63  ;;  %v3392_v30 = vpop.f32.mrb[78].mxu1 }
 0xaac   :  { %v3393_v46 = vpop.f32.mrb[79].mxu1 }
 0xaad   :  { %v3080_v27 = vadd.f32 %v3391_v38, %v5796_v0  ;;  %v3394_v21 = vadd.f32 %v3393_v46, %v3392_v30 }
 0xaaf   :  { %3096 = vst [vmem:[#allocation17 + $0x30] sm:$0xff] %v3080_v27  ;;  %v3081_v37 = vadd.f32 %v3394_v21, %v5802_v52 }
 0xab1   :  { %3097 = vst [vmem:[#allocation17 + $0x38] sm:$0xff] %v3081_v37  ;;  %v3395_v53 = vpop.f32.mrb[80].mxu1 }
 0xab2   :  { %v3396_v29 = vpop.f32.mrb[81].mxu1 }
 0xab3   :  { %v3397_v56 = vadd.f32 %v3396_v29, %v3395_v53  ;;  %v3398_v33 = vpop.f32.mrb[82].mxu1 }
 0xab4   :  { %v3399_v55 = vpop.f32.mrb[83].mxu1 }
 0xab5   :  { %v3082_v19 = vadd.f32 %v3397_v56, %v5808_v24  ;;  %v3400_v45 = vadd.f32 %v3399_v55, %v3398_v33 }
 0xab7   :  { %3098 = vst [vmem:[#allocation17 + $0x40] sm:$0xff] %v3082_v19  ;;  %v3083_v15 = vadd.f32 %v3400_v45, %v5814_v47 }
 0xab9   :  { %3099 = vst [vmem:[#allocation17 + $0x48] sm:$0xff] %v3083_v15  ;;  %v3401_v44 = vpop.f32.mrb[84].mxu1 }
 0xaba   :  { %v3402_v7 = vpop.f32.mrb[85].mxu1 }
 0xabb   :  { %v3403_v0 = vadd.f32 %v3402_v7, %v3401_v44  ;;  %v3404_v58 = vpop.f32.mrb[86].mxu1 }
 0xabc   :  { %v3405_v1 = vpop.f32.mrb[87].mxu1 }
 0xabd   :  { %v3084_v52 = vadd.f32 %v3403_v0, %v5812_v60  ;;  %v3406_v14 = vadd.f32 %v3405_v1, %v3404_v58 }
 0xabf   :  { %3100 = vst [vmem:[#allocation17 + $0x50] sm:$0xff] %v3084_v52  ;;  %v3085_v20 = vadd.f32 %v3406_v14, %v5818_v48 }
 0xac1   :  { %3101 = vst [vmem:[#allocation17 + $0x58] sm:$0xff] %v3085_v20  ;;  %v3407_v34 = vpop.f32.mrb[88].mxu1 }
 0xac2   :  { %v3408_v41 = vpop.f32.mrb[89].mxu1 }
 0xac3   :  { %v3409_v24 = vadd.f32 %v3408_v41, %v3407_v34  ;;  %v3410_v50 = vpop.f32.mrb[90].mxu1 }
 0xac4   :  { %v3411_v3 = vpop.f32.mrb[91].mxu1 }
 0xac5   :  { %v3086_v47 = vadd.f32 %v3409_v24, %v5826_v42  ;;  %v3412_v62 = vadd.f32 %v3411_v3, %v3410_v50 }
 0xac7   :  { %3102 = vst [vmem:[#allocation17 + $0x60] sm:$0xff] %v3086_v47  ;;  %v3087_v25 = vadd.f32 %v3412_v62, %v5830_v57 }
 0xac9   :  { %3103 = vst [vmem:[#allocation17 + $0x68] sm:$0xff] %v3087_v25  ;;  %v3413_v4 = vpop.f32.mrb[92].mxu1 }
 0xaca   :  { %v3414_v49 = vpop.f32.mrb[93].mxu1 }
 0xacb   :  { %v3415_v60 = vadd.f32 %v3414_v49, %v3413_v4  ;;  %v3416_v32 = vpop.f32.mrb[94].mxu1 }
 0xacc   :  { %v3417_v11 = vpop.f32.mrb[95].mxu1 }
 0xacd   :  { %v3088_v48 = vadd.f32 %v3415_v60, %v5828_v40  ;;  %v3418_v6 = vadd.f32 %v3417_v11, %v3416_v32 }
 0xacf   :  { %3104 = vst [vmem:[#allocation17 + $0x70] sm:$0xff] %v3088_v48  ;;  %v3089_v36 = vadd.f32 %v3418_v6, %v5834_v17 }
 0xad1   :  { %3105 = vst [vmem:[#allocation17 + $0x78] sm:$0xff] %v3089_v36 }
 0xad2   :  { %4381 = shalt.err (!%p4378_p6)
}
 0xad3   :  { %s4382_s26 = scalar_lea.hbm %s5907_s11, 2048 }
 0xad4   :  { %p4383_p7 = scmp.ne.s32.totalorder %s5907_s11, %s4382_s26  ;;  %p4386_p8 = scmp.lt.u32.totalorder %s4382_s26, %s5907_s11 }
 0xad6   :  { %p4388_p9 = pnand %p4386_p8, %p4383_p7 }
 0xad8   :  { %4391 = shalt.err (!%p4388_p9)
}
 0xad9   :  { %3117 = dma.vmem_to_hbm [thread:$0]  %s3112_s30, 2048, %s5907_s11, [#allocation4], %s4409_s18, %s4409_s18, %s4410_s24  }
 0xada   :  { %4402 = dma.done.wait [#allocation4], 2048  }
 0xadb   :  { %4403 = vsyncadd [#allocation4], 4294965248 }
 0xadc   :  { %3121 = vsyncpa [#allocation3], 1 }
 0xadd   :  { %3122 = vsyncpa [#allocation6], 1 }
 0xade   :  { %3123 = vsyncpa [#allocation9], 1 }
 0xadf   :  { %3124 = vsyncpa [#allocation12], 1 }
 0xae0   :  { %3125 = vsyncpa [#allocation15], 1 }
 0xae1   :  { %3126 = vsyncpa [#allocation4], 1 }

</bundles_post_ra>
